<compile_context>
chip_gen: v7x
topology: tpu7x:2x2x1
jax: 0.10.0
libtpu: 0.0.40
codegen_flags: <defaults>
</compile_context>

<pallas_src>
import functools
import math

import jax
import jax.numpy as jnp
from jax.experimental import pallas as pl
from jax.experimental.pallas import tpu as pltpu


# MXU operand dtype (accumulation is always fp32; elementwise math stays fp32,
# which also matches v5e's fp32-only VPU/EUP).  Use jnp.float32 for exact fp32.
MXU_DTYPE = jnp.bfloat16


def _layer_norm(y, g, b, eps):
    """Row-wise LayerNorm over the last (lane) axis; statistics in fp32."""
    mu = jnp.mean(y, axis=-1, keepdims=True)
    var = jnp.mean((y - mu) * (y - mu), axis=-1, keepdims=True)
    return (y - mu) * jax.lax.rsqrt(var + eps) * g + b


# ----------------------------- Pallas kernels ------------------------------ #

def _mha_block_kernel(q_in_ref, kv_in_ref, wq_ref, bq_ref, wkv_ref, bkv_ref,
                      wo_ref, bo_ref, g_ref, bln_ref, o_ref,
                      *, nhead, scale, eps):
    """Fused MHA block for one batch element.

    out = LayerNorm( q_in + OutProj( SDPA( QProj(q_in), KVProj(kv_in) ) ) )
    q_in_ref: (1, L, E), kv_in_ref: (1, S, E), o_ref: (1, L, E).
    """
    x_q = q_in_ref[0]            # (L, E) fp32 -- also the residual
    x_kv = kv_in_ref[0]          # (S, E)
    L, E = x_q.shape
    Dh = E // nhead

    # Fused projections: one lane-dense dot for Q (E wide) and one for K|V (2E wide).
    q = jnp.dot(x_q.astype(MXU_DTYPE), wq_ref[...].astype(MXU_DTYPE),
                preferred_element_type=jnp.float32) + bq_ref[...]        # (L, E)
    kv = jnp.dot(x_kv.astype(MXU_DTYPE), wkv_ref[...].astype(MXU_DTYPE),
                 preferred_element_type=jnp.float32) + bkv_ref[...]      # (S, 2E)
    k = kv[:, :E]
    v = kv[:, E:]

    # All heads handled inside this single grid step (static unroll over heads);
    # the (L, S) score matrix keeps S on the lane axis.  Output projection is
    # accumulated per head (avoids an in-kernel lane concat).
    y = jnp.zeros((L, E), jnp.float32)
    for h in range(nhead):
        sl = slice(h * Dh, (h + 1) * Dh)
        qh = q[:, sl]                                    # (L, Dh)
        kh = k[:, sl]                                    # (S, Dh)
        vh = v[:, sl]                                    # (S, Dh)
        s = jax.lax.dot_general(
            qh.astype(MXU_DTYPE), kh.astype(MXU_DTYPE),
            (((1,), (1,)), ((), ())),
            preferred_element_type=jnp.float32) * scale  # (L, S)
        s = s - jnp.max(s, axis=-1, keepdims=True)
        e = jnp.exp(s)
        probs = e * pl.reciprocal(jnp.sum(e, axis=-1, keepdims=True), approx=True)
        ctx = jnp.dot(probs.astype(MXU_DTYPE), vh.astype(MXU_DTYPE),
                      preferred_element_type=jnp.float32)               # (L, Dh)
        wo_h = wo_ref[h * Dh:(h + 1) * Dh, :]            # (Dh, E) sublane-aligned
        y = y + jnp.dot(ctx.astype(MXU_DTYPE), wo_h.astype(MXU_DTYPE),
                        preferred_element_type=jnp.float32)

    # Output-proj bias + residual + LayerNorm epilogue (stays in VMEM).
    y = y + bo_ref[...] + x_q
    o_ref[0] = _layer_norm(y, g_ref[...], bln_ref[...], eps).astype(o_ref.dtype)


def _ffn_block_kernel(x_ref, w1_ref, b1_ref, w2_ref, b2_ref, g_ref, bln_ref,
                      o_ref, *, eps):
    """out = LayerNorm(x + lin2(relu(lin1(x)))) for one batch element."""
    x = x_ref[0]                                         # (L, E) -- residual
    h = jnp.dot(x.astype(MXU_DTYPE), w1_ref[...].astype(MXU_DTYPE),
                preferred_element_type=jnp.float32) + b1_ref[...]        # (L, F)
    h = jnp.maximum(h, 0.0)
    y = jnp.dot(h.astype(MXU_DTYPE), w2_ref[...].astype(MXU_DTYPE),
                preferred_element_type=jnp.float32) + b2_ref[...]        # (L, E)
    o_ref[0] = _layer_norm(y + x, g_ref[...], bln_ref[...], eps).astype(o_ref.dtype)


def _layernorm_kernel(x_ref, g_ref, b_ref, o_ref, *, eps):
    """Plain LayerNorm (no residual) for one batch element."""
    o_ref[0] = _layer_norm(x_ref[0], g_ref[...], b_ref[...], eps).astype(o_ref.dtype)


# ------------------------------ Pallas wrappers ----------------------------- #

_PARALLEL_BATCH = pltpu.CompilerParams(dimension_semantics=("parallel",))


def mha_block(q_in, kv_in, p, gamma, beta, nhead, eps=1e-5):
    """Fused MultiheadAttention + residual + LayerNorm.
    q_in: (N, L, E), kv_in: (N, S, E) -> (N, L, E)."""
    N, L, E = q_in.shape
    S = kv_in.shape[1]
    Dh = E // nhead
    scale = 1.0 / math.sqrt(Dh)

    # Split the packed in-projection once at trace time (free).
    wq = p["in_w"][:, :E]                    # (E, E)
    wkv = p["in_w"][:, E:]                   # (E, 2E)
    bq = p["in_b"][:E].reshape(1, E)
    bkv = p["in_b"][E:].reshape(1, 2 * E)

    kernel = functools.partial(_mha_block_kernel, nhead=nhead, scale=scale, eps=eps)
    return pl.pallas_call(
        kernel,
        out_shape=jax.ShapeDtypeStruct((N, L, E), jnp.float32),
        grid=(N,),
        in_specs=[
            pl.BlockSpec((1, L, E), lambda b: (b, 0, 0)),       # q_in
            pl.BlockSpec((1, S, E), lambda b: (b, 0, 0)),       # kv_in
            pl.BlockSpec((E, E), lambda b: (0, 0)),             # wq
            pl.BlockSpec((1, E), lambda b: (0, 0)),             # bq
            pl.BlockSpec((E, 2 * E), lambda b: (0, 0)),         # wkv
            pl.BlockSpec((1, 2 * E), lambda b: (0, 0)),         # bkv
            pl.BlockSpec((E, E), lambda b: (0, 0)),             # wo
            pl.BlockSpec((1, E), lambda b: (0, 0)),             # bo
            pl.BlockSpec((1, E), lambda b: (0, 0)),             # gamma
            pl.BlockSpec((1, E), lambda b: (0, 0)),             # beta
        ],
        out_specs=pl.BlockSpec((1, L, E), lambda b: (b, 0, 0)),
        compiler_params=_PARALLEL_BATCH,
    )(q_in, kv_in, wq, bq, wkv, bkv,
      p["out_w"], p["out_b"].reshape(1, E),
      gamma.reshape(1, E), beta.reshape(1, E))


def ffn_block(x, p, gamma, beta, eps=1e-5):
    """Fused lin1+relu+lin2 + residual + LayerNorm.  x: (N, L, E) -> (N, L, E)."""
    N, L, E = x.shape
    F = p["lin1_w"].shape[1]
    kernel = functools.partial(_ffn_block_kernel, eps=eps)
    return pl.pallas_call(
        kernel,
        out_shape=jax.ShapeDtypeStruct((N, L, E), jnp.float32),
        grid=(N,),
        in_specs=[
            pl.BlockSpec((1, L, E), lambda b: (b, 0, 0)),       # x
            pl.BlockSpec((E, F), lambda b: (0, 0)),             # w1
            pl.BlockSpec((1, F), lambda b: (0, 0)),             # b1
            pl.BlockSpec((F, E), lambda b: (0, 0)),             # w2
            pl.BlockSpec((1, E), lambda b: (0, 0)),             # b2
            pl.BlockSpec((1, E), lambda b: (0, 0)),             # gamma
            pl.BlockSpec((1, E), lambda b: (0, 0)),             # beta
        ],
        out_specs=pl.BlockSpec((1, L, E), lambda b: (b, 0, 0)),
        compiler_params=_PARALLEL_BATCH,
    )(x, p["lin1_w"], p["lin1_b"].reshape(1, F),
      p["lin2_w"], p["lin2_b"].reshape(1, E),
      gamma.reshape(1, E), beta.reshape(1, E))


def layernorm(x, gamma, beta, eps=1e-5):
    """Plain LayerNorm over the feature axis.  x: (N, L, E) -> (N, L, E)."""
    N, L, E = x.shape
    kernel = functools.partial(_layernorm_kernel, eps=eps)
    return pl.pallas_call(
        kernel,
        out_shape=jax.ShapeDtypeStruct((N, L, E), jnp.float32),
        grid=(N,),
        in_specs=[
            pl.BlockSpec((1, L, E), lambda b: (b, 0, 0)),
            pl.BlockSpec((1, E), lambda b: (0, 0)),
            pl.BlockSpec((1, E), lambda b: (0, 0)),
        ],
        out_specs=pl.BlockSpec((1, L, E), lambda b: (b, 0, 0)),
        compiler_params=_PARALLEL_BATCH,
    )(x, gamma.reshape(1, E), beta.reshape(1, E))


# --------------------------- model building blocks -------------------------- #

def encoder_layer_fwd(src, p, nhead):
    """src: (N, S, E) -> (N, S, E) (post-norm, torch semantics, eval mode)."""
    x = mha_block(src, src, p["sa"], p["ln1"]["g"], p["ln1"]["b"], nhead)
    x = ffn_block(x, p, p["ln2"]["g"], p["ln2"]["b"])
    return x


def decoder_layer_fwd(tgt, memory, p, nhead):
    """tgt: (N, T, E), memory: (N, S, E) -> (N, T, E)."""
    x = mha_block(tgt, tgt, p["sa"], p["ln1"]["g"], p["ln1"]["b"], nhead)
    x = mha_block(x, memory, p["ca"], p["ln2"]["g"], p["ln2"]["b"], nhead)
    x = ffn_block(x, p, p["ln3"]["g"], p["ln3"]["b"])
    return x


@functools.partial(jax.jit, static_argnames=("nhead",))
def transformer_forward(src, tgt, params, nhead):
    """src: (S, N, E), tgt: (T, N, E) -> (output (T, N, E), memory (S, N, E))."""
    # Internal layout is batch-first; only the boundaries transpose.
    memory = jnp.transpose(src, (1, 0, 2))            # (N, S, E)
    out = jnp.transpose(tgt, (1, 0, 2))               # (N, T, E)

    for p in params["enc"]:
        memory = encoder_layer_fwd(memory, p, nhead)
    memory = layernorm(memory, params["enc_norm"]["g"], params["enc_norm"]["b"])

    for p in params["dec"]:
        out = decoder_layer_fwd(out, memory, p, nhead)
    out = layernorm(out, params["dec_norm"]["g"], params["dec_norm"]["b"])

    return jnp.transpose(out, (1, 0, 2)), jnp.transpose(memory, (1, 0, 2))


# ----------------------------- parameter init ------------------------------ #

def init_transformer_params(key, E, H, F, n_enc, n_dec):
    keys = iter(jax.random.split(key, 256))

    def xavier(shape):
        fan_in, fan_out = shape
        a = math.sqrt(6.0 / (fan_in + fan_out))
        return jax.random.uniform(next(keys), shape, jnp.float32, -a, a)

    def mha_p():
        return dict(in_w=xavier((E, 3 * E)), in_b=jnp.zeros((3 * E,), jnp.float32),
                    out_w=xavier((E, E)), out_b=jnp.zeros((E,), jnp.float32))

    def ln_p():
        return dict(g=jnp.ones((E,), jnp.float32), b=jnp.zeros((E,), jnp.float32))

    def enc_layer():
        return dict(sa=mha_p(),
                    lin1_w=xavier((E, F)), lin1_b=jnp.zeros((F,), jnp.float32),
                    lin2_w=xavier((F, E)), lin2_b=jnp.zeros((E,), jnp.float32),
                    ln1=ln_p(), ln2=ln_p())

    def dec_layer():
        return dict(sa=mha_p(), ca=mha_p(),
                    lin1_w=xavier((E, F)), lin1_b=jnp.zeros((F,), jnp.float32),
                    lin2_w=xavier((F, E)), lin2_b=jnp.zeros((E,), jnp.float32),
                    ln1=ln_p(), ln2=ln_p(), ln3=ln_p())

    return dict(enc=[enc_layer() for _ in range(n_enc)],
                dec=[dec_layer() for _ in range(n_dec)],
                enc_norm=ln_p(), dec_norm=ln_p())


# ---------------------------------- main ----------------------------------- #

if __name__ == "__main__":
    d_model, nhead, dim_ff = 32, 4, 64
    num_enc, num_dec = 2, 2
    S, T, N = 8, 6, 2   # src len, tgt len, batch

    root = jax.random.PRNGKey(0)
    k_params, k_src, k_tgt = jax.random.split(root, 3)

    params = init_transformer_params(k_params, d_model, nhead, dim_ff, num_enc, num_dec)
    src = jax.random.normal(k_src, (S, N, d_model), jnp.float32)
    tgt = jax.random.normal(k_tgt, (T, N, d_model), jnp.float32)

    output, memory = transformer_forward(src, tgt, params, nhead=nhead)
    jax.block_until_ready((output, memory))

    assert output.shape == (T, N, d_model), output.shape
    assert memory.shape == (S, N, d_model), memory.shape
    assert jnp.all(jnp.isfinite(output)) and jnp.all(jnp.isfinite(memory))
    print("KERNEL_OK")
</pallas_src>

<mosaic_0001>
module attributes {stable_mosaic.version = 11 : i64} {
  func.func @_layernorm_kernel(%arg0: i32, %arg1: memref<1x8x32xf32, #tpu.memory_space<vmem>>, %arg2: memref<1x32xf32, #tpu.memory_space<vmem>>, %arg3: memref<1x32xf32, #tpu.memory_space<vmem>>, %arg4: memref<1x8x32xf32, #tpu.memory_space<vmem>>) attributes {dimension_semantics = [#tpu.dimension_semantics<parallel>], iteration_bounds = array<i64: 2>, scalar_prefetch = 0 : i64, scratch_operands = 0 : i64, tpu.core_type = #tpu.core_type<tc>, window_params = [{transform_indices = @transform_0, window_bounds = array<i64: 1, 8, 32>}, {pipeline_mode = #tpu.pipeline_mode<synchronous>, transform_indices = @transform_1, window_bounds = array<i64: 1, 32>}, {pipeline_mode = #tpu.pipeline_mode<synchronous>, transform_indices = @transform_2, window_bounds = array<i64: 1, 32>}, {transform_indices = @transform_3, window_bounds = array<i64: 1, 8, 32>}]} {
    %c0 = arith.constant 0 : index
    %c0_0 = arith.constant 0 : index
    %c0_1 = arith.constant 0 : index
    %0 = vector.load %arg1[%c0, %c0_0, %c0_1] : memref<1x8x32xf32, #tpu.memory_space<vmem>>, vector<1x8x32xf32>
    %1 = vector.shape_cast %0 : vector<1x8x32xf32> to vector<8x32xf32>
    %c0_2 = arith.constant 0 : index
    %c0_3 = arith.constant 0 : index
    %2 = vector.load %arg2[%c0_2, %c0_3] : memref<1x32xf32, #tpu.memory_space<vmem>>, vector<1x32xf32>
    %c0_4 = arith.constant 0 : index
    %c0_5 = arith.constant 0 : index
    %3 = vector.load %arg3[%c0_4, %c0_5] : memref<1x32xf32, #tpu.memory_space<vmem>>, vector<1x32xf32>
    %cst = arith.constant dense<0.000000e+00> : vector<8xf32>
    %4 = vector.multi_reduction <add>, %1, %cst [1] : vector<8x32xf32> to vector<8xf32>
    %5 = vector.shape_cast %4 : vector<8xf32> to vector<8x1xf32>
    %cst_6 = arith.constant 3.200000e+01 : f32
    %6 = vector.broadcast %cst_6 : f32 to vector<8x1xf32>
    %7 = arith.divf %5, %6 : vector<8x1xf32>
    %8 = vector.broadcast %7 : vector<8x1xf32> to vector<8x32xf32>
    %9 = arith.subf %1, %8 : vector<8x32xf32>
    %10 = vector.broadcast %7 : vector<8x1xf32> to vector<8x32xf32>
    %11 = arith.subf %1, %10 : vector<8x32xf32>
    %12 = arith.mulf %9, %11 : vector<8x32xf32>
    %cst_7 = arith.constant dense<0.000000e+00> : vector<8xf32>
    %13 = vector.multi_reduction <add>, %12, %cst_7 [1] : vector<8x32xf32> to vector<8xf32>
    %14 = vector.shape_cast %13 : vector<8xf32> to vector<8x1xf32>
    %cst_8 = arith.constant 3.200000e+01 : f32
    %15 = vector.broadcast %cst_8 : f32 to vector<8x1xf32>
    %16 = arith.divf %14, %15 : vector<8x1xf32>
    %17 = vector.broadcast %7 : vector<8x1xf32> to vector<8x32xf32>
    %18 = arith.subf %1, %17 : vector<8x32xf32>
    %cst_9 = arith.constant 9.99999974E-6 : f32
    %19 = vector.broadcast %cst_9 : f32 to vector<8x1xf32>
    %20 = arith.addf %16, %19 : vector<8x1xf32>
    %21 = math.rsqrt %20 : vector<8x1xf32>
    %22 = vector.broadcast %21 : vector<8x1xf32> to vector<8x32xf32>
    %23 = arith.mulf %18, %22 : vector<8x32xf32>
    %24 = vector.broadcast %2 : vector<1x32xf32> to vector<8x32xf32>
    %25 = arith.mulf %23, %24 : vector<8x32xf32>
    %26 = vector.broadcast %3 : vector<1x32xf32> to vector<8x32xf32>
    %27 = arith.addf %25, %26 : vector<8x32xf32>
    %c0_10 = arith.constant 0 : index
    %c0_11 = arith.constant 0 : index
    %c0_12 = arith.constant 0 : index
    %28 = vector.load %arg4[%c0_10, %c0_11, %c0_12] : memref<1x8x32xf32, #tpu.memory_space<vmem>>, vector<1x8x32xf32>
    %29 = vector.shape_cast %28 : vector<1x8x32xf32> to vector<8x32xf32>
    %30 = vector.shape_cast %27 : vector<8x32xf32> to vector<1x8x32xf32>
    tpu.vector_store %arg4[%c0_10, %c0_11, %c0_12], %30 {strides = array<i32>} : memref<1x8x32xf32, #tpu.memory_space<vmem>>, vector<1x8x32xf32>,
    return
  }
  func.func @transform_0(%arg0: i32) -> (i32, i32, i32) {
    %c0_i32 = arith.constant 0 : i32
    %c0_i32_0 = arith.constant 0 : i32
    %c0_i32_1 = arith.constant 0 : i32
    return %arg0, %c0_i32, %c0_i32_0 : i32, i32, i32
  }
  func.func @transform_1(%arg0: i32) -> (i32, i32) {
    %c0_i32 = arith.constant 0 : i32
    %c0_i32_0 = arith.constant 0 : i32
    %c0_i32_1 = arith.constant 0 : i32
    return %c0_i32, %c0_i32_0 : i32, i32
  }
  func.func @transform_2(%arg0: i32) -> (i32, i32) {
    %c0_i32 = arith.constant 0 : i32
    %c0_i32_0 = arith.constant 0 : i32
    %c0_i32_1 = arith.constant 0 : i32
    return %c0_i32, %c0_i32_0 : i32, i32
  }
  func.func @transform_3(%arg0: i32) -> (i32, i32, i32) {
    %c0_i32 = arith.constant 0 : i32
    %c0_i32_0 = arith.constant 0 : i32
    %c0_i32_1 = arith.constant 0 : i32
    return %arg0, %c0_i32, %c0_i32_0 : i32, i32, i32
  }
}

module attributes {stable_mosaic.version = 11 : i64} {
  func.func @_ffn_block_kernel(%arg0: i32, %arg1: memref<1x8x32xf32, #tpu.memory_space<vmem>>, %arg2: memref<32x64xf32, #tpu.memory_space<vmem>>, %arg3: memref<1x64xf32, #tpu.memory_space<vmem>>, %arg4: memref<64x32xf32, #tpu.memory_space<vmem>>, %arg5: memref<1x32xf32, #tpu.memory_space<vmem>>, %arg6: memref<1x32xf32, #tpu.memory_space<vmem>>, %arg7: memref<1x32xf32, #tpu.memory_space<vmem>>, %arg8: memref<1x8x32xf32, #tpu.memory_space<vmem>>) attributes {dimension_semantics = [#tpu.dimension_semantics<parallel>], iteration_bounds = array<i64: 2>, scalar_prefetch = 0 : i64, scratch_operands = 0 : i64, tpu.core_type = #tpu.core_type<tc>, window_params = [{transform_indices = @transform_0, window_bounds = array<i64: 1, 8, 32>}, {pipeline_mode = #tpu.pipeline_mode<synchronous>, transform_indices = @transform_1, window_bounds = array<i64: 32, 64>}, {pipeline_mode = #tpu.pipeline_mode<synchronous>, transform_indices = @transform_2, window_bounds = array<i64: 1, 64>}, {pipeline_mode = #tpu.pipeline_mode<synchronous>, transform_indices = @transform_3, window_bounds = array<i64: 64, 32>}, {pipeline_mode = #tpu.pipeline_mode<synchronous>, transform_indices = @transform_4, window_bounds = array<i64: 1, 32>}, {pipeline_mode = #tpu.pipeline_mode<synchronous>, transform_indices = @transform_5, window_bounds = array<i64: 1, 32>}, {pipeline_mode = #tpu.pipeline_mode<synchronous>, transform_indices = @transform_6, window_bounds = array<i64: 1, 32>}, {transform_indices = @transform_7, window_bounds = array<i64: 1, 8, 32>}]} {
    %c0 = arith.constant 0 : index
    %c0_0 = arith.constant 0 : index
    %c0_1 = arith.constant 0 : index
    %0 = vector.load %arg1[%c0, %c0_0, %c0_1] : memref<1x8x32xf32, #tpu.memory_space<vmem>>, vector<1x8x32xf32>
    %1 = vector.shape_cast %0 : vector<1x8x32xf32> to vector<8x32xf32>
    %2 = arith.truncf %1 : vector<8x32xf32> to vector<8x32xbf16>
    %c0_2 = arith.constant 0 : index
    %c0_3 = arith.constant 0 : index
    %3 = vector.load %arg2[%c0_2, %c0_3] : memref<32x64xf32, #tpu.memory_space<vmem>>, vector<32x64xf32>
    %4 = arith.truncf %3 : vector<32x64xf32> to vector<32x64xbf16>
    %cst = arith.constant dense<0.000000e+00> : vector<8x64xf32>
    %5 = tpu.matmul %2, %4, %cst {dimension_numbers = #tpu.dot_dimension_numbers<[1], [0], [0], [1], [0, 0, 1, 1], [], []>} : vector<8x32xbf16>, vector<32x64xbf16>, vector<8x64xf32> -> vector<8x64xf32>
    %c0_4 = arith.constant 0 : index
    %c0_5 = arith.constant 0 : index
    %6 = vector.load %arg3[%c0_4, %c0_5] : memref<1x64xf32, #tpu.memory_space<vmem>>, vector<1x64xf32>
    %7 = vector.broadcast %6 : vector<1x64xf32> to vector<8x64xf32>
    %8 = arith.addf %5, %7 : vector<8x64xf32>
    %cst_6 = arith.constant 0.000000e+00 : f32
    %9 = vector.broadcast %cst_6 : f32 to vector<8x64xf32>
    %10 = arith.maximumf %8, %9 : vector<8x64xf32>
    %11 = arith.truncf %10 : vector<8x64xf32> to vector<8x64xbf16>
    %c0_7 = arith.constant 0 : index
    %c0_8 = arith.constant 0 : index
    %12 = vector.load %arg4[%c0_7, %c0_8] : memref<64x32xf32, #tpu.memory_space<vmem>>, vector<64x32xf32>
    %13 = arith.truncf %12 : vector<64x32xf32> to vector<64x32xbf16>
    %cst_9 = arith.constant dense<0.000000e+00> : vector<8x32xf32>
    %14 = tpu.matmul %11, %13, %cst_9 {dimension_numbers = #tpu.dot_dimension_numbers<[1], [0], [0], [1], [0, 0, 1, 1], [], []>} : vector<8x64xbf16>, vector<64x32xbf16>, vector<8x32xf32> -> vector<8x32xf32>
    %c0_10 = arith.constant 0 : index
    %c0_11 = arith.constant 0 : index
    %15 = vector.load %arg5[%c0_10, %c0_11] : memref<1x32xf32, #tpu.memory_space<vmem>>, vector<1x32xf32>
    %16 = vector.broadcast %15 : vector<1x32xf32> to vector<8x32xf32>
    %17 = arith.addf %14, %16 : vector<8x32xf32>
    %18 = arith.addf %17, %1 : vector<8x32xf32>
    %c0_12 = arith.constant 0 : index
    %c0_13 = arith.constant 0 : index
    %19 = vector.load %arg6[%c0_12, %c0_13] : memref<1x32xf32, #tpu.memory_space<vmem>>, vector<1x32xf32>
    %c0_14 = arith.constant 0 : index
    %c0_15 = arith.constant 0 : index
    %20 = vector.load %arg7[%c0_14, %c0_15] : memref<1x32xf32, #tpu.memory_space<vmem>>, vector<1x32xf32>
    %cst_16 = arith.constant dense<0.000000e+00> : vector<8xf32>
    %21 = vector.multi_reduction <add>, %18, %cst_16 [1] : vector<8x32xf32> to vector<8xf32>
    %22 = vector.shape_cast %21 : vector<8xf32> to vector<8x1xf32>
    %cst_17 = arith.constant 3.200000e+01 : f32
    %23 = vector.broadcast %cst_17 : f32 to vector<8x1xf32>
    %24 = arith.divf %22, %23 : vector<8x1xf32>
    %25 = vector.broadcast %24 : vector<8x1xf32> to vector<8x32xf32>
    %26 = arith.subf %18, %25 : vector<8x32xf32>
    %27 = vector.broadcast %24 : vector<8x1xf32> to vector<8x32xf32>
    %28 = arith.subf %18, %27 : vector<8x32xf32>
    %29 = arith.mulf %26, %28 : vector<8x32xf32>
    %cst_18 = arith.constant dense<0.000000e+00> : vector<8xf32>
    %30 = vector.multi_reduction <add>, %29, %cst_18 [1] : vector<8x32xf32> to vector<8xf32>
    %31 = vector.shape_cast %30 : vector<8xf32> to vector<8x1xf32>
    %cst_19 = arith.constant 3.200000e+01 : f32
    %32 = vector.broadcast %cst_19 : f32 to vector<8x1xf32>
    %33 = arith.divf %31, %32 : vector<8x1xf32>
    %34 = vector.broadcast %24 : vector<8x1xf32> to vector<8x32xf32>
    %35 = arith.subf %18, %34 : vector<8x32xf32>
    %cst_20 = arith.constant 9.99999974E-6 : f32
    %36 = vector.broadcast %cst_20 : f32 to vector<8x1xf32>
    %37 = arith.addf %33, %36 : vector<8x1xf32>
    %38 = math.rsqrt %37 : vector<8x1xf32>
    %39 = vector.broadcast %38 : vector<8x1xf32> to vector<8x32xf32>
    %40 = arith.mulf %35, %39 : vector<8x32xf32>
    %41 = vector.broadcast %19 : vector<1x32xf32> to vector<8x32xf32>
    %42 = arith.mulf %40, %41 : vector<8x32xf32>
    %43 = vector.broadcast %20 : vector<1x32xf32> to vector<8x32xf32>
    %44 = arith.addf %42, %43 : vector<8x32xf32>
    %c0_21 = arith.constant 0 : index
    %c0_22 = arith.constant 0 : index
    %c0_23 = arith.constant 0 : index
    %45 = vector.load %arg8[%c0_21, %c0_22, %c0_23] : memref<1x8x32xf32, #tpu.memory_space<vmem>>, vector<1x8x32xf32>
    %46 = vector.shape_cast %45 : vector<1x8x32xf32> to vector<8x32xf32>
    %47 = vector.shape_cast %44 : vector<8x32xf32> to vector<1x8x32xf32>
    tpu.vector_store %arg8[%c0_21, %c0_22, %c0_23], %47 {strides = array<i32>} : memref<1x8x32xf32, #tpu.memory_space<vmem>>, vector<1x8x32xf32>,
    return
  }
  func.func @transform_0(%arg0: i32) -> (i32, i32, i32) {
    %c0_i32 = arith.constant 0 : i32
    %c0_i32_0 = arith.constant 0 : i32
    %c0_i32_1 = arith.constant 0 : i32
    return %arg0, %c0_i32, %c0_i32_0 : i32, i32, i32
  }
  func.func @transform_1(%arg0: i32) -> (i32, i32) {
    %c0_i32 = arith.constant 0 : i32
    %c0_i32_0 = arith.constant 0 : i32
    %c0_i32_1 = arith.constant 0 : i32
    return %c0_i32, %c0_i32_0 : i32, i32
  }
  func.func @transform_2(%arg0: i32) -> (i32, i32) {
    %c0_i32 = arith.constant 0 : i32
    %c0_i32_0 = arith.constant 0 : i32
    %c0_i32_1 = arith.constant 0 : i32
    return %c0_i32, %c0_i32_0 : i32, i32
  }
  func.func @transform_3(%arg0: i32) -> (i32, i32) {
    %c0_i32 = arith.constant 0 : i32
    %c0_i32_0 = arith.constant 0 : i32
    %c0_i32_1 = arith.constant 0 : i32
    return %c0_i32, %c0_i32_0 : i32, i32
  }
  func.func @transform_4(%arg0: i32) -> (i32, i32) {
    %c0_i32 = arith.constant 0 : i32
    %c0_i32_0 = arith.constant 0 : i32
    %c0_i32_1 = arith.constant 0 : i32
    return %c0_i32, %c0_i32_0 : i32, i32
  }
  func.func @transform_5(%arg0: i32) -> (i32, i32) {
    %c0_i32 = arith.constant 0 : i32
    %c0_i32_0 = arith.constant 0 : i32
    %c0_i32_1 = arith.constant 0 : i32
    return %c0_i32, %c0_i32_0 : i32, i32
  }
  func.func @transform_6(%arg0: i32) -> (i32, i32) {
    %c0_i32 = arith.constant 0 : i32
    %c0_i32_0 = arith.constant 0 : i32
    %c0_i32_1 = arith.constant 0 : i32
    return %c0_i32, %c0_i32_0 : i32, i32
  }
  func.func @transform_7(%arg0: i32) -> (i32, i32, i32) {
    %c0_i32 = arith.constant 0 : i32
    %c0_i32_0 = arith.constant 0 : i32
    %c0_i32_1 = arith.constant 0 : i32
    return %arg0, %c0_i32, %c0_i32_0 : i32, i32, i32
  }
}

module attributes {stable_mosaic.version = 11 : i64} {
  func.func @_mha_block_kernel(%arg0: i32, %arg1: memref<1x8x32xf32, #tpu.memory_space<vmem>>, %arg2: memref<1x8x32xf32, #tpu.memory_space<vmem>>, %arg3: memref<32x32xf32, #tpu.memory_space<vmem>>, %arg4: memref<1x32xf32, #tpu.memory_space<vmem>>, %arg5: memref<32x64xf32, #tpu.memory_space<vmem>>, %arg6: memref<1x64xf32, #tpu.memory_space<vmem>>, %arg7: memref<32x32xf32, #tpu.memory_space<vmem>>, %arg8: memref<1x32xf32, #tpu.memory_space<vmem>>, %arg9: memref<1x32xf32, #tpu.memory_space<vmem>>, %arg10: memref<1x32xf32, #tpu.memory_space<vmem>>, %arg11: memref<1x8x32xf32, #tpu.memory_space<vmem>>) attributes {dimension_semantics = [#tpu.dimension_semantics<parallel>], iteration_bounds = array<i64: 2>, scalar_prefetch = 0 : i64, scratch_operands = 0 : i64, tpu.core_type = #tpu.core_type<tc>, window_params = [{transform_indices = @transform_0, window_bounds = array<i64: 1, 8, 32>}, {transform_indices = @transform_1, window_bounds = array<i64: 1, 8, 32>}, {pipeline_mode = #tpu.pipeline_mode<synchronous>, transform_indices = @transform_2, window_bounds = array<i64: 32, 32>}, {pipeline_mode = #tpu.pipeline_mode<synchronous>, transform_indices = @transform_3, window_bounds = array<i64: 1, 32>}, {pipeline_mode = #tpu.pipeline_mode<synchronous>, transform_indices = @transform_4, window_bounds = array<i64: 32, 64>}, {pipeline_mode = #tpu.pipeline_mode<synchronous>, transform_indices = @transform_5, window_bounds = array<i64: 1, 64>}, {pipeline_mode = #tpu.pipeline_mode<synchronous>, transform_indices = @transform_6, window_bounds = array<i64: 32, 32>}, {pipeline_mode = #tpu.pipeline_mode<synchronous>, transform_indices = @transform_7, window_bounds = array<i64: 1, 32>}, {pipeline_mode = #tpu.pipeline_mode<synchronous>, transform_indices = @transform_8, window_bounds = array<i64: 1, 32>}, {pipeline_mode = #tpu.pipeline_mode<synchronous>, transform_indices = @transform_9, window_bounds = array<i64: 1, 32>}, {transform_indices = @transform_10, window_bounds = array<i64: 1, 8, 32>}]} {
    %c0 = arith.constant 0 : index
    %c0_0 = arith.constant 0 : index
    %c0_1 = arith.constant 0 : index
    %0 = vector.load %arg1[%c0, %c0_0, %c0_1] : memref<1x8x32xf32, #tpu.memory_space<vmem>>, vector<1x8x32xf32>
    %1 = vector.shape_cast %0 : vector<1x8x32xf32> to vector<8x32xf32>
    %c0_2 = arith.constant 0 : index
    %c0_3 = arith.constant 0 : index
    %c0_4 = arith.constant 0 : index
    %2 = vector.load %arg2[%c0_2, %c0_3, %c0_4] : memref<1x8x32xf32, #tpu.memory_space<vmem>>, vector<1x8x32xf32>
    %3 = vector.shape_cast %2 : vector<1x8x32xf32> to vector<8x32xf32>
    %4 = arith.truncf %1 : vector<8x32xf32> to vector<8x32xbf16>
    %c0_5 = arith.constant 0 : index
    %c0_6 = arith.constant 0 : index
    %5 = vector.load %arg3[%c0_5, %c0_6] : memref<32x32xf32, #tpu.memory_space<vmem>>, vector<32x32xf32>
    %6 = arith.truncf %5 : vector<32x32xf32> to vector<32x32xbf16>
    %cst = arith.constant dense<0.000000e+00> : vector<8x32xf32>
    %7 = tpu.matmul %4, %6, %cst {dimension_numbers = #tpu.dot_dimension_numbers<[1], [0], [0], [1], [0, 0, 1, 1], [], []>} : vector<8x32xbf16>, vector<32x32xbf16>, vector<8x32xf32> -> vector<8x32xf32>
    %c0_7 = arith.constant 0 : index
    %c0_8 = arith.constant 0 : index
    %8 = vector.load %arg4[%c0_7, %c0_8] : memref<1x32xf32, #tpu.memory_space<vmem>>, vector<1x32xf32>
    %9 = vector.broadcast %8 : vector<1x32xf32> to vector<8x32xf32>
    %10 = arith.addf %7, %9 : vector<8x32xf32>
    %11 = arith.truncf %3 : vector<8x32xf32> to vector<8x32xbf16>
    %c0_9 = arith.constant 0 : index
    %c0_10 = arith.constant 0 : index
    %12 = vector.load %arg5[%c0_9, %c0_10] : memref<32x64xf32, #tpu.memory_space<vmem>>, vector<32x64xf32>
    %13 = arith.truncf %12 : vector<32x64xf32> to vector<32x64xbf16>
    %cst_11 = arith.constant dense<0.000000e+00> : vector<8x64xf32>
    %14 = tpu.matmul %11, %13, %cst_11 {dimension_numbers = #tpu.dot_dimension_numbers<[1], [0], [0], [1], [0, 0, 1, 1], [], []>} : vector<8x32xbf16>, vector<32x64xbf16>, vector<8x64xf32> -> vector<8x64xf32>
    %c0_12 = arith.constant 0 : index
    %c0_13 = arith.constant 0 : index
    %15 = vector.load %arg6[%c0_12, %c0_13] : memref<1x64xf32, #tpu.memory_space<vmem>>, vector<1x64xf32>
    %16 = vector.broadcast %15 : vector<1x64xf32> to vector<8x64xf32>
    %17 = arith.addf %14, %16 : vector<8x64xf32>
    %18 = vector.extract_strided_slice %17 {offsets = [0, 0], sizes = [8, 32], strides = [1, 1]} : vector<8x64xf32> to vector<8x32xf32>
    %19 = vector.extract_strided_slice %17 {offsets = [0, 32], sizes = [8, 32], strides = [1, 1]} : vector<8x64xf32> to vector<8x32xf32>
    %cst_14 = arith.constant 0.000000e+00 : f32
    %20 = vector.broadcast %cst_14 : f32 to vector<8x32xf32>
    %21 = vector.extract_strided_slice %10 {offsets = [0, 0], sizes = [8, 8], strides = [1, 1]} : vector<8x32xf32> to vector<8x8xf32>
    %22 = vector.extract_strided_slice %18 {offsets = [0, 0], sizes = [8, 8], strides = [1, 1]} : vector<8x32xf32> to vector<8x8xf32>
    %23 = vector.extract_strided_slice %19 {offsets = [0, 0], sizes = [8, 8], strides = [1, 1]} : vector<8x32xf32> to vector<8x8xf32>
    %24 = arith.truncf %21 : vector<8x8xf32> to vector<8x8xbf16>
    %25 = arith.truncf %22 : vector<8x8xf32> to vector<8x8xbf16>
    %cst_15 = arith.constant dense<0.000000e+00> : vector<8x8xf32>
    %26 = tpu.matmul %24, %25, %cst_15 {dimension_numbers = #tpu.dot_dimension_numbers<[1], [1], [0], [0], [0, 0, 1, 0], [], []>} : vector<8x8xbf16>, vector<8x8xbf16>, vector<8x8xf32> -> vector<8x8xf32>
    %cst_16 = arith.constant 0.353553385 : f32
    %27 = vector.broadcast %cst_16 : f32 to vector<8x8xf32>
    %28 = arith.mulf %26, %27 : vector<8x8xf32>
    %cst_17 = arith.constant dense<0xFF800000> : vector<8xf32>
    %29 = vector.multi_reduction <maximumf>, %28, %cst_17 [1] : vector<8x8xf32> to vector<8xf32>
    %30 = vector.shape_cast %29 : vector<8xf32> to vector<8x1xf32>
    %31 = vector.broadcast %30 : vector<8x1xf32> to vector<8x8xf32>
    %32 = arith.subf %28, %31 : vector<8x8xf32>
    %33 = math.exp %32 : vector<8x8xf32>
    %cst_18 = arith.constant dense<0.000000e+00> : vector<8xf32>
    %34 = vector.multi_reduction <add>, %33, %cst_18 [1] : vector<8x8xf32> to vector<8xf32>
    %35 = vector.shape_cast %34 : vector<8xf32> to vector<8x1xf32>
    %36 = tpu.reciprocal %35 {approx = true} : vector<8x1xf32> -> vector<8x1xf32>
    %37 = vector.broadcast %36 : vector<8x1xf32> to vector<8x8xf32>
    %38 = arith.mulf %33, %37 : vector<8x8xf32>
    %39 = arith.truncf %38 : vector<8x8xf32> to vector<8x8xbf16>
    %40 = arith.truncf %23 : vector<8x8xf32> to vector<8x8xbf16>
    %cst_19 = arith.constant dense<0.000000e+00> : vector<8x8xf32>
    %41 = tpu.matmul %39, %40, %cst_19 {dimension_numbers = #tpu.dot_dimension_numbers<[1], [0], [0], [1], [0, 0, 1, 1], [], []>} : vector<8x8xbf16>, vector<8x8xbf16>, vector<8x8xf32> -> vector<8x8xf32>
    %c0_20 = arith.constant 0 : index
    %c0_21 = arith.constant 0 : index
    %42 = vector.load %arg7[%c0_20, %c0_21] : memref<32x32xf32, #tpu.memory_space<vmem>>, vector<8x32xf32>
    %43 = arith.truncf %41 : vector<8x8xf32> to vector<8x8xbf16>
    %44 = arith.truncf %42 : vector<8x32xf32> to vector<8x32xbf16>
    %cst_22 = arith.constant dense<0.000000e+00> : vector<8x32xf32>
    %45 = tpu.matmul %43, %44, %cst_22 {dimension_numbers = #tpu.dot_dimension_numbers<[1], [0], [0], [1], [0, 0, 1, 1], [], []>} : vector<8x8xbf16>, vector<8x32xbf16>, vector<8x32xf32> -> vector<8x32xf32>
    %46 = arith.addf %20, %45 : vector<8x32xf32>
    %47 = vector.extract_strided_slice %10 {offsets = [0, 8], sizes = [8, 8], strides = [1, 1]} : vector<8x32xf32> to vector<8x8xf32>
    %48 = vector.extract_strided_slice %18 {offsets = [0, 8], sizes = [8, 8], strides = [1, 1]} : vector<8x32xf32> to vector<8x8xf32>
    %49 = vector.extract_strided_slice %19 {offsets = [0, 8], sizes = [8, 8], strides = [1, 1]} : vector<8x32xf32> to vector<8x8xf32>
    %50 = arith.truncf %47 : vector<8x8xf32> to vector<8x8xbf16>
    %51 = arith.truncf %48 : vector<8x8xf32> to vector<8x8xbf16>
    %cst_23 = arith.constant dense<0.000000e+00> : vector<8x8xf32>
    %52 = tpu.matmul %50, %51, %cst_23 {dimension_numbers = #tpu.dot_dimension_numbers<[1], [1], [0], [0], [0, 0, 1, 0], [], []>} : vector<8x8xbf16>, vector<8x8xbf16>, vector<8x8xf32> -> vector<8x8xf32>
    %cst_24 = arith.constant 0.353553385 : f32
    %53 = vector.broadcast %cst_24 : f32 to vector<8x8xf32>
    %54 = arith.mulf %52, %53 : vector<8x8xf32>
    %cst_25 = arith.constant dense<0xFF800000> : vector<8xf32>
    %55 = vector.multi_reduction <maximumf>, %54, %cst_25 [1] : vector<8x8xf32> to vector<8xf32>
    %56 = vector.shape_cast %55 : vector<8xf32> to vector<8x1xf32>
    %57 = vector.broadcast %56 : vector<8x1xf32> to vector<8x8xf32>
    %58 = arith.subf %54, %57 : vector<8x8xf32>
    %59 = math.exp %58 : vector<8x8xf32>
    %cst_26 = arith.constant dense<0.000000e+00> : vector<8xf32>
    %60 = vector.multi_reduction <add>, %59, %cst_26 [1] : vector<8x8xf32> to vector<8xf32>
    %61 = vector.shape_cast %60 : vector<8xf32> to vector<8x1xf32>
    %62 = tpu.reciprocal %61 {approx = true} : vector<8x1xf32> -> vector<8x1xf32>
    %63 = vector.broadcast %62 : vector<8x1xf32> to vector<8x8xf32>
    %64 = arith.mulf %59, %63 : vector<8x8xf32>
    %65 = arith.truncf %64 : vector<8x8xf32> to vector<8x8xbf16>
    %66 = arith.truncf %49 : vector<8x8xf32> to vector<8x8xbf16>
    %cst_27 = arith.constant dense<0.000000e+00> : vector<8x8xf32>
    %67 = tpu.matmul %65, %66, %cst_27 {dimension_numbers = #tpu.dot_dimension_numbers<[1], [0], [0], [1], [0, 0, 1, 1], [], []>} : vector<8x8xbf16>, vector<8x8xbf16>, vector<8x8xf32> -> vector<8x8xf32>
    %c8 = arith.constant 8 : index
    %c0_28 = arith.constant 0 : index
    %68 = vector.load %arg7[%c8, %c0_28] : memref<32x32xf32, #tpu.memory_space<vmem>>, vector<8x32xf32>
    %69 = arith.truncf %67 : vector<8x8xf32> to vector<8x8xbf16>
    %70 = arith.truncf %68 : vector<8x32xf32> to vector<8x32xbf16>
    %cst_29 = arith.constant dense<0.000000e+00> : vector<8x32xf32>
    %71 = tpu.matmul %69, %70, %cst_29 {dimension_numbers = #tpu.dot_dimension_numbers<[1], [0], [0], [1], [0, 0, 1, 1], [], []>} : vector<8x8xbf16>, vector<8x32xbf16>, vector<8x32xf32> -> vector<8x32xf32>
    %72 = arith.addf %46, %71 : vector<8x32xf32>
    %73 = vector.extract_strided_slice %10 {offsets = [0, 16], sizes = [8, 8], strides = [1, 1]} : vector<8x32xf32> to vector<8x8xf32>
    %74 = vector.extract_strided_slice %18 {offsets = [0, 16], sizes = [8, 8], strides = [1, 1]} : vector<8x32xf32> to vector<8x8xf32>
    %75 = vector.extract_strided_slice %19 {offsets = [0, 16], sizes = [8, 8], strides = [1, 1]} : vector<8x32xf32> to vector<8x8xf32>
    %76 = arith.truncf %73 : vector<8x8xf32> to vector<8x8xbf16>
    %77 = arith.truncf %74 : vector<8x8xf32> to vector<8x8xbf16>
    %cst_30 = arith.constant dense<0.000000e+00> : vector<8x8xf32>
    %78 = tpu.matmul %76, %77, %cst_30 {dimension_numbers = #tpu.dot_dimension_numbers<[1], [1], [0], [0], [0, 0, 1, 0], [], []>} : vector<8x8xbf16>, vector<8x8xbf16>, vector<8x8xf32> -> vector<8x8xf32>
    %cst_31 = arith.constant 0.353553385 : f32
    %79 = vector.broadcast %cst_31 : f32 to vector<8x8xf32>
    %80 = arith.mulf %78, %79 : vector<8x8xf32>
    %cst_32 = arith.constant dense<0xFF800000> : vector<8xf32>
    %81 = vector.multi_reduction <maximumf>, %80, %cst_32 [1] : vector<8x8xf32> to vector<8xf32>
    %82 = vector.shape_cast %81 : vector<8xf32> to vector<8x1xf32>
    %83 = vector.broadcast %82 : vector<8x1xf32> to vector<8x8xf32>
    %84 = arith.subf %80, %83 : vector<8x8xf32>
    %85 = math.exp %84 : vector<8x8xf32>
    %cst_33 = arith.constant dense<0.000000e+00> : vector<8xf32>
    %86 = vector.multi_reduction <add>, %85, %cst_33 [1] : vector<8x8xf32> to vector<8xf32>
    %87 = vector.shape_cast %86 : vector<8xf32> to vector<8x1xf32>
    %88 = tpu.reciprocal %87 {approx = true} : vector<8x1xf32> -> vector<8x1xf32>
    %89 = vector.broadcast %88 : vector<8x1xf32> to vector<8x8xf32>
    %90 = arith.mulf %85, %89 : vector<8x8xf32>
    %91 = arith.truncf %90 : vector<8x8xf32> to vector<8x8xbf16>
    %92 = arith.truncf %75 : vector<8x8xf32> to vector<8x8xbf16>
    %cst_34 = arith.constant dense<0.000000e+00> : vector<8x8xf32>
    %93 = tpu.matmul %91, %92, %cst_34 {dimension_numbers = #tpu.dot_dimension_numbers<[1], [0], [0], [1], [0, 0, 1, 1], [], []>} : vector<8x8xbf16>, vector<8x8xbf16>, vector<8x8xf32> -> vector<8x8xf32>
    %c16 = arith.constant 16 : index
    %c0_35 = arith.constant 0 : index
    %94 = vector.load %arg7[%c16, %c0_35] : memref<32x32xf32, #tpu.memory_space<vmem>>, vector<8x32xf32>
    %95 = arith.truncf %93 : vector<8x8xf32> to vector<8x8xbf16>
    %96 = arith.truncf %94 : vector<8x32xf32> to vector<8x32xbf16>
    %cst_36 = arith.constant dense<0.000000e+00> : vector<8x32xf32>
    %97 = tpu.matmul %95, %96, %cst_36 {dimension_numbers = #tpu.dot_dimension_numbers<[1], [0], [0], [1], [0, 0, 1, 1], [], []>} : vector<8x8xbf16>, vector<8x32xbf16>, vector<8x32xf32> -> vector<8x32xf32>
    %98 = arith.addf %72, %97 : vector<8x32xf32>
    %99 = vector.extract_strided_slice %10 {offsets = [0, 24], sizes = [8, 8], strides = [1, 1]} : vector<8x32xf32> to vector<8x8xf32>
    %100 = vector.extract_strided_slice %18 {offsets = [0, 24], sizes = [8, 8], strides = [1, 1]} : vector<8x32xf32> to vector<8x8xf32>
    %101 = vector.extract_strided_slice %19 {offsets = [0, 24], sizes = [8, 8], strides = [1, 1]} : vector<8x32xf32> to vector<8x8xf32>
    %102 = arith.truncf %99 : vector<8x8xf32> to vector<8x8xbf16>
    %103 = arith.truncf %100 : vector<8x8xf32> to vector<8x8xbf16>
    %cst_37 = arith.constant dense<0.000000e+00> : vector<8x8xf32>
    %104 = tpu.matmul %102, %103, %cst_37 {dimension_numbers = #tpu.dot_dimension_numbers<[1], [1], [0], [0], [0, 0, 1, 0], [], []>} : vector<8x8xbf16>, vector<8x8xbf16>, vector<8x8xf32> -> vector<8x8xf32>
    %cst_38 = arith.constant 0.353553385 : f32
    %105 = vector.broadcast %cst_38 : f32 to vector<8x8xf32>
    %106 = arith.mulf %104, %105 : vector<8x8xf32>
    %cst_39 = arith.constant dense<0xFF800000> : vector<8xf32>
    %107 = vector.multi_reduction <maximumf>, %106, %cst_39 [1] : vector<8x8xf32> to vector<8xf32>
    %108 = vector.shape_cast %107 : vector<8xf32> to vector<8x1xf32>
    %109 = vector.broadcast %108 : vector<8x1xf32> to vector<8x8xf32>
    %110 = arith.subf %106, %109 : vector<8x8xf32>
    %111 = math.exp %110 : vector<8x8xf32>
    %cst_40 = arith.constant dense<0.000000e+00> : vector<8xf32>
    %112 = vector.multi_reduction <add>, %111, %cst_40 [1] : vector<8x8xf32> to vector<8xf32>
    %113 = vector.shape_cast %112 : vector<8xf32> to vector<8x1xf32>
    %114 = tpu.reciprocal %113 {approx = true} : vector<8x1xf32> -> vector<8x1xf32>
    %115 = vector.broadcast %114 : vector<8x1xf32> to vector<8x8xf32>
    %116 = arith.mulf %111, %115 : vector<8x8xf32>
    %117 = arith.truncf %116 : vector<8x8xf32> to vector<8x8xbf16>
    %118 = arith.truncf %101 : vector<8x8xf32> to vector<8x8xbf16>
    %cst_41 = arith.constant dense<0.000000e+00> : vector<8x8xf32>
    %119 = tpu.matmul %117, %118, %cst_41 {dimension_numbers = #tpu.dot_dimension_numbers<[1], [0], [0], [1], [0, 0, 1, 1], [], []>} : vector<8x8xbf16>, vector<8x8xbf16>, vector<8x8xf32> -> vector<8x8xf32>
    %c24 = arith.constant 24 : index
    %c0_42 = arith.constant 0 : index
    %120 = vector.load %arg7[%c24, %c0_42] : memref<32x32xf32, #tpu.memory_space<vmem>>, vector<8x32xf32>
    %121 = arith.truncf %119 : vector<8x8xf32> to vector<8x8xbf16>
    %122 = arith.truncf %120 : vector<8x32xf32> to vector<8x32xbf16>
    %cst_43 = arith.constant dense<0.000000e+00> : vector<8x32xf32>
    %123 = tpu.matmul %121, %122, %cst_43 {dimension_numbers = #tpu.dot_dimension_numbers<[1], [0], [0], [1], [0, 0, 1, 1], [], []>} : vector<8x8xbf16>, vector<8x32xbf16>, vector<8x32xf32> -> vector<8x32xf32>
    %124 = arith.addf %98, %123 : vector<8x32xf32>
    %c0_44 = arith.constant 0 : index
    %c0_45 = arith.constant 0 : index
    %125 = vector.load %arg8[%c0_44, %c0_45] : memref<1x32xf32, #tpu.memory_space<vmem>>, vector<1x32xf32>
    %126 = vector.broadcast %125 : vector<1x32xf32> to vector<8x32xf32>
    %127 = arith.addf %124, %126 : vector<8x32xf32>
    %128 = arith.addf %127, %1 : vector<8x32xf32>
    %c0_46 = arith.constant 0 : index
    %c0_47 = arith.constant 0 : index
    %129 = vector.load %arg9[%c0_46, %c0_47] : memref<1x32xf32, #tpu.memory_space<vmem>>, vector<1x32xf32>
    %c0_48 = arith.constant 0 : index
    %c0_49 = arith.constant 0 : index
    %130 = vector.load %arg10[%c0_48, %c0_49] : memref<1x32xf32, #tpu.memory_space<vmem>>, vector<1x32xf32>
    %cst_50 = arith.constant dense<0.000000e+00> : vector<8xf32>
    %131 = vector.multi_reduction <add>, %128, %cst_50 [1] : vector<8x32xf32> to vector<8xf32>
    %132 = vector.shape_cast %131 : vector<8xf32> to vector<8x1xf32>
    %cst_51 = arith.constant 3.200000e+01 : f32
    %133 = vector.broadcast %cst_51 : f32 to vector<8x1xf32>
    %134 = arith.divf %132, %133 : vector<8x1xf32>
    %135 = vector.broadcast %134 : vector<8x1xf32> to vector<8x32xf32>
    %136 = arith.subf %128, %135 : vector<8x32xf32>
    %137 = vector.broadcast %134 : vector<8x1xf32> to vector<8x32xf32>
    %138 = arith.subf %128, %137 : vector<8x32xf32>
    %139 = arith.mulf %136, %138 : vector<8x32xf32>
    %cst_52 = arith.constant dense<0.000000e+00> : vector<8xf32>
    %140 = vector.multi_reduction <add>, %139, %cst_52 [1] : vector<8x32xf32> to vector<8xf32>
    %141 = vector.shape_cast %140 : vector<8xf32> to vector<8x1xf32>
    %cst_53 = arith.constant 3.200000e+01 : f32
    %142 = vector.broadcast %cst_53 : f32 to vector<8x1xf32>
    %143 = arith.divf %141, %142 : vector<8x1xf32>
    %144 = vector.broadcast %134 : vector<8x1xf32> to vector<8x32xf32>
    %145 = arith.subf %128, %144 : vector<8x32xf32>
    %cst_54 = arith.constant 9.99999974E-6 : f32
    %146 = vector.broadcast %cst_54 : f32 to vector<8x1xf32>
    %147 = arith.addf %143, %146 : vector<8x1xf32>
    %148 = math.rsqrt %147 : vector<8x1xf32>
    %149 = vector.broadcast %148 : vector<8x1xf32> to vector<8x32xf32>
    %150 = arith.mulf %145, %149 : vector<8x32xf32>
    %151 = vector.broadcast %129 : vector<1x32xf32> to vector<8x32xf32>
    %152 = arith.mulf %150, %151 : vector<8x32xf32>
    %153 = vector.broadcast %130 : vector<1x32xf32> to vector<8x32xf32>
    %154 = arith.addf %152, %153 : vector<8x32xf32>
    %c0_55 = arith.constant 0 : index
    %c0_56 = arith.constant 0 : index
    %c0_57 = arith.constant 0 : index
    %155 = vector.load %arg11[%c0_55, %c0_56, %c0_57] : memref<1x8x32xf32, #tpu.memory_space<vmem>>, vector<1x8x32xf32>
    %156 = vector.shape_cast %155 : vector<1x8x32xf32> to vector<8x32xf32>
    %157 = vector.shape_cast %154 : vector<8x32xf32> to vector<1x8x32xf32>
    tpu.vector_store %arg11[%c0_55, %c0_56, %c0_57], %157 {strides = array<i32>} : memref<1x8x32xf32, #tpu.memory_space<vmem>>, vector<1x8x32xf32>,
    return
  }
  func.func @transform_0(%arg0: i32) -> (i32, i32, i32) {
    %c0_i32 = arith.constant 0 : i32
    %c0_i32_0 = arith.constant 0 : i32
    %c0_i32_1 = arith.constant 0 : i32
    return %arg0, %c0_i32, %c0_i32_0 : i32, i32, i32
  }
  func.func @transform_1(%arg0: i32) -> (i32, i32, i32) {
    %c0_i32 = arith.constant 0 : i32
    %c0_i32_0 = arith.constant 0 : i32
    %c0_i32_1 = arith.constant 0 : i32
    return %arg0, %c0_i32, %c0_i32_0 : i32, i32, i32
  }
  func.func @transform_2(%arg0: i32) -> (i32, i32) {
    %c0_i32 = arith.constant 0 : i32
    %c0_i32_0 = arith.constant 0 : i32
    %c0_i32_1 = arith.constant 0 : i32
    return %c0_i32, %c0_i32_0 : i32, i32
  }
  func.func @transform_3(%arg0: i32) -> (i32, i32) {
    %c0_i32 = arith.constant 0 : i32
    %c0_i32_0 = arith.constant 0 : i32
    %c0_i32_1 = arith.constant 0 : i32
    return %c0_i32, %c0_i32_0 : i32, i32
  }
  func.func @transform_4(%arg0: i32) -> (i32, i32) {
    %c0_i32 = arith.constant 0 : i32
    %c0_i32_0 = arith.constant 0 : i32
    %c0_i32_1 = arith.constant 0 : i32
    return %c0_i32, %c0_i32_0 : i32, i32
  }
  func.func @transform_5(%arg0: i32) -> (i32, i32) {
    %c0_i32 = arith.constant 0 : i32
    %c0_i32_0 = arith.constant 0 : i32
    %c0_i32_1 = arith.constant 0 : i32
    return %c0_i32, %c0_i32_0 : i32, i32
  }
  func.func @transform_6(%arg0: i32) -> (i32, i32) {
    %c0_i32 = arith.constant 0 : i32
    %c0_i32_0 = arith.constant 0 : i32
    %c0_i32_1 = arith.constant 0 : i32
    return %c0_i32, %c0_i32_0 : i32, i32
  }
  func.func @transform_7(%arg0: i32) -> (i32, i32) {
    %c0_i32 = arith.constant 0 : i32
    %c0_i32_0 = arith.constant 0 : i32
    %c0_i32_1 = arith.constant 0 : i32
    return %c0_i32, %c0_i32_0 : i32, i32
  }
  func.func @transform_8(%arg0: i32) -> (i32, i32) {
    %c0_i32 = arith.constant 0 : i32
    %c0_i32_0 = arith.constant 0 : i32
    %c0_i32_1 = arith.constant 0 : i32
    return %c0_i32, %c0_i32_0 : i32, i32
  }
  func.func @transform_9(%arg0: i32) -> (i32, i32) {
    %c0_i32 = arith.constant 0 : i32
    %c0_i32_0 = arith.constant 0 : i32
    %c0_i32_1 = arith.constant 0 : i32
    return %c0_i32, %c0_i32_0 : i32, i32
  }
  func.func @transform_10(%arg0: i32) -> (i32, i32, i32) {
    %c0_i32 = arith.constant 0 : i32
    %c0_i32_0 = arith.constant 0 : i32
    %c0_i32_1 = arith.constant 0 : i32
    return %arg0, %c0_i32, %c0_i32_0 : i32, i32, i32
  }
}

module attributes {stable_mosaic.version = 11 : i64} {
  func.func @_mha_block_kernel(%arg0: i32, %arg1: memref<1x6x32xf32, #tpu.memory_space<vmem>>, %arg2: memref<1x6x32xf32, #tpu.memory_space<vmem>>, %arg3: memref<32x32xf32, #tpu.memory_space<vmem>>, %arg4: memref<1x32xf32, #tpu.memory_space<vmem>>, %arg5: memref<32x64xf32, #tpu.memory_space<vmem>>, %arg6: memref<1x64xf32, #tpu.memory_space<vmem>>, %arg7: memref<32x32xf32, #tpu.memory_space<vmem>>, %arg8: memref<1x32xf32, #tpu.memory_space<vmem>>, %arg9: memref<1x32xf32, #tpu.memory_space<vmem>>, %arg10: memref<1x32xf32, #tpu.memory_space<vmem>>, %arg11: memref<1x6x32xf32, #tpu.memory_space<vmem>>) attributes {dimension_semantics = [#tpu.dimension_semantics<parallel>], iteration_bounds = array<i64: 2>, scalar_prefetch = 0 : i64, scratch_operands = 0 : i64, tpu.core_type = #tpu.core_type<tc>, window_params = [{transform_indices = @transform_0, window_bounds = array<i64: 1, 6, 32>}, {transform_indices = @transform_1, window_bounds = array<i64: 1, 6, 32>}, {pipeline_mode = #tpu.pipeline_mode<synchronous>, transform_indices = @transform_2, window_bounds = array<i64: 32, 32>}, {pipeline_mode = #tpu.pipeline_mode<synchronous>, transform_indices = @transform_3, window_bounds = array<i64: 1, 32>}, {pipeline_mode = #tpu.pipeline_mode<synchronous>, transform_indices = @transform_4, window_bounds = array<i64: 32, 64>}, {pipeline_mode = #tpu.pipeline_mode<synchronous>, transform_indices = @transform_5, window_bounds = array<i64: 1, 64>}, {pipeline_mode = #tpu.pipeline_mode<synchronous>, transform_indices = @transform_6, window_bounds = array<i64: 32, 32>}, {pipeline_mode = #tpu.pipeline_mode<synchronous>, transform_indices = @transform_7, window_bounds = array<i64: 1, 32>}, {pipeline_mode = #tpu.pipeline_mode<synchronous>, transform_indices = @transform_8, window_bounds = array<i64: 1, 32>}, {pipeline_mode = #tpu.pipeline_mode<synchronous>, transform_indices = @transform_9, window_bounds = array<i64: 1, 32>}, {transform_indices = @transform_10, window_bounds = array<i64: 1, 6, 32>}]} {
    %c0 = arith.constant 0 : index
    %c0_0 = arith.constant 0 : index
    %c0_1 = arith.constant 0 : index
    %0 = vector.load %arg1[%c0, %c0_0, %c0_1] : memref<1x6x32xf32, #tpu.memory_space<vmem>>, vector<1x6x32xf32>
    %1 = vector.shape_cast %0 : vector<1x6x32xf32> to vector<6x32xf32>
    %c0_2 = arith.constant 0 : index
    %c0_3 = arith.constant 0 : index
    %c0_4 = arith.constant 0 : index
    %2 = vector.load %arg2[%c0_2, %c0_3, %c0_4] : memref<1x6x32xf32, #tpu.memory_space<vmem>>, vector<1x6x32xf32>
    %3 = vector.shape_cast %2 : vector<1x6x32xf32> to vector<6x32xf32>
    %4 = arith.truncf %1 : vector<6x32xf32> to vector<6x32xbf16>
    %c0_5 = arith.constant 0 : index
    %c0_6 = arith.constant 0 : index
    %5 = vector.load %arg3[%c0_5, %c0_6] : memref<32x32xf32, #tpu.memory_space<vmem>>, vector<32x32xf32>
    %6 = arith.truncf %5 : vector<32x32xf32> to vector<32x32xbf16>
    %cst = arith.constant dense<0.000000e+00> : vector<6x32xf32>
    %7 = tpu.matmul %4, %6, %cst {dimension_numbers = #tpu.dot_dimension_numbers<[1], [0], [0], [1], [0, 0, 1, 1], [], []>} : vector<6x32xbf16>, vector<32x32xbf16>, vector<6x32xf32> -> vector<6x32xf32>
    %c0_7 = arith.constant 0 : index
    %c0_8 = arith.constant 0 : index
    %8 = vector.load %arg4[%c0_7, %c0_8] : memref<1x32xf32, #tpu.memory_space<vmem>>, vector<1x32xf32>
    %9 = vector.broadcast %8 : vector<1x32xf32> to vector<6x32xf32>
    %10 = arith.addf %7, %9 : vector<6x32xf32>
    %11 = arith.truncf %3 : vector<6x32xf32> to vector<6x32xbf16>
    %c0_9 = arith.constant 0 : index
    %c0_10 = arith.constant 0 : index
    %12 = vector.load %arg5[%c0_9, %c0_10] : memref<32x64xf32, #tpu.memory_space<vmem>>, vector<32x64xf32>
    %13 = arith.truncf %12 : vector<32x64xf32> to vector<32x64xbf16>
    %cst_11 = arith.constant dense<0.000000e+00> : vector<6x64xf32>
    %14 = tpu.matmul %11, %13, %cst_11 {dimension_numbers = #tpu.dot_dimension_numbers<[1], [0], [0], [1], [0, 0, 1, 1], [], []>} : vector<6x32xbf16>, vector<32x64xbf16>, vector<6x64xf32> -> vector<6x64xf32>
    %c0_12 = arith.constant 0 : index
    %c0_13 = arith.constant 0 : index
    %15 = vector.load %arg6[%c0_12, %c0_13] : memref<1x64xf32, #tpu.memory_space<vmem>>, vector<1x64xf32>
    %16 = vector.broadcast %15 : vector<1x64xf32> to vector<6x64xf32>
    %17 = arith.addf %14, %16 : vector<6x64xf32>
    %18 = vector.extract_strided_slice %17 {offsets = [0, 0], sizes = [6, 32], strides = [1, 1]} : vector<6x64xf32> to vector<6x32xf32>
    %19 = vector.extract_strided_slice %17 {offsets = [0, 32], sizes = [6, 32], strides = [1, 1]} : vector<6x64xf32> to vector<6x32xf32>
    %cst_14 = arith.constant 0.000000e+00 : f32
    %20 = vector.broadcast %cst_14 : f32 to vector<6x32xf32>
    %21 = vector.extract_strided_slice %10 {offsets = [0, 0], sizes = [6, 8], strides = [1, 1]} : vector<6x32xf32> to vector<6x8xf32>
    %22 = vector.extract_strided_slice %18 {offsets = [0, 0], sizes = [6, 8], strides = [1, 1]} : vector<6x32xf32> to vector<6x8xf32>
    %23 = vector.extract_strided_slice %19 {offsets = [0, 0], sizes = [6, 8], strides = [1, 1]} : vector<6x32xf32> to vector<6x8xf32>
    %24 = arith.truncf %21 : vector<6x8xf32> to vector<6x8xbf16>
    %25 = arith.truncf %22 : vector<6x8xf32> to vector<6x8xbf16>
    %cst_15 = arith.constant dense<0.000000e+00> : vector<6x6xf32>
    %26 = tpu.matmul %24, %25, %cst_15 {dimension_numbers = #tpu.dot_dimension_numbers<[1], [1], [0], [0], [0, 0, 1, 0], [], []>} : vector<6x8xbf16>, vector<6x8xbf16>, vector<6x6xf32> -> vector<6x6xf32>
    %cst_16 = arith.constant 0.353553385 : f32
    %27 = vector.broadcast %cst_16 : f32 to vector<6x6xf32>
    %28 = arith.mulf %26, %27 : vector<6x6xf32>
    %cst_17 = arith.constant dense<0xFF800000> : vector<6xf32>
    %29 = vector.multi_reduction <maximumf>, %28, %cst_17 [1] : vector<6x6xf32> to vector<6xf32>
    %30 = vector.shape_cast %29 : vector<6xf32> to vector<6x1xf32>
    %31 = vector.broadcast %30 : vector<6x1xf32> to vector<6x6xf32>
    %32 = arith.subf %28, %31 : vector<6x6xf32>
    %33 = math.exp %32 : vector<6x6xf32>
    %cst_18 = arith.constant dense<0.000000e+00> : vector<6xf32>
    %34 = vector.multi_reduction <add>, %33, %cst_18 [1] : vector<6x6xf32> to vector<6xf32>
    %35 = vector.shape_cast %34 : vector<6xf32> to vector<6x1xf32>
    %36 = tpu.reciprocal %35 {approx = true} : vector<6x1xf32> -> vector<6x1xf32>
    %37 = vector.broadcast %36 : vector<6x1xf32> to vector<6x6xf32>
    %38 = arith.mulf %33, %37 : vector<6x6xf32>
    %39 = arith.truncf %38 : vector<6x6xf32> to vector<6x6xbf16>
    %40 = arith.truncf %23 : vector<6x8xf32> to vector<6x8xbf16>
    %cst_19 = arith.constant dense<0.000000e+00> : vector<6x8xf32>
    %41 = tpu.matmul %39, %40, %cst_19 {dimension_numbers = #tpu.dot_dimension_numbers<[1], [0], [0], [1], [0, 0, 1, 1], [], []>} : vector<6x6xbf16>, vector<6x8xbf16>, vector<6x8xf32> -> vector<6x8xf32>
    %c0_20 = arith.constant 0 : index
    %c0_21 = arith.constant 0 : index
    %42 = vector.load %arg7[%c0_20, %c0_21] : memref<32x32xf32, #tpu.memory_space<vmem>>, vector<8x32xf32>
    %43 = arith.truncf %41 : vector<6x8xf32> to vector<6x8xbf16>
    %44 = arith.truncf %42 : vector<8x32xf32> to vector<8x32xbf16>
    %cst_22 = arith.constant dense<0.000000e+00> : vector<6x32xf32>
    %45 = tpu.matmul %43, %44, %cst_22 {dimension_numbers = #tpu.dot_dimension_numbers<[1], [0], [0], [1], [0, 0, 1, 1], [], []>} : vector<6x8xbf16>, vector<8x32xbf16>, vector<6x32xf32> -> vector<6x32xf32>
    %46 = arith.addf %20, %45 : vector<6x32xf32>
    %47 = vector.extract_strided_slice %10 {offsets = [0, 8], sizes = [6, 8], strides = [1, 1]} : vector<6x32xf32> to vector<6x8xf32>
    %48 = vector.extract_strided_slice %18 {offsets = [0, 8], sizes = [6, 8], strides = [1, 1]} : vector<6x32xf32> to vector<6x8xf32>
    %49 = vector.extract_strided_slice %19 {offsets = [0, 8], sizes = [6, 8], strides = [1, 1]} : vector<6x32xf32> to vector<6x8xf32>
    %50 = arith.truncf %47 : vector<6x8xf32> to vector<6x8xbf16>
    %51 = arith.truncf %48 : vector<6x8xf32> to vector<6x8xbf16>
    %cst_23 = arith.constant dense<0.000000e+00> : vector<6x6xf32>
    %52 = tpu.matmul %50, %51, %cst_23 {dimension_numbers = #tpu.dot_dimension_numbers<[1], [1], [0], [0], [0, 0, 1, 0], [], []>} : vector<6x8xbf16>, vector<6x8xbf16>, vector<6x6xf32> -> vector<6x6xf32>
    %cst_24 = arith.constant 0.353553385 : f32
    %53 = vector.broadcast %cst_24 : f32 to vector<6x6xf32>
    %54 = arith.mulf %52, %53 : vector<6x6xf32>
    %cst_25 = arith.constant dense<0xFF800000> : vector<6xf32>
    %55 = vector.multi_reduction <maximumf>, %54, %cst_25 [1] : vector<6x6xf32> to vector<6xf32>
    %56 = vector.shape_cast %55 : vector<6xf32> to vector<6x1xf32>
    %57 = vector.broadcast %56 : vector<6x1xf32> to vector<6x6xf32>
    %58 = arith.subf %54, %57 : vector<6x6xf32>
    %59 = math.exp %58 : vector<6x6xf32>
    %cst_26 = arith.constant dense<0.000000e+00> : vector<6xf32>
    %60 = vector.multi_reduction <add>, %59, %cst_26 [1] : vector<6x6xf32> to vector<6xf32>
    %61 = vector.shape_cast %60 : vector<6xf32> to vector<6x1xf32>
    %62 = tpu.reciprocal %61 {approx = true} : vector<6x1xf32> -> vector<6x1xf32>
    %63 = vector.broadcast %62 : vector<6x1xf32> to vector<6x6xf32>
    %64 = arith.mulf %59, %63 : vector<6x6xf32>
    %65 = arith.truncf %64 : vector<6x6xf32> to vector<6x6xbf16>
    %66 = arith.truncf %49 : vector<6x8xf32> to vector<6x8xbf16>
    %cst_27 = arith.constant dense<0.000000e+00> : vector<6x8xf32>
    %67 = tpu.matmul %65, %66, %cst_27 {dimension_numbers = #tpu.dot_dimension_numbers<[1], [0], [0], [1], [0, 0, 1, 1], [], []>} : vector<6x6xbf16>, vector<6x8xbf16>, vector<6x8xf32> -> vector<6x8xf32>
    %c8 = arith.constant 8 : index
    %c0_28 = arith.constant 0 : index
    %68 = vector.load %arg7[%c8, %c0_28] : memref<32x32xf32, #tpu.memory_space<vmem>>, vector<8x32xf32>
    %69 = arith.truncf %67 : vector<6x8xf32> to vector<6x8xbf16>
    %70 = arith.truncf %68 : vector<8x32xf32> to vector<8x32xbf16>
    %cst_29 = arith.constant dense<0.000000e+00> : vector<6x32xf32>
    %71 = tpu.matmul %69, %70, %cst_29 {dimension_numbers = #tpu.dot_dimension_numbers<[1], [0], [0], [1], [0, 0, 1, 1], [], []>} : vector<6x8xbf16>, vector<8x32xbf16>, vector<6x32xf32> -> vector<6x32xf32>
    %72 = arith.addf %46, %71 : vector<6x32xf32>
    %73 = vector.extract_strided_slice %10 {offsets = [0, 16], sizes = [6, 8], strides = [1, 1]} : vector<6x32xf32> to vector<6x8xf32>
    %74 = vector.extract_strided_slice %18 {offsets = [0, 16], sizes = [6, 8], strides = [1, 1]} : vector<6x32xf32> to vector<6x8xf32>
    %75 = vector.extract_strided_slice %19 {offsets = [0, 16], sizes = [6, 8], strides = [1, 1]} : vector<6x32xf32> to vector<6x8xf32>
    %76 = arith.truncf %73 : vector<6x8xf32> to vector<6x8xbf16>
    %77 = arith.truncf %74 : vector<6x8xf32> to vector<6x8xbf16>
    %cst_30 = arith.constant dense<0.000000e+00> : vector<6x6xf32>
    %78 = tpu.matmul %76, %77, %cst_30 {dimension_numbers = #tpu.dot_dimension_numbers<[1], [1], [0], [0], [0, 0, 1, 0], [], []>} : vector<6x8xbf16>, vector<6x8xbf16>, vector<6x6xf32> -> vector<6x6xf32>
    %cst_31 = arith.constant 0.353553385 : f32
    %79 = vector.broadcast %cst_31 : f32 to vector<6x6xf32>
    %80 = arith.mulf %78, %79 : vector<6x6xf32>
    %cst_32 = arith.constant dense<0xFF800000> : vector<6xf32>
    %81 = vector.multi_reduction <maximumf>, %80, %cst_32 [1] : vector<6x6xf32> to vector<6xf32>
    %82 = vector.shape_cast %81 : vector<6xf32> to vector<6x1xf32>
    %83 = vector.broadcast %82 : vector<6x1xf32> to vector<6x6xf32>
    %84 = arith.subf %80, %83 : vector<6x6xf32>
    %85 = math.exp %84 : vector<6x6xf32>
    %cst_33 = arith.constant dense<0.000000e+00> : vector<6xf32>
    %86 = vector.multi_reduction <add>, %85, %cst_33 [1] : vector<6x6xf32> to vector<6xf32>
    %87 = vector.shape_cast %86 : vector<6xf32> to vector<6x1xf32>
    %88 = tpu.reciprocal %87 {approx = true} : vector<6x1xf32> -> vector<6x1xf32>
    %89 = vector.broadcast %88 : vector<6x1xf32> to vector<6x6xf32>
    %90 = arith.mulf %85, %89 : vector<6x6xf32>
    %91 = arith.truncf %90 : vector<6x6xf32> to vector<6x6xbf16>
    %92 = arith.truncf %75 : vector<6x8xf32> to vector<6x8xbf16>
    %cst_34 = arith.constant dense<0.000000e+00> : vector<6x8xf32>
    %93 = tpu.matmul %91, %92, %cst_34 {dimension_numbers = #tpu.dot_dimension_numbers<[1], [0], [0], [1], [0, 0, 1, 1], [], []>} : vector<6x6xbf16>, vector<6x8xbf16>, vector<6x8xf32> -> vector<6x8xf32>
    %c16 = arith.constant 16 : index
    %c0_35 = arith.constant 0 : index
    %94 = vector.load %arg7[%c16, %c0_35] : memref<32x32xf32, #tpu.memory_space<vmem>>, vector<8x32xf32>
    %95 = arith.truncf %93 : vector<6x8xf32> to vector<6x8xbf16>
    %96 = arith.truncf %94 : vector<8x32xf32> to vector<8x32xbf16>
    %cst_36 = arith.constant dense<0.000000e+00> : vector<6x32xf32>
    %97 = tpu.matmul %95, %96, %cst_36 {dimension_numbers = #tpu.dot_dimension_numbers<[1], [0], [0], [1], [0, 0, 1, 1], [], []>} : vector<6x8xbf16>, vector<8x32xbf16>, vector<6x32xf32> -> vector<6x32xf32>
    %98 = arith.addf %72, %97 : vector<6x32xf32>
    %99 = vector.extract_strided_slice %10 {offsets = [0, 24], sizes = [6, 8], strides = [1, 1]} : vector<6x32xf32> to vector<6x8xf32>
    %100 = vector.extract_strided_slice %18 {offsets = [0, 24], sizes = [6, 8], strides = [1, 1]} : vector<6x32xf32> to vector<6x8xf32>
    %101 = vector.extract_strided_slice %19 {offsets = [0, 24], sizes = [6, 8], strides = [1, 1]} : vector<6x32xf32> to vector<6x8xf32>
    %102 = arith.truncf %99 : vector<6x8xf32> to vector<6x8xbf16>
    %103 = arith.truncf %100 : vector<6x8xf32> to vector<6x8xbf16>
    %cst_37 = arith.constant dense<0.000000e+00> : vector<6x6xf32>
    %104 = tpu.matmul %102, %103, %cst_37 {dimension_numbers = #tpu.dot_dimension_numbers<[1], [1], [0], [0], [0, 0, 1, 0], [], []>} : vector<6x8xbf16>, vector<6x8xbf16>, vector<6x6xf32> -> vector<6x6xf32>
    %cst_38 = arith.constant 0.353553385 : f32
    %105 = vector.broadcast %cst_38 : f32 to vector<6x6xf32>
    %106 = arith.mulf %104, %105 : vector<6x6xf32>
    %cst_39 = arith.constant dense<0xFF800000> : vector<6xf32>
    %107 = vector.multi_reduction <maximumf>, %106, %cst_39 [1] : vector<6x6xf32> to vector<6xf32>
    %108 = vector.shape_cast %107 : vector<6xf32> to vector<6x1xf32>
    %109 = vector.broadcast %108 : vector<6x1xf32> to vector<6x6xf32>
    %110 = arith.subf %106, %109 : vector<6x6xf32>
    %111 = math.exp %110 : vector<6x6xf32>
    %cst_40 = arith.constant dense<0.000000e+00> : vector<6xf32>
    %112 = vector.multi_reduction <add>, %111, %cst_40 [1] : vector<6x6xf32> to vector<6xf32>
    %113 = vector.shape_cast %112 : vector<6xf32> to vector<6x1xf32>
    %114 = tpu.reciprocal %113 {approx = true} : vector<6x1xf32> -> vector<6x1xf32>
    %115 = vector.broadcast %114 : vector<6x1xf32> to vector<6x6xf32>
    %116 = arith.mulf %111, %115 : vector<6x6xf32>
    %117 = arith.truncf %116 : vector<6x6xf32> to vector<6x6xbf16>
    %118 = arith.truncf %101 : vector<6x8xf32> to vector<6x8xbf16>
    %cst_41 = arith.constant dense<0.000000e+00> : vector<6x8xf32>
    %119 = tpu.matmul %117, %118, %cst_41 {dimension_numbers = #tpu.dot_dimension_numbers<[1], [0], [0], [1], [0, 0, 1, 1], [], []>} : vector<6x6xbf16>, vector<6x8xbf16>, vector<6x8xf32> -> vector<6x8xf32>
    %c24 = arith.constant 24 : index
    %c0_42 = arith.constant 0 : index
    %120 = vector.load %arg7[%c24, %c0_42] : memref<32x32xf32, #tpu.memory_space<vmem>>, vector<8x32xf32>
    %121 = arith.truncf %119 : vector<6x8xf32> to vector<6x8xbf16>
    %122 = arith.truncf %120 : vector<8x32xf32> to vector<8x32xbf16>
    %cst_43 = arith.constant dense<0.000000e+00> : vector<6x32xf32>
    %123 = tpu.matmul %121, %122, %cst_43 {dimension_numbers = #tpu.dot_dimension_numbers<[1], [0], [0], [1], [0, 0, 1, 1], [], []>} : vector<6x8xbf16>, vector<8x32xbf16>, vector<6x32xf32> -> vector<6x32xf32>
    %124 = arith.addf %98, %123 : vector<6x32xf32>
    %c0_44 = arith.constant 0 : index
    %c0_45 = arith.constant 0 : index
    %125 = vector.load %arg8[%c0_44, %c0_45] : memref<1x32xf32, #tpu.memory_space<vmem>>, vector<1x32xf32>
    %126 = vector.broadcast %125 : vector<1x32xf32> to vector<6x32xf32>
    %127 = arith.addf %124, %126 : vector<6x32xf32>
    %128 = arith.addf %127, %1 : vector<6x32xf32>
    %c0_46 = arith.constant 0 : index
    %c0_47 = arith.constant 0 : index
    %129 = vector.load %arg9[%c0_46, %c0_47] : memref<1x32xf32, #tpu.memory_space<vmem>>, vector<1x32xf32>
    %c0_48 = arith.constant 0 : index
    %c0_49 = arith.constant 0 : index
    %130 = vector.load %arg10[%c0_48, %c0_49] : memref<1x32xf32, #tpu.memory_space<vmem>>, vector<1x32xf32>
    %cst_50 = arith.constant dense<0.000000e+00> : vector<6xf32>
    %131 = vector.multi_reduction <add>, %128, %cst_50 [1] : vector<6x32xf32> to vector<6xf32>
    %132 = vector.shape_cast %131 : vector<6xf32> to vector<6x1xf32>
    %cst_51 = arith.constant 3.200000e+01 : f32
    %133 = vector.broadcast %cst_51 : f32 to vector<6x1xf32>
    %134 = arith.divf %132, %133 : vector<6x1xf32>
    %135 = vector.broadcast %134 : vector<6x1xf32> to vector<6x32xf32>
    %136 = arith.subf %128, %135 : vector<6x32xf32>
    %137 = vector.broadcast %134 : vector<6x1xf32> to vector<6x32xf32>
    %138 = arith.subf %128, %137 : vector<6x32xf32>
    %139 = arith.mulf %136, %138 : vector<6x32xf32>
    %cst_52 = arith.constant dense<0.000000e+00> : vector<6xf32>
    %140 = vector.multi_reduction <add>, %139, %cst_52 [1] : vector<6x32xf32> to vector<6xf32>
    %141 = vector.shape_cast %140 : vector<6xf32> to vector<6x1xf32>
    %cst_53 = arith.constant 3.200000e+01 : f32
    %142 = vector.broadcast %cst_53 : f32 to vector<6x1xf32>
    %143 = arith.divf %141, %142 : vector<6x1xf32>
    %144 = vector.broadcast %134 : vector<6x1xf32> to vector<6x32xf32>
    %145 = arith.subf %128, %144 : vector<6x32xf32>
    %cst_54 = arith.constant 9.99999974E-6 : f32
    %146 = vector.broadcast %cst_54 : f32 to vector<6x1xf32>
    %147 = arith.addf %143, %146 : vector<6x1xf32>
    %148 = math.rsqrt %147 : vector<6x1xf32>
    %149 = vector.broadcast %148 : vector<6x1xf32> to vector<6x32xf32>
    %150 = arith.mulf %145, %149 : vector<6x32xf32>
    %151 = vector.broadcast %129 : vector<1x32xf32> to vector<6x32xf32>
    %152 = arith.mulf %150, %151 : vector<6x32xf32>
    %153 = vector.broadcast %130 : vector<1x32xf32> to vector<6x32xf32>
    %154 = arith.addf %152, %153 : vector<6x32xf32>
    %c0_55 = arith.constant 0 : index
    %c0_56 = arith.constant 0 : index
    %c0_57 = arith.constant 0 : index
    %155 = vector.load %arg11[%c0_55, %c0_56, %c0_57] : memref<1x6x32xf32, #tpu.memory_space<vmem>>, vector<1x6x32xf32>
    %156 = vector.shape_cast %155 : vector<1x6x32xf32> to vector<6x32xf32>
    %157 = vector.shape_cast %154 : vector<6x32xf32> to vector<1x6x32xf32>
    tpu.vector_store %arg11[%c0_55, %c0_56, %c0_57], %157 {strides = array<i32>} : memref<1x6x32xf32, #tpu.memory_space<vmem>>, vector<1x6x32xf32>,
    return
  }
  func.func @transform_0(%arg0: i32) -> (i32, i32, i32) {
    %c0_i32 = arith.constant 0 : i32
    %c0_i32_0 = arith.constant 0 : i32
    %c0_i32_1 = arith.constant 0 : i32
    return %arg0, %c0_i32, %c0_i32_0 : i32, i32, i32
  }
  func.func @transform_1(%arg0: i32) -> (i32, i32, i32) {
    %c0_i32 = arith.constant 0 : i32
    %c0_i32_0 = arith.constant 0 : i32
    %c0_i32_1 = arith.constant 0 : i32
    return %arg0, %c0_i32, %c0_i32_0 : i32, i32, i32
  }
  func.func @transform_2(%arg0: i32) -> (i32, i32) {
    %c0_i32 = arith.constant 0 : i32
    %c0_i32_0 = arith.constant 0 : i32
    %c0_i32_1 = arith.constant 0 : i32
    return %c0_i32, %c0_i32_0 : i32, i32
  }
  func.func @transform_3(%arg0: i32) -> (i32, i32) {
    %c0_i32 = arith.constant 0 : i32
    %c0_i32_0 = arith.constant 0 : i32
    %c0_i32_1 = arith.constant 0 : i32
    return %c0_i32, %c0_i32_0 : i32, i32
  }
  func.func @transform_4(%arg0: i32) -> (i32, i32) {
    %c0_i32 = arith.constant 0 : i32
    %c0_i32_0 = arith.constant 0 : i32
    %c0_i32_1 = arith.constant 0 : i32
    return %c0_i32, %c0_i32_0 : i32, i32
  }
  func.func @transform_5(%arg0: i32) -> (i32, i32) {
    %c0_i32 = arith.constant 0 : i32
    %c0_i32_0 = arith.constant 0 : i32
    %c0_i32_1 = arith.constant 0 : i32
    return %c0_i32, %c0_i32_0 : i32, i32
  }
  func.func @transform_6(%arg0: i32) -> (i32, i32) {
    %c0_i32 = arith.constant 0 : i32
    %c0_i32_0 = arith.constant 0 : i32
    %c0_i32_1 = arith.constant 0 : i32
    return %c0_i32, %c0_i32_0 : i32, i32
  }
  func.func @transform_7(%arg0: i32) -> (i32, i32) {
    %c0_i32 = arith.constant 0 : i32
    %c0_i32_0 = arith.constant 0 : i32
    %c0_i32_1 = arith.constant 0 : i32
    return %c0_i32, %c0_i32_0 : i32, i32
  }
  func.func @transform_8(%arg0: i32) -> (i32, i32) {
    %c0_i32 = arith.constant 0 : i32
    %c0_i32_0 = arith.constant 0 : i32
    %c0_i32_1 = arith.constant 0 : i32
    return %c0_i32, %c0_i32_0 : i32, i32
  }
  func.func @transform_9(%arg0: i32) -> (i32, i32) {
    %c0_i32 = arith.constant 0 : i32
    %c0_i32_0 = arith.constant 0 : i32
    %c0_i32_1 = arith.constant 0 : i32
    return %c0_i32, %c0_i32_0 : i32, i32
  }
  func.func @transform_10(%arg0: i32) -> (i32, i32, i32) {
    %c0_i32 = arith.constant 0 : i32
    %c0_i32_0 = arith.constant 0 : i32
    %c0_i32_1 = arith.constant 0 : i32
    return %arg0, %c0_i32, %c0_i32_0 : i32, i32, i32
  }
}

module attributes {stable_mosaic.version = 11 : i64} {
  func.func @_mha_block_kernel(%arg0: i32, %arg1: memref<1x6x32xf32, #tpu.memory_space<vmem>>, %arg2: memref<1x8x32xf32, #tpu.memory_space<vmem>>, %arg3: memref<32x32xf32, #tpu.memory_space<vmem>>, %arg4: memref<1x32xf32, #tpu.memory_space<vmem>>, %arg5: memref<32x64xf32, #tpu.memory_space<vmem>>, %arg6: memref<1x64xf32, #tpu.memory_space<vmem>>, %arg7: memref<32x32xf32, #tpu.memory_space<vmem>>, %arg8: memref<1x32xf32, #tpu.memory_space<vmem>>, %arg9: memref<1x32xf32, #tpu.memory_space<vmem>>, %arg10: memref<1x32xf32, #tpu.memory_space<vmem>>, %arg11: memref<1x6x32xf32, #tpu.memory_space<vmem>>) attributes {dimension_semantics = [#tpu.dimension_semantics<parallel>], iteration_bounds = array<i64: 2>, scalar_prefetch = 0 : i64, scratch_operands = 0 : i64, tpu.core_type = #tpu.core_type<tc>, window_params = [{transform_indices = @transform_0, window_bounds = array<i64: 1, 6, 32>}, {transform_indices = @transform_1, window_bounds = array<i64: 1, 8, 32>}, {pipeline_mode = #tpu.pipeline_mode<synchronous>, transform_indices = @transform_2, window_bounds = array<i64: 32, 32>}, {pipeline_mode = #tpu.pipeline_mode<synchronous>, transform_indices = @transform_3, window_bounds = array<i64: 1, 32>}, {pipeline_mode = #tpu.pipeline_mode<synchronous>, transform_indices = @transform_4, window_bounds = array<i64: 32, 64>}, {pipeline_mode = #tpu.pipeline_mode<synchronous>, transform_indices = @transform_5, window_bounds = array<i64: 1, 64>}, {pipeline_mode = #tpu.pipeline_mode<synchronous>, transform_indices = @transform_6, window_bounds = array<i64: 32, 32>}, {pipeline_mode = #tpu.pipeline_mode<synchronous>, transform_indices = @transform_7, window_bounds = array<i64: 1, 32>}, {pipeline_mode = #tpu.pipeline_mode<synchronous>, transform_indices = @transform_8, window_bounds = array<i64: 1, 32>}, {pipeline_mode = #tpu.pipeline_mode<synchronous>, transform_indices = @transform_9, window_bounds = array<i64: 1, 32>}, {transform_indices = @transform_10, window_bounds = array<i64: 1, 6, 32>}]} {
    %c0 = arith.constant 0 : index
    %c0_0 = arith.constant 0 : index
    %c0_1 = arith.constant 0 : index
    %0 = vector.load %arg1[%c0, %c0_0, %c0_1] : memref<1x6x32xf32, #tpu.memory_space<vmem>>, vector<1x6x32xf32>
    %1 = vector.shape_cast %0 : vector<1x6x32xf32> to vector<6x32xf32>
    %c0_2 = arith.constant 0 : index
    %c0_3 = arith.constant 0 : index
    %c0_4 = arith.constant 0 : index
    %2 = vector.load %arg2[%c0_2, %c0_3, %c0_4] : memref<1x8x32xf32, #tpu.memory_space<vmem>>, vector<1x8x32xf32>
    %3 = vector.shape_cast %2 : vector<1x8x32xf32> to vector<8x32xf32>
    %4 = arith.truncf %1 : vector<6x32xf32> to vector<6x32xbf16>
    %c0_5 = arith.constant 0 : index
    %c0_6 = arith.constant 0 : index
    %5 = vector.load %arg3[%c0_5, %c0_6] : memref<32x32xf32, #tpu.memory_space<vmem>>, vector<32x32xf32>
    %6 = arith.truncf %5 : vector<32x32xf32> to vector<32x32xbf16>
    %cst = arith.constant dense<0.000000e+00> : vector<6x32xf32>
    %7 = tpu.matmul %4, %6, %cst {dimension_numbers = #tpu.dot_dimension_numbers<[1], [0], [0], [1], [0, 0, 1, 1], [], []>} : vector<6x32xbf16>, vector<32x32xbf16>, vector<6x32xf32> -> vector<6x32xf32>
    %c0_7 = arith.constant 0 : index
    %c0_8 = arith.constant 0 : index
    %8 = vector.load %arg4[%c0_7, %c0_8] : memref<1x32xf32, #tpu.memory_space<vmem>>, vector<1x32xf32>
    %9 = vector.broadcast %8 : vector<1x32xf32> to vector<6x32xf32>
    %10 = arith.addf %7, %9 : vector<6x32xf32>
    %11 = arith.truncf %3 : vector<8x32xf32> to vector<8x32xbf16>
    %c0_9 = arith.constant 0 : index
    %c0_10 = arith.constant 0 : index
    %12 = vector.load %arg5[%c0_9, %c0_10] : memref<32x64xf32, #tpu.memory_space<vmem>>, vector<32x64xf32>
    %13 = arith.truncf %12 : vector<32x64xf32> to vector<32x64xbf16>
    %cst_11 = arith.constant dense<0.000000e+00> : vector<8x64xf32>
    %14 = tpu.matmul %11, %13, %cst_11 {dimension_numbers = #tpu.dot_dimension_numbers<[1], [0], [0], [1], [0, 0, 1, 1], [], []>} : vector<8x32xbf16>, vector<32x64xbf16>, vector<8x64xf32> -> vector<8x64xf32>
    %c0_12 = arith.constant 0 : index
    %c0_13 = arith.constant 0 : index
    %15 = vector.load %arg6[%c0_12, %c0_13] : memref<1x64xf32, #tpu.memory_space<vmem>>, vector<1x64xf32>
    %16 = vector.broadcast %15 : vector<1x64xf32> to vector<8x64xf32>
    %17 = arith.addf %14, %16 : vector<8x64xf32>
    %18 = vector.extract_strided_slice %17 {offsets = [0, 0], sizes = [8, 32], strides = [1, 1]} : vector<8x64xf32> to vector<8x32xf32>
    %19 = vector.extract_strided_slice %17 {offsets = [0, 32], sizes = [8, 32], strides = [1, 1]} : vector<8x64xf32> to vector<8x32xf32>
    %cst_14 = arith.constant 0.000000e+00 : f32
    %20 = vector.broadcast %cst_14 : f32 to vector<6x32xf32>
    %21 = vector.extract_strided_slice %10 {offsets = [0, 0], sizes = [6, 8], strides = [1, 1]} : vector<6x32xf32> to vector<6x8xf32>
    %22 = vector.extract_strided_slice %18 {offsets = [0, 0], sizes = [8, 8], strides = [1, 1]} : vector<8x32xf32> to vector<8x8xf32>
    %23 = vector.extract_strided_slice %19 {offsets = [0, 0], sizes = [8, 8], strides = [1, 1]} : vector<8x32xf32> to vector<8x8xf32>
    %24 = arith.truncf %21 : vector<6x8xf32> to vector<6x8xbf16>
    %25 = arith.truncf %22 : vector<8x8xf32> to vector<8x8xbf16>
    %cst_15 = arith.constant dense<0.000000e+00> : vector<6x8xf32>
    %26 = tpu.matmul %24, %25, %cst_15 {dimension_numbers = #tpu.dot_dimension_numbers<[1], [1], [0], [0], [0, 0, 1, 0], [], []>} : vector<6x8xbf16>, vector<8x8xbf16>, vector<6x8xf32> -> vector<6x8xf32>
    %cst_16 = arith.constant 0.353553385 : f32
    %27 = vector.broadcast %cst_16 : f32 to vector<6x8xf32>
    %28 = arith.mulf %26, %27 : vector<6x8xf32>
    %cst_17 = arith.constant dense<0xFF800000> : vector<6xf32>
    %29 = vector.multi_reduction <maximumf>, %28, %cst_17 [1] : vector<6x8xf32> to vector<6xf32>
    %30 = vector.shape_cast %29 : vector<6xf32> to vector<6x1xf32>
    %31 = vector.broadcast %30 : vector<6x1xf32> to vector<6x8xf32>
    %32 = arith.subf %28, %31 : vector<6x8xf32>
    %33 = math.exp %32 : vector<6x8xf32>
    %cst_18 = arith.constant dense<0.000000e+00> : vector<6xf32>
    %34 = vector.multi_reduction <add>, %33, %cst_18 [1] : vector<6x8xf32> to vector<6xf32>
    %35 = vector.shape_cast %34 : vector<6xf32> to vector<6x1xf32>
    %36 = tpu.reciprocal %35 {approx = true} : vector<6x1xf32> -> vector<6x1xf32>
    %37 = vector.broadcast %36 : vector<6x1xf32> to vector<6x8xf32>
    %38 = arith.mulf %33, %37 : vector<6x8xf32>
    %39 = arith.truncf %38 : vector<6x8xf32> to vector<6x8xbf16>
    %40 = arith.truncf %23 : vector<8x8xf32> to vector<8x8xbf16>
    %cst_19 = arith.constant dense<0.000000e+00> : vector<6x8xf32>
    %41 = tpu.matmul %39, %40, %cst_19 {dimension_numbers = #tpu.dot_dimension_numbers<[1], [0], [0], [1], [0, 0, 1, 1], [], []>} : vector<6x8xbf16>, vector<8x8xbf16>, vector<6x8xf32> -> vector<6x8xf32>
    %c0_20 = arith.constant 0 : index
    %c0_21 = arith.constant 0 : index
    %42 = vector.load %arg7[%c0_20, %c0_21] : memref<32x32xf32, #tpu.memory_space<vmem>>, vector<8x32xf32>
    %43 = arith.truncf %41 : vector<6x8xf32> to vector<6x8xbf16>
    %44 = arith.truncf %42 : vector<8x32xf32> to vector<8x32xbf16>
    %cst_22 = arith.constant dense<0.000000e+00> : vector<6x32xf32>
    %45 = tpu.matmul %43, %44, %cst_22 {dimension_numbers = #tpu.dot_dimension_numbers<[1], [0], [0], [1], [0, 0, 1, 1], [], []>} : vector<6x8xbf16>, vector<8x32xbf16>, vector<6x32xf32> -> vector<6x32xf32>
    %46 = arith.addf %20, %45 : vector<6x32xf32>
    %47 = vector.extract_strided_slice %10 {offsets = [0, 8], sizes = [6, 8], strides = [1, 1]} : vector<6x32xf32> to vector<6x8xf32>
    %48 = vector.extract_strided_slice %18 {offsets = [0, 8], sizes = [8, 8], strides = [1, 1]} : vector<8x32xf32> to vector<8x8xf32>
    %49 = vector.extract_strided_slice %19 {offsets = [0, 8], sizes = [8, 8], strides = [1, 1]} : vector<8x32xf32> to vector<8x8xf32>
    %50 = arith.truncf %47 : vector<6x8xf32> to vector<6x8xbf16>
    %51 = arith.truncf %48 : vector<8x8xf32> to vector<8x8xbf16>
    %cst_23 = arith.constant dense<0.000000e+00> : vector<6x8xf32>
    %52 = tpu.matmul %50, %51, %cst_23 {dimension_numbers = #tpu.dot_dimension_numbers<[1], [1], [0], [0], [0, 0, 1, 0], [], []>} : vector<6x8xbf16>, vector<8x8xbf16>, vector<6x8xf32> -> vector<6x8xf32>
    %cst_24 = arith.constant 0.353553385 : f32
    %53 = vector.broadcast %cst_24 : f32 to vector<6x8xf32>
    %54 = arith.mulf %52, %53 : vector<6x8xf32>
    %cst_25 = arith.constant dense<0xFF800000> : vector<6xf32>
    %55 = vector.multi_reduction <maximumf>, %54, %cst_25 [1] : vector<6x8xf32> to vector<6xf32>
    %56 = vector.shape_cast %55 : vector<6xf32> to vector<6x1xf32>
    %57 = vector.broadcast %56 : vector<6x1xf32> to vector<6x8xf32>
    %58 = arith.subf %54, %57 : vector<6x8xf32>
    %59 = math.exp %58 : vector<6x8xf32>
    %cst_26 = arith.constant dense<0.000000e+00> : vector<6xf32>
    %60 = vector.multi_reduction <add>, %59, %cst_26 [1] : vector<6x8xf32> to vector<6xf32>
    %61 = vector.shape_cast %60 : vector<6xf32> to vector<6x1xf32>
    %62 = tpu.reciprocal %61 {approx = true} : vector<6x1xf32> -> vector<6x1xf32>
    %63 = vector.broadcast %62 : vector<6x1xf32> to vector<6x8xf32>
    %64 = arith.mulf %59, %63 : vector<6x8xf32>
    %65 = arith.truncf %64 : vector<6x8xf32> to vector<6x8xbf16>
    %66 = arith.truncf %49 : vector<8x8xf32> to vector<8x8xbf16>
    %cst_27 = arith.constant dense<0.000000e+00> : vector<6x8xf32>
    %67 = tpu.matmul %65, %66, %cst_27 {dimension_numbers = #tpu.dot_dimension_numbers<[1], [0], [0], [1], [0, 0, 1, 1], [], []>} : vector<6x8xbf16>, vector<8x8xbf16>, vector<6x8xf32> -> vector<6x8xf32>
    %c8 = arith.constant 8 : index
    %c0_28 = arith.constant 0 : index
    %68 = vector.load %arg7[%c8, %c0_28] : memref<32x32xf32, #tpu.memory_space<vmem>>, vector<8x32xf32>
    %69 = arith.truncf %67 : vector<6x8xf32> to vector<6x8xbf16>
    %70 = arith.truncf %68 : vector<8x32xf32> to vector<8x32xbf16>
    %cst_29 = arith.constant dense<0.000000e+00> : vector<6x32xf32>
    %71 = tpu.matmul %69, %70, %cst_29 {dimension_numbers = #tpu.dot_dimension_numbers<[1], [0], [0], [1], [0, 0, 1, 1], [], []>} : vector<6x8xbf16>, vector<8x32xbf16>, vector<6x32xf32> -> vector<6x32xf32>
    %72 = arith.addf %46, %71 : vector<6x32xf32>
    %73 = vector.extract_strided_slice %10 {offsets = [0, 16], sizes = [6, 8], strides = [1, 1]} : vector<6x32xf32> to vector<6x8xf32>
    %74 = vector.extract_strided_slice %18 {offsets = [0, 16], sizes = [8, 8], strides = [1, 1]} : vector<8x32xf32> to vector<8x8xf32>
    %75 = vector.extract_strided_slice %19 {offsets = [0, 16], sizes = [8, 8], strides = [1, 1]} : vector<8x32xf32> to vector<8x8xf32>
    %76 = arith.truncf %73 : vector<6x8xf32> to vector<6x8xbf16>
    %77 = arith.truncf %74 : vector<8x8xf32> to vector<8x8xbf16>
    %cst_30 = arith.constant dense<0.000000e+00> : vector<6x8xf32>
    %78 = tpu.matmul %76, %77, %cst_30 {dimension_numbers = #tpu.dot_dimension_numbers<[1], [1], [0], [0], [0, 0, 1, 0], [], []>} : vector<6x8xbf16>, vector<8x8xbf16>, vector<6x8xf32> -> vector<6x8xf32>
    %cst_31 = arith.constant 0.353553385 : f32
    %79 = vector.broadcast %cst_31 : f32 to vector<6x8xf32>
    %80 = arith.mulf %78, %79 : vector<6x8xf32>
    %cst_32 = arith.constant dense<0xFF800000> : vector<6xf32>
    %81 = vector.multi_reduction <maximumf>, %80, %cst_32 [1] : vector<6x8xf32> to vector<6xf32>
    %82 = vector.shape_cast %81 : vector<6xf32> to vector<6x1xf32>
    %83 = vector.broadcast %82 : vector<6x1xf32> to vector<6x8xf32>
    %84 = arith.subf %80, %83 : vector<6x8xf32>
    %85 = math.exp %84 : vector<6x8xf32>
    %cst_33 = arith.constant dense<0.000000e+00> : vector<6xf32>
    %86 = vector.multi_reduction <add>, %85, %cst_33 [1] : vector<6x8xf32> to vector<6xf32>
    %87 = vector.shape_cast %86 : vector<6xf32> to vector<6x1xf32>
    %88 = tpu.reciprocal %87 {approx = true} : vector<6x1xf32> -> vector<6x1xf32>
    %89 = vector.broadcast %88 : vector<6x1xf32> to vector<6x8xf32>
    %90 = arith.mulf %85, %89 : vector<6x8xf32>
    %91 = arith.truncf %90 : vector<6x8xf32> to vector<6x8xbf16>
    %92 = arith.truncf %75 : vector<8x8xf32> to vector<8x8xbf16>
    %cst_34 = arith.constant dense<0.000000e+00> : vector<6x8xf32>
    %93 = tpu.matmul %91, %92, %cst_34 {dimension_numbers = #tpu.dot_dimension_numbers<[1], [0], [0], [1], [0, 0, 1, 1], [], []>} : vector<6x8xbf16>, vector<8x8xbf16>, vector<6x8xf32> -> vector<6x8xf32>
    %c16 = arith.constant 16 : index
    %c0_35 = arith.constant 0 : index
    %94 = vector.load %arg7[%c16, %c0_35] : memref<32x32xf32, #tpu.memory_space<vmem>>, vector<8x32xf32>
    %95 = arith.truncf %93 : vector<6x8xf32> to vector<6x8xbf16>
    %96 = arith.truncf %94 : vector<8x32xf32> to vector<8x32xbf16>
    %cst_36 = arith.constant dense<0.000000e+00> : vector<6x32xf32>
    %97 = tpu.matmul %95, %96, %cst_36 {dimension_numbers = #tpu.dot_dimension_numbers<[1], [0], [0], [1], [0, 0, 1, 1], [], []>} : vector<6x8xbf16>, vector<8x32xbf16>, vector<6x32xf32> -> vector<6x32xf32>
    %98 = arith.addf %72, %97 : vector<6x32xf32>
    %99 = vector.extract_strided_slice %10 {offsets = [0, 24], sizes = [6, 8], strides = [1, 1]} : vector<6x32xf32> to vector<6x8xf32>
    %100 = vector.extract_strided_slice %18 {offsets = [0, 24], sizes = [8, 8], strides = [1, 1]} : vector<8x32xf32> to vector<8x8xf32>
    %101 = vector.extract_strided_slice %19 {offsets = [0, 24], sizes = [8, 8], strides = [1, 1]} : vector<8x32xf32> to vector<8x8xf32>
    %102 = arith.truncf %99 : vector<6x8xf32> to vector<6x8xbf16>
    %103 = arith.truncf %100 : vector<8x8xf32> to vector<8x8xbf16>
    %cst_37 = arith.constant dense<0.000000e+00> : vector<6x8xf32>
    %104 = tpu.matmul %102, %103, %cst_37 {dimension_numbers = #tpu.dot_dimension_numbers<[1], [1], [0], [0], [0, 0, 1, 0], [], []>} : vector<6x8xbf16>, vector<8x8xbf16>, vector<6x8xf32> -> vector<6x8xf32>
    %cst_38 = arith.constant 0.353553385 : f32
    %105 = vector.broadcast %cst_38 : f32 to vector<6x8xf32>
    %106 = arith.mulf %104, %105 : vector<6x8xf32>
    %cst_39 = arith.constant dense<0xFF800000> : vector<6xf32>
    %107 = vector.multi_reduction <maximumf>, %106, %cst_39 [1] : vector<6x8xf32> to vector<6xf32>
    %108 = vector.shape_cast %107 : vector<6xf32> to vector<6x1xf32>
    %109 = vector.broadcast %108 : vector<6x1xf32> to vector<6x8xf32>
    %110 = arith.subf %106, %109 : vector<6x8xf32>
    %111 = math.exp %110 : vector<6x8xf32>
    %cst_40 = arith.constant dense<0.000000e+00> : vector<6xf32>
    %112 = vector.multi_reduction <add>, %111, %cst_40 [1] : vector<6x8xf32> to vector<6xf32>
    %113 = vector.shape_cast %112 : vector<6xf32> to vector<6x1xf32>
    %114 = tpu.reciprocal %113 {approx = true} : vector<6x1xf32> -> vector<6x1xf32>
    %115 = vector.broadcast %114 : vector<6x1xf32> to vector<6x8xf32>
    %116 = arith.mulf %111, %115 : vector<6x8xf32>
    %117 = arith.truncf %116 : vector<6x8xf32> to vector<6x8xbf16>
    %118 = arith.truncf %101 : vector<8x8xf32> to vector<8x8xbf16>
    %cst_41 = arith.constant dense<0.000000e+00> : vector<6x8xf32>
    %119 = tpu.matmul %117, %118, %cst_41 {dimension_numbers = #tpu.dot_dimension_numbers<[1], [0], [0], [1], [0, 0, 1, 1], [], []>} : vector<6x8xbf16>, vector<8x8xbf16>, vector<6x8xf32> -> vector<6x8xf32>
    %c24 = arith.constant 24 : index
    %c0_42 = arith.constant 0 : index
    %120 = vector.load %arg7[%c24, %c0_42] : memref<32x32xf32, #tpu.memory_space<vmem>>, vector<8x32xf32>
    %121 = arith.truncf %119 : vector<6x8xf32> to vector<6x8xbf16>
    %122 = arith.truncf %120 : vector<8x32xf32> to vector<8x32xbf16>
    %cst_43 = arith.constant dense<0.000000e+00> : vector<6x32xf32>
    %123 = tpu.matmul %121, %122, %cst_43 {dimension_numbers = #tpu.dot_dimension_numbers<[1], [0], [0], [1], [0, 0, 1, 1], [], []>} : vector<6x8xbf16>, vector<8x32xbf16>, vector<6x32xf32> -> vector<6x32xf32>
    %124 = arith.addf %98, %123 : vector<6x32xf32>
    %c0_44 = arith.constant 0 : index
    %c0_45 = arith.constant 0 : index
    %125 = vector.load %arg8[%c0_44, %c0_45] : memref<1x32xf32, #tpu.memory_space<vmem>>, vector<1x32xf32>
    %126 = vector.broadcast %125 : vector<1x32xf32> to vector<6x32xf32>
    %127 = arith.addf %124, %126 : vector<6x32xf32>
    %128 = arith.addf %127, %1 : vector<6x32xf32>
    %c0_46 = arith.constant 0 : index
    %c0_47 = arith.constant 0 : index
    %129 = vector.load %arg9[%c0_46, %c0_47] : memref<1x32xf32, #tpu.memory_space<vmem>>, vector<1x32xf32>
    %c0_48 = arith.constant 0 : index
    %c0_49 = arith.constant 0 : index
    %130 = vector.load %arg10[%c0_48, %c0_49] : memref<1x32xf32, #tpu.memory_space<vmem>>, vector<1x32xf32>
    %cst_50 = arith.constant dense<0.000000e+00> : vector<6xf32>
    %131 = vector.multi_reduction <add>, %128, %cst_50 [1] : vector<6x32xf32> to vector<6xf32>
    %132 = vector.shape_cast %131 : vector<6xf32> to vector<6x1xf32>
    %cst_51 = arith.constant 3.200000e+01 : f32
    %133 = vector.broadcast %cst_51 : f32 to vector<6x1xf32>
    %134 = arith.divf %132, %133 : vector<6x1xf32>
    %135 = vector.broadcast %134 : vector<6x1xf32> to vector<6x32xf32>
    %136 = arith.subf %128, %135 : vector<6x32xf32>
    %137 = vector.broadcast %134 : vector<6x1xf32> to vector<6x32xf32>
    %138 = arith.subf %128, %137 : vector<6x32xf32>
    %139 = arith.mulf %136, %138 : vector<6x32xf32>
    %cst_52 = arith.constant dense<0.000000e+00> : vector<6xf32>
    %140 = vector.multi_reduction <add>, %139, %cst_52 [1] : vector<6x32xf32> to vector<6xf32>
    %141 = vector.shape_cast %140 : vector<6xf32> to vector<6x1xf32>
    %cst_53 = arith.constant 3.200000e+01 : f32
    %142 = vector.broadcast %cst_53 : f32 to vector<6x1xf32>
    %143 = arith.divf %141, %142 : vector<6x1xf32>
    %144 = vector.broadcast %134 : vector<6x1xf32> to vector<6x32xf32>
    %145 = arith.subf %128, %144 : vector<6x32xf32>
    %cst_54 = arith.constant 9.99999974E-6 : f32
    %146 = vector.broadcast %cst_54 : f32 to vector<6x1xf32>
    %147 = arith.addf %143, %146 : vector<6x1xf32>
    %148 = math.rsqrt %147 : vector<6x1xf32>
    %149 = vector.broadcast %148 : vector<6x1xf32> to vector<6x32xf32>
    %150 = arith.mulf %145, %149 : vector<6x32xf32>
    %151 = vector.broadcast %129 : vector<1x32xf32> to vector<6x32xf32>
    %152 = arith.mulf %150, %151 : vector<6x32xf32>
    %153 = vector.broadcast %130 : vector<1x32xf32> to vector<6x32xf32>
    %154 = arith.addf %152, %153 : vector<6x32xf32>
    %c0_55 = arith.constant 0 : index
    %c0_56 = arith.constant 0 : index
    %c0_57 = arith.constant 0 : index
    %155 = vector.load %arg11[%c0_55, %c0_56, %c0_57] : memref<1x6x32xf32, #tpu.memory_space<vmem>>, vector<1x6x32xf32>
    %156 = vector.shape_cast %155 : vector<1x6x32xf32> to vector<6x32xf32>
    %157 = vector.shape_cast %154 : vector<6x32xf32> to vector<1x6x32xf32>
    tpu.vector_store %arg11[%c0_55, %c0_56, %c0_57], %157 {strides = array<i32>} : memref<1x6x32xf32, #tpu.memory_space<vmem>>, vector<1x6x32xf32>,
    return
  }
  func.func @transform_0(%arg0: i32) -> (i32, i32, i32) {
    %c0_i32 = arith.constant 0 : i32
    %c0_i32_0 = arith.constant 0 : i32
    %c0_i32_1 = arith.constant 0 : i32
    return %arg0, %c0_i32, %c0_i32_0 : i32, i32, i32
  }
  func.func @transform_1(%arg0: i32) -> (i32, i32, i32) {
    %c0_i32 = arith.constant 0 : i32
    %c0_i32_0 = arith.constant 0 : i32
    %c0_i32_1 = arith.constant 0 : i32
    return %arg0, %c0_i32, %c0_i32_0 : i32, i32, i32
  }
  func.func @transform_2(%arg0: i32) -> (i32, i32) {
    %c0_i32 = arith.constant 0 : i32
    %c0_i32_0 = arith.constant 0 : i32
    %c0_i32_1 = arith.constant 0 : i32
    return %c0_i32, %c0_i32_0 : i32, i32
  }
  func.func @transform_3(%arg0: i32) -> (i32, i32) {
    %c0_i32 = arith.constant 0 : i32
    %c0_i32_0 = arith.constant 0 : i32
    %c0_i32_1 = arith.constant 0 : i32
    return %c0_i32, %c0_i32_0 : i32, i32
  }
  func.func @transform_4(%arg0: i32) -> (i32, i32) {
    %c0_i32 = arith.constant 0 : i32
    %c0_i32_0 = arith.constant 0 : i32
    %c0_i32_1 = arith.constant 0 : i32
    return %c0_i32, %c0_i32_0 : i32, i32
  }
  func.func @transform_5(%arg0: i32) -> (i32, i32) {
    %c0_i32 = arith.constant 0 : i32
    %c0_i32_0 = arith.constant 0 : i32
    %c0_i32_1 = arith.constant 0 : i32
    return %c0_i32, %c0_i32_0 : i32, i32
  }
  func.func @transform_6(%arg0: i32) -> (i32, i32) {
    %c0_i32 = arith.constant 0 : i32
    %c0_i32_0 = arith.constant 0 : i32
    %c0_i32_1 = arith.constant 0 : i32
    return %c0_i32, %c0_i32_0 : i32, i32
  }
  func.func @transform_7(%arg0: i32) -> (i32, i32) {
    %c0_i32 = arith.constant 0 : i32
    %c0_i32_0 = arith.constant 0 : i32
    %c0_i32_1 = arith.constant 0 : i32
    return %c0_i32, %c0_i32_0 : i32, i32
  }
  func.func @transform_8(%arg0: i32) -> (i32, i32) {
    %c0_i32 = arith.constant 0 : i32
    %c0_i32_0 = arith.constant 0 : i32
    %c0_i32_1 = arith.constant 0 : i32
    return %c0_i32, %c0_i32_0 : i32, i32
  }
  func.func @transform_9(%arg0: i32) -> (i32, i32) {
    %c0_i32 = arith.constant 0 : i32
    %c0_i32_0 = arith.constant 0 : i32
    %c0_i32_1 = arith.constant 0 : i32
    return %c0_i32, %c0_i32_0 : i32, i32
  }
  func.func @transform_10(%arg0: i32) -> (i32, i32, i32) {
    %c0_i32 = arith.constant 0 : i32
    %c0_i32_0 = arith.constant 0 : i32
    %c0_i32_1 = arith.constant 0 : i32
    return %arg0, %c0_i32, %c0_i32_0 : i32, i32, i32
  }
}

module attributes {stable_mosaic.version = 11 : i64} {
  func.func @_ffn_block_kernel(%arg0: i32, %arg1: memref<1x6x32xf32, #tpu.memory_space<vmem>>, %arg2: memref<32x64xf32, #tpu.memory_space<vmem>>, %arg3: memref<1x64xf32, #tpu.memory_space<vmem>>, %arg4: memref<64x32xf32, #tpu.memory_space<vmem>>, %arg5: memref<1x32xf32, #tpu.memory_space<vmem>>, %arg6: memref<1x32xf32, #tpu.memory_space<vmem>>, %arg7: memref<1x32xf32, #tpu.memory_space<vmem>>, %arg8: memref<1x6x32xf32, #tpu.memory_space<vmem>>) attributes {dimension_semantics = [#tpu.dimension_semantics<parallel>], iteration_bounds = array<i64: 2>, scalar_prefetch = 0 : i64, scratch_operands = 0 : i64, tpu.core_type = #tpu.core_type<tc>, window_params = [{transform_indices = @transform_0, window_bounds = array<i64: 1, 6, 32>}, {pipeline_mode = #tpu.pipeline_mode<synchronous>, transform_indices = @transform_1, window_bounds = array<i64: 32, 64>}, {pipeline_mode = #tpu.pipeline_mode<synchronous>, transform_indices = @transform_2, window_bounds = array<i64: 1, 64>}, {pipeline_mode = #tpu.pipeline_mode<synchronous>, transform_indices = @transform_3, window_bounds = array<i64: 64, 32>}, {pipeline_mode = #tpu.pipeline_mode<synchronous>, transform_indices = @transform_4, window_bounds = array<i64: 1, 32>}, {pipeline_mode = #tpu.pipeline_mode<synchronous>, transform_indices = @transform_5, window_bounds = array<i64: 1, 32>}, {pipeline_mode = #tpu.pipeline_mode<synchronous>, transform_indices = @transform_6, window_bounds = array<i64: 1, 32>}, {transform_indices = @transform_7, window_bounds = array<i64: 1, 6, 32>}]} {
    %c0 = arith.constant 0 : index
    %c0_0 = arith.constant 0 : index
    %c0_1 = arith.constant 0 : index
    %0 = vector.load %arg1[%c0, %c0_0, %c0_1] : memref<1x6x32xf32, #tpu.memory_space<vmem>>, vector<1x6x32xf32>
    %1 = vector.shape_cast %0 : vector<1x6x32xf32> to vector<6x32xf32>
    %2 = arith.truncf %1 : vector<6x32xf32> to vector<6x32xbf16>
    %c0_2 = arith.constant 0 : index
    %c0_3 = arith.constant 0 : index
    %3 = vector.load %arg2[%c0_2, %c0_3] : memref<32x64xf32, #tpu.memory_space<vmem>>, vector<32x64xf32>
    %4 = arith.truncf %3 : vector<32x64xf32> to vector<32x64xbf16>
    %cst = arith.constant dense<0.000000e+00> : vector<6x64xf32>
    %5 = tpu.matmul %2, %4, %cst {dimension_numbers = #tpu.dot_dimension_numbers<[1], [0], [0], [1], [0, 0, 1, 1], [], []>} : vector<6x32xbf16>, vector<32x64xbf16>, vector<6x64xf32> -> vector<6x64xf32>
    %c0_4 = arith.constant 0 : index
    %c0_5 = arith.constant 0 : index
    %6 = vector.load %arg3[%c0_4, %c0_5] : memref<1x64xf32, #tpu.memory_space<vmem>>, vector<1x64xf32>
    %7 = vector.broadcast %6 : vector<1x64xf32> to vector<6x64xf32>
    %8 = arith.addf %5, %7 : vector<6x64xf32>
    %cst_6 = arith.constant 0.000000e+00 : f32
    %9 = vector.broadcast %cst_6 : f32 to vector<6x64xf32>
    %10 = arith.maximumf %8, %9 : vector<6x64xf32>
    %11 = arith.truncf %10 : vector<6x64xf32> to vector<6x64xbf16>
    %c0_7 = arith.constant 0 : index
    %c0_8 = arith.constant 0 : index
    %12 = vector.load %arg4[%c0_7, %c0_8] : memref<64x32xf32, #tpu.memory_space<vmem>>, vector<64x32xf32>
    %13 = arith.truncf %12 : vector<64x32xf32> to vector<64x32xbf16>
    %cst_9 = arith.constant dense<0.000000e+00> : vector<6x32xf32>
    %14 = tpu.matmul %11, %13, %cst_9 {dimension_numbers = #tpu.dot_dimension_numbers<[1], [0], [0], [1], [0, 0, 1, 1], [], []>} : vector<6x64xbf16>, vector<64x32xbf16>, vector<6x32xf32> -> vector<6x32xf32>
    %c0_10 = arith.constant 0 : index
    %c0_11 = arith.constant 0 : index
    %15 = vector.load %arg5[%c0_10, %c0_11] : memref<1x32xf32, #tpu.memory_space<vmem>>, vector<1x32xf32>
    %16 = vector.broadcast %15 : vector<1x32xf32> to vector<6x32xf32>
    %17 = arith.addf %14, %16 : vector<6x32xf32>
    %18 = arith.addf %17, %1 : vector<6x32xf32>
    %c0_12 = arith.constant 0 : index
    %c0_13 = arith.constant 0 : index
    %19 = vector.load %arg6[%c0_12, %c0_13] : memref<1x32xf32, #tpu.memory_space<vmem>>, vector<1x32xf32>
    %c0_14 = arith.constant 0 : index
    %c0_15 = arith.constant 0 : index
    %20 = vector.load %arg7[%c0_14, %c0_15] : memref<1x32xf32, #tpu.memory_space<vmem>>, vector<1x32xf32>
    %cst_16 = arith.constant dense<0.000000e+00> : vector<6xf32>
    %21 = vector.multi_reduction <add>, %18, %cst_16 [1] : vector<6x32xf32> to vector<6xf32>
    %22 = vector.shape_cast %21 : vector<6xf32> to vector<6x1xf32>
    %cst_17 = arith.constant 3.200000e+01 : f32
    %23 = vector.broadcast %cst_17 : f32 to vector<6x1xf32>
    %24 = arith.divf %22, %23 : vector<6x1xf32>
    %25 = vector.broadcast %24 : vector<6x1xf32> to vector<6x32xf32>
    %26 = arith.subf %18, %25 : vector<6x32xf32>
    %27 = vector.broadcast %24 : vector<6x1xf32> to vector<6x32xf32>
    %28 = arith.subf %18, %27 : vector<6x32xf32>
    %29 = arith.mulf %26, %28 : vector<6x32xf32>
    %cst_18 = arith.constant dense<0.000000e+00> : vector<6xf32>
    %30 = vector.multi_reduction <add>, %29, %cst_18 [1] : vector<6x32xf32> to vector<6xf32>
    %31 = vector.shape_cast %30 : vector<6xf32> to vector<6x1xf32>
    %cst_19 = arith.constant 3.200000e+01 : f32
    %32 = vector.broadcast %cst_19 : f32 to vector<6x1xf32>
    %33 = arith.divf %31, %32 : vector<6x1xf32>
    %34 = vector.broadcast %24 : vector<6x1xf32> to vector<6x32xf32>
    %35 = arith.subf %18, %34 : vector<6x32xf32>
    %cst_20 = arith.constant 9.99999974E-6 : f32
    %36 = vector.broadcast %cst_20 : f32 to vector<6x1xf32>
    %37 = arith.addf %33, %36 : vector<6x1xf32>
    %38 = math.rsqrt %37 : vector<6x1xf32>
    %39 = vector.broadcast %38 : vector<6x1xf32> to vector<6x32xf32>
    %40 = arith.mulf %35, %39 : vector<6x32xf32>
    %41 = vector.broadcast %19 : vector<1x32xf32> to vector<6x32xf32>
    %42 = arith.mulf %40, %41 : vector<6x32xf32>
    %43 = vector.broadcast %20 : vector<1x32xf32> to vector<6x32xf32>
    %44 = arith.addf %42, %43 : vector<6x32xf32>
    %c0_21 = arith.constant 0 : index
    %c0_22 = arith.constant 0 : index
    %c0_23 = arith.constant 0 : index
    %45 = vector.load %arg8[%c0_21, %c0_22, %c0_23] : memref<1x6x32xf32, #tpu.memory_space<vmem>>, vector<1x6x32xf32>
    %46 = vector.shape_cast %45 : vector<1x6x32xf32> to vector<6x32xf32>
    %47 = vector.shape_cast %44 : vector<6x32xf32> to vector<1x6x32xf32>
    tpu.vector_store %arg8[%c0_21, %c0_22, %c0_23], %47 {strides = array<i32>} : memref<1x6x32xf32, #tpu.memory_space<vmem>>, vector<1x6x32xf32>,
    return
  }
  func.func @transform_0(%arg0: i32) -> (i32, i32, i32) {
    %c0_i32 = arith.constant 0 : i32
    %c0_i32_0 = arith.constant 0 : i32
    %c0_i32_1 = arith.constant 0 : i32
    return %arg0, %c0_i32, %c0_i32_0 : i32, i32, i32
  }
  func.func @transform_1(%arg0: i32) -> (i32, i32) {
    %c0_i32 = arith.constant 0 : i32
    %c0_i32_0 = arith.constant 0 : i32
    %c0_i32_1 = arith.constant 0 : i32
    return %c0_i32, %c0_i32_0 : i32, i32
  }
  func.func @transform_2(%arg0: i32) -> (i32, i32) {
    %c0_i32 = arith.constant 0 : i32
    %c0_i32_0 = arith.constant 0 : i32
    %c0_i32_1 = arith.constant 0 : i32
    return %c0_i32, %c0_i32_0 : i32, i32
  }
  func.func @transform_3(%arg0: i32) -> (i32, i32) {
    %c0_i32 = arith.constant 0 : i32
    %c0_i32_0 = arith.constant 0 : i32
    %c0_i32_1 = arith.constant 0 : i32
    return %c0_i32, %c0_i32_0 : i32, i32
  }
  func.func @transform_4(%arg0: i32) -> (i32, i32) {
    %c0_i32 = arith.constant 0 : i32
    %c0_i32_0 = arith.constant 0 : i32
    %c0_i32_1 = arith.constant 0 : i32
    return %c0_i32, %c0_i32_0 : i32, i32
  }
  func.func @transform_5(%arg0: i32) -> (i32, i32) {
    %c0_i32 = arith.constant 0 : i32
    %c0_i32_0 = arith.constant 0 : i32
    %c0_i32_1 = arith.constant 0 : i32
    return %c0_i32, %c0_i32_0 : i32, i32
  }
  func.func @transform_6(%arg0: i32) -> (i32, i32) {
    %c0_i32 = arith.constant 0 : i32
    %c0_i32_0 = arith.constant 0 : i32
    %c0_i32_1 = arith.constant 0 : i32
    return %c0_i32, %c0_i32_0 : i32, i32
  }
  func.func @transform_7(%arg0: i32) -> (i32, i32, i32) {
    %c0_i32 = arith.constant 0 : i32
    %c0_i32_0 = arith.constant 0 : i32
    %c0_i32_1 = arith.constant 0 : i32
    return %arg0, %c0_i32, %c0_i32_0 : i32, i32, i32
  }
}

module attributes {stable_mosaic.version = 11 : i64} {
  func.func @_layernorm_kernel(%arg0: i32, %arg1: memref<1x6x32xf32, #tpu.memory_space<vmem>>, %arg2: memref<1x32xf32, #tpu.memory_space<vmem>>, %arg3: memref<1x32xf32, #tpu.memory_space<vmem>>, %arg4: memref<1x6x32xf32, #tpu.memory_space<vmem>>) attributes {dimension_semantics = [#tpu.dimension_semantics<parallel>], iteration_bounds = array<i64: 2>, scalar_prefetch = 0 : i64, scratch_operands = 0 : i64, tpu.core_type = #tpu.core_type<tc>, window_params = [{transform_indices = @transform_0, window_bounds = array<i64: 1, 6, 32>}, {pipeline_mode = #tpu.pipeline_mode<synchronous>, transform_indices = @transform_1, window_bounds = array<i64: 1, 32>}, {pipeline_mode = #tpu.pipeline_mode<synchronous>, transform_indices = @transform_2, window_bounds = array<i64: 1, 32>}, {transform_indices = @transform_3, window_bounds = array<i64: 1, 6, 32>}]} {
    %c0 = arith.constant 0 : index
    %c0_0 = arith.constant 0 : index
    %c0_1 = arith.constant 0 : index
    %0 = vector.load %arg1[%c0, %c0_0, %c0_1] : memref<1x6x32xf32, #tpu.memory_space<vmem>>, vector<1x6x32xf32>
    %1 = vector.shape_cast %0 : vector<1x6x32xf32> to vector<6x32xf32>
    %c0_2 = arith.constant 0 : index
    %c0_3 = arith.constant 0 : index
    %2 = vector.load %arg2[%c0_2, %c0_3] : memref<1x32xf32, #tpu.memory_space<vmem>>, vector<1x32xf32>
    %c0_4 = arith.constant 0 : index
    %c0_5 = arith.constant 0 : index
    %3 = vector.load %arg3[%c0_4, %c0_5] : memref<1x32xf32, #tpu.memory_space<vmem>>, vector<1x32xf32>
    %cst = arith.constant dense<0.000000e+00> : vector<6xf32>
    %4 = vector.multi_reduction <add>, %1, %cst [1] : vector<6x32xf32> to vector<6xf32>
    %5 = vector.shape_cast %4 : vector<6xf32> to vector<6x1xf32>
    %cst_6 = arith.constant 3.200000e+01 : f32
    %6 = vector.broadcast %cst_6 : f32 to vector<6x1xf32>
    %7 = arith.divf %5, %6 : vector<6x1xf32>
    %8 = vector.broadcast %7 : vector<6x1xf32> to vector<6x32xf32>
    %9 = arith.subf %1, %8 : vector<6x32xf32>
    %10 = vector.broadcast %7 : vector<6x1xf32> to vector<6x32xf32>
    %11 = arith.subf %1, %10 : vector<6x32xf32>
    %12 = arith.mulf %9, %11 : vector<6x32xf32>
    %cst_7 = arith.constant dense<0.000000e+00> : vector<6xf32>
    %13 = vector.multi_reduction <add>, %12, %cst_7 [1] : vector<6x32xf32> to vector<6xf32>
    %14 = vector.shape_cast %13 : vector<6xf32> to vector<6x1xf32>
    %cst_8 = arith.constant 3.200000e+01 : f32
    %15 = vector.broadcast %cst_8 : f32 to vector<6x1xf32>
    %16 = arith.divf %14, %15 : vector<6x1xf32>
    %17 = vector.broadcast %7 : vector<6x1xf32> to vector<6x32xf32>
    %18 = arith.subf %1, %17 : vector<6x32xf32>
    %cst_9 = arith.constant 9.99999974E-6 : f32
    %19 = vector.broadcast %cst_9 : f32 to vector<6x1xf32>
    %20 = arith.addf %16, %19 : vector<6x1xf32>
    %21 = math.rsqrt %20 : vector<6x1xf32>
    %22 = vector.broadcast %21 : vector<6x1xf32> to vector<6x32xf32>
    %23 = arith.mulf %18, %22 : vector<6x32xf32>
    %24 = vector.broadcast %2 : vector<1x32xf32> to vector<6x32xf32>
    %25 = arith.mulf %23, %24 : vector<6x32xf32>
    %26 = vector.broadcast %3 : vector<1x32xf32> to vector<6x32xf32>
    %27 = arith.addf %25, %26 : vector<6x32xf32>
    %c0_10 = arith.constant 0 : index
    %c0_11 = arith.constant 0 : index
    %c0_12 = arith.constant 0 : index
    %28 = vector.load %arg4[%c0_10, %c0_11, %c0_12] : memref<1x6x32xf32, #tpu.memory_space<vmem>>, vector<1x6x32xf32>
    %29 = vector.shape_cast %28 : vector<1x6x32xf32> to vector<6x32xf32>
    %30 = vector.shape_cast %27 : vector<6x32xf32> to vector<1x6x32xf32>
    tpu.vector_store %arg4[%c0_10, %c0_11, %c0_12], %30 {strides = array<i32>} : memref<1x6x32xf32, #tpu.memory_space<vmem>>, vector<1x6x32xf32>,
    return
  }
  func.func @transform_0(%arg0: i32) -> (i32, i32, i32) {
    %c0_i32 = arith.constant 0 : i32
    %c0_i32_0 = arith.constant 0 : i32
    %c0_i32_1 = arith.constant 0 : i32
    return %arg0, %c0_i32, %c0_i32_0 : i32, i32, i32
  }
  func.func @transform_1(%arg0: i32) -> (i32, i32) {
    %c0_i32 = arith.constant 0 : i32
    %c0_i32_0 = arith.constant 0 : i32
    %c0_i32_1 = arith.constant 0 : i32
    return %c0_i32, %c0_i32_0 : i32, i32
  }
  func.func @transform_2(%arg0: i32) -> (i32, i32) {
    %c0_i32 = arith.constant 0 : i32
    %c0_i32_0 = arith.constant 0 : i32
    %c0_i32_1 = arith.constant 0 : i32
    return %c0_i32, %c0_i32_0 : i32, i32
  }
  func.func @transform_3(%arg0: i32) -> (i32, i32, i32) {
    %c0_i32 = arith.constant 0 : i32
    %c0_i32_0 = arith.constant 0 : i32
    %c0_i32_1 = arith.constant 0 : i32
    return %arg0, %c0_i32, %c0_i32_0 : i32, i32, i32
  }
}

</mosaic_0001>

<bundles_post_ra>
// kernel: transformer_forward.16
= control target key start
LH: loop header
LB: loop body
LE: loop exit
PB: predicated region body
PF: predicated region fallthrough
CT: control target
= control target key end

     0   :  { %s301_s12 = smov 0   ;;  %s327_s0 = inlined_call_operand.vmem [shape: f32[2,8,32], index: 0, kind: input, shape index: {}]   ;;  %s328_s1 = inlined_call_operand.vmem [shape: f32[1,32], index: 1, kind: input, shape index: {}]   ;;  %s329_s2 = inlined_call_operand.vmem [shape: f32[1,32], index: 2, kind: input, shape index: {}]   ;;  %s330_s3 = inlined_call_operand.vmem [shape: f32[2,8,32], index: 3, kind: output, shape index: {}]  }
   0x1 LB: > { %s252_s13 = sadd.s32 4294967295, %s279_s12   ;;  %p256_p0 = scmp.ge.s32.totalorder %s279_s12, 1  ;;  %s279_s12 = sphi %s301_s12, %s13_s12  }
   0x2   : > { %p136_p1 = scmp.lt.s32.totalorder %s279_s12, 3 }
   0x4   : > { %p137_p2 = pnand %p256_p0, %p136_p1 }
   0x5   : > { %p158_p3 = scmp.lt.s32.totalorder (!%p137_p2), %s252_s13, 1  ;;  %vm169_vm0 = vcmask (!%p137_p2), 261120   ;;  %v259_v11 = vld [vmem:[%s328_s1] ss:$0 sm:$0xff] (!%p137_p2) }
   0x6   : > { %140 = sbr.rel (%p137_p2) target bundleno = 331 (0x14b), region = 32  ;;  %v260_v13 = vld [vmem:[%s329_s2] ss:$0 sm:$0xff] (!%p137_p2) }
   0xd   : > { %s332_s13 = smov (!%p158_p3, %s252_s13), 1 }
   0xe   : > { %s257_s14 = sshll.u32 %s332_s13, 3 }
   0xf   : > { %s161_s17 = scalar_lea.vmem %s327_s0, %s257_s14  ;;  %s165_s24 = scalar_lea.vmem %s330_s3, %s257_s14 }
  0x10   : > { %v166_v0 = vld [vmem:[%s161_s17] sm:$0xff] }
  0x11   : > { %v170_v1 = vsel %vm169_vm0, %v166_v0, 0.0 }
  0x12   : > { %171 = vadd.xlane.f32.xlu0 %v170_v1 }
  0x9f   : > { %v172_v2 = vpop.xlane.xlu0 %171 }
  0xa0   : > { %v174_v3 = vmul.f32 0.03125, %v172_v2 }
  0xa2   : > { %v175_v4 = vsub.f32 %v166_v0, %v174_v3 }
  0xa4   : > { %v176_v5 = vmul.f32 %v175_v4, %v175_v4 }
  0xa6   : > { %v177_v6 = vsel %vm169_vm0, %v176_v5, 0.0 }
  0xa7   : > { %178 = vadd.xlane.f32.xlu0 %v177_v6 }
 0x134   : > { %v179_v7 = vpop.xlane.xlu0 %178 }
 0x135   : > { %v180_v8 = vmul.f32 0.03125, %v179_v7 }
 0x137   : > { %v181_v9 = vadd.f32 1e-05, %v180_v8 }
 0x139   : > { %271 = vrsqrt.f32 %v181_v9 }
 0x143   : > { %v272_v10 = vpop.eup %271 }
 0x144   : > { %v183_v12 = vmul.f32 %v272_v10, %v175_v4 }
 0x146   : > { %v190_v14 = vmul.f32 %v259_v11, %v183_v12 }
 0x148   : > { %v197_v15 = vadd.f32 %v260_v13, %v190_v14 }
 0x14a   : > { %198 = vst.msk [vmem:[%s165_s24] sm:$0xff] %vm169_vm0, %v197_v15 }
 0x14b PF: > { %s13_s12 = sadd.s32 1, %s279_s12  }
 0x14c   : > { %p10_p4 = scmp.ge.s32.totalorder %s13_s12, 4  }
 0x14e   :  { %12 = sbr.rel (!%p10_p4) target bundleno = 1 (0x1), region = 62 }

// kernel: transformer_forward.13
= control target key start
LH: loop header
LB: loop body
LE: loop exit
PB: predicated region body
PF: predicated region fallthrough
CT: control target
= control target key end

     0   :  { %s589_s24 = smov 0   ;;  %s665_s0 = inlined_call_operand.vmem [shape: f32[2,8,32], index: 0, kind: input, shape index: {}]   ;;  %s666_s1 = inlined_call_operand.vmem [shape: f32[32,64], index: 1, kind: input, shape index: {}]   ;;  %s667_s2 = inlined_call_operand.vmem [shape: f32[1,64], index: 2, kind: input, shape index: {}]   ;;  %s668_s3 = inlined_call_operand.vmem [shape: f32[64,32], index: 3, kind: input, shape index: {}]   ;;  %s669_s4 = inlined_call_operand.vmem [shape: f32[1,32], index: 4, kind: input, shape index: {}]   ;;  %s670_s5 = inlined_call_operand.vmem [shape: f32[1,32], index: 5, kind: input, shape index: {}]   ;;  %s671_s6 = inlined_call_operand.vmem [shape: f32[1,32], index: 6, kind: input, shape index: {}]   ;;  %s672_s7 = inlined_call_operand.vmem [shape: f32[2,8,32], index: 7, kind: output, shape index: {}]  }
   0x1 LB: > { %s484_s25 = sadd.s32 4294967295, %s545_s24   ;;  %p488_p0 = scmp.ge.s32.totalorder %s545_s24, 1  ;;  %s545_s24 = sphi %s589_s24, %s17_s24  }
   0x2   : > { %p236_p1 = scmp.lt.s32.totalorder %s545_s24, 3 }
   0x4   : > { %p237_p2 = pnand %p488_p0, %p236_p1 }
   0x5   : > { %v277_v0 = vld [vmem:[%s666_s1] sm:$0xff] (!%p237_p2)  ;;  %v278_v1 = vld [vmem:[%s666_s1 + $0x8] sm:$0xff] (!%p237_p2)  ;;  %v279_v2 = vld [vmem:[%s666_s1 + $0x10] sm:$0xff] (!%p237_p2)  ;;  %p266_p3 = scmp.lt.s32.totalorder (!%p237_p2), %s484_s25, 1  ;;  %v547_v3 = vmov (!%p237_p2), 0.0   ;;  %vm548_vm0 = vmmov (!%p237_p2), 0  }
   0x6   : > { %240 = sbr.rel (%p237_p2) target bundleno = 767 (0x2ff), region = 48  ;;  %507 = vmatprep.subr.bf16.mxu0 (!%p237_p2), %v547_v3  ;;  %v281_v4 = vpack.c.bf16 (!%p237_p2), %v278_v1, %v277_v0  ;;  %v280_v5 = vld [vmem:[%s666_s1 + $0x18] sm:$0xff] (!%p237_p2)  ;;  %511 = vmatprep.mubr.msk.bf16.mxu0 (!%p237_p2), %vm548_vm0, %v547_v3  ;;  %v336_v6 = vld [vmem:[%s668_s3] sm:$0xff] (!%p237_p2)  ;;  %v337_v7 = vld [vmem:[%s668_s3 + $0x8] sm:$0xff] (!%p237_p2)  ;;  %vm290_vm1 = vcmask (!%p237_p2), 261120   ;;  %vm355_vm2 = vcmask (!%p237_p2), 523264  }
   0x7   : > { %515 = vmatprep.subr.bf16.mxu1 (!%p237_p2), %v547_v3  ;;  %v344_v8 = vpack.c.bf16 (!%p237_p2), %v337_v7, %v336_v6  ;;  %v338_v9 = vld [vmem:[%s668_s3 + $0x10] sm:$0xff] (!%p237_p2)  ;;  %v339_v10 = vld [vmem:[%s668_s3 + $0x18] sm:$0xff] (!%p237_p2)  ;;  %523 = vmatprep.mubr.msk.bf16.mxu1 (!%p237_p2), %vm548_vm0, %v547_v3  ;;  %v282_v11 = vpack.c.bf16 (!%p237_p2), %v280_v5, %v279_v2  ;;  %v340_v15 = vld [vmem:[%s668_s3 + $0x20] sm:$0xff] (!%p237_p2) }
   0x8   : > { %508 = vmatpush3.bf16.msra.mxu0 (!%p237_p2), %v281_v4  ;;  %v345_v12 = vpack.c.bf16 (!%p237_p2), %v339_v10, %v338_v9  ;;  %v341_v16 = vld [vmem:[%s668_s3 + $0x28] sm:$0xff] (!%p237_p2)  ;;  %v342_v18 = vld [vmem:[%s668_s3 + $0x30] sm:$0xff] (!%p237_p2)  ;;  %v343_v19 = vld [vmem:[%s668_s3 + $0x38] sm:$0xff] (!%p237_p2) }
   0x9   : > { %509 = vmatprep.subr.bf16.mxu0 (!%p237_p2), %v547_v3  ;;  %516 = vmatpush3.bf16.msra.mxu1 (!%p237_p2), %v344_v8  ;;  %v346_v17 = vpack.c.bf16 (!%p237_p2), %v341_v16, %v340_v15  ;;  %v347_v20 = vpack.c.bf16 (!%p237_p2), %v343_v19, %v342_v18  ;;  %v491_v21 = vld [vmem:[%s667_s2] ss:$0 sm:$0xff] (!%p237_p2) }
   0xa   : > { %517 = vmatprep.subr.bf16.mxu1 (!%p237_p2), %v547_v3  ;;  %v493_v29 = vld [vmem:[%s669_s4] ss:$0 sm:$0xff] (!%p237_p2) }
   0xb   : > { %v495_v46 = vld [vmem:[%s670_s5] ss:$0 sm:$0xff] (!%p237_p2) }
   0xc   : > { %510 = vmatpush3.bf16.msra.mxu0 (!%p237_p2), %v282_v11  ;;  %v496_v48 = vld [vmem:[%s671_s6] ss:$0 sm:$0xff] (!%p237_p2) }
   0xd   : > { %s674_s25 = smov (!%p266_p3, %s484_s25), 1  ;;  %518 = vmatpush3.bf16.msra.mxu1 %v345_v12 }
   0xe   : > { %s489_s19 = sshll.u32 %s674_s25, 3  ;;  %519 = vmatprep.subr.bf16.mxu1 %v547_v3 }
   0xf   : > { %s269_s22 = scalar_lea.vmem %s665_s0, %s489_s19  ;;  %s273_s21 = scalar_lea.vmem %s672_s7, %s489_s19 }
  0x10   : > { %v275_v13 = vld [vmem:[%s269_s22] sm:$0xff] }
  0x11   : > { %v276_v14 = vpack.c.bf16 %v275_v13, %v275_v13  ;;  %520 = vmatpush3.bf16.msra.mxu1 %v346_v17 }
  0x12   : > { %521 = vmatprep.subr.bf16.mxu1 %v547_v3 }
  0x13   : > { %512 = vmatmul.mubr.msk.bf16.vlgmr.msra.gmra.mrb[0].mxu0 %vm290_vm1, %v276_v14 }
  0x15   : > { %522 = vmatpush3.bf16.msra.mxu1 %v347_v20 }
  0xe6   : > { %v328_v22 = vpop.f32.mrb[0].mxu0 }
  0xe7   : > { %v329_v23 = vadd.f32 %v491_v21, %v328_v22  ;;  %v513_v24 = vpop.f32.mrb[1].mxu0 }
  0xe8   : > { %v331_v25 = vpop.f32.mrb[2].mxu0 }
  0xe9   : > { %v334_v26 = vmax.f32 %v329_v23, 0.0  ;;  %v514_v27 = vpop.f32.mrb[3].mxu0 }
  0xeb   : > { %v335_v28 = vpack.c.bf16 %v334_v26, %v334_v26 }
  0xed   : > { %524 = vmatmul.mubr.msk.bf16.vlgmr.msra.gmra.mrb[0].mxu1 %vm355_vm2, %v335_v28 }
 0x1c0   : > { %v393_v30 = vpop.f32.mrb[0].mxu1 }
 0x1c1   : > { %v394_v31 = vadd.f32 %v493_v29, %v393_v30  ;;  %v525_v32 = vpop.f32.mrb[1].mxu1 }
 0x1c2   : > { %v396_v33 = vpop.f32.mrb[2].mxu1 }
 0x1c3   : > { %v526_v34 = vpop.f32.mrb[3].mxu1  ;;  %v399_v35 = vadd.f32 %v394_v31, %v275_v13 }
 0x1c5   : > { %v402_v36 = vsel %vm290_vm1, %v399_v35, 0.0 }
 0x1c6   : > { %403 = vadd.xlane.f32.xlu0 %v402_v36 }
 0x253   : > { %v404_v37 = vpop.xlane.xlu0 %403 }
 0x254   : > { %v406_v38 = vmul.f32 0.03125, %v404_v37 }
 0x256   : > { %v407_v39 = vsub.f32 %v399_v35, %v406_v38 }
 0x258   : > { %v408_v40 = vmul.f32 %v407_v39, %v407_v39 }
 0x25a   : > { %v409_v41 = vsel %vm290_vm1, %v408_v40, 0.0 }
 0x25b   : > { %410 = vadd.xlane.f32.xlu0 %v409_v41 }
 0x2e8   : > { %v411_v42 = vpop.xlane.xlu0 %410 }
 0x2e9   : > { %v412_v43 = vmul.f32 0.03125, %v411_v42 }
 0x2eb   : > { %v413_v44 = vadd.f32 1e-05, %v412_v43 }
 0x2ed   : > { %537 = vrsqrt.f32 %v413_v44 }
 0x2f7   : > { %v538_v45 = vpop.eup %537 }
 0x2f8   : > { %v415_v47 = vmul.f32 %v538_v45, %v407_v39 }
 0x2fa   : > { %v422_v49 = vmul.f32 %v495_v46, %v415_v47 }
 0x2fc   : > { %v429_v50 = vadd.f32 %v496_v48, %v422_v49 }
 0x2fe   : > { %430 = vst.msk [vmem:[%s273_s21] sm:$0xff] %vm290_vm1, %v429_v50 }
 0x2ff PF: > { %s17_s24 = sadd.s32 1, %s545_s24  }
 0x300   : > { %p14_p4 = scmp.ge.s32.totalorder %s17_s24, 4  }
 0x302   :  { %16 = sbr.rel (!%p14_p4) target bundleno = 1 (0x1), region = 78 }

// kernel: transformer_forward.17
= control target key start
LH: loop header
LB: loop body
LE: loop exit
PB: predicated region body
PF: predicated region fallthrough
CT: control target
= control target key end

     0   :  { %s1497_s13 = smov 0   ;;  %s1676_s0 = inlined_call_operand.vmem [shape: f32[2,6,32], index: 0, kind: input, shape index: {}, may-alias: {0,1}]   ;;  %s1677_s1 = inlined_call_operand.vmem [shape: f32[2,6,32], index: 1, kind: input, shape index: {}, may-alias: {0,1}]   ;;  %s1678_s2 = inlined_call_operand.vmem [shape: f32[32,32], index: 2, kind: input, shape index: {}]   ;;  %s1679_s3 = inlined_call_operand.vmem [shape: f32[1,32], index: 3, kind: input, shape index: {}]   ;;  %s1680_s4 = inlined_call_operand.vmem [shape: f32[32,64], index: 4, kind: input, shape index: {}]   ;;  %s1681_s5 = inlined_call_operand.vmem [shape: f32[1,64], index: 5, kind: input, shape index: {}]   ;;  %s1682_s6 = inlined_call_operand.vmem [shape: f32[32,32], index: 6, kind: input, shape index: {}]   ;;  %s1683_s7 = inlined_call_operand.vmem [shape: f32[1,32], index: 7, kind: input, shape index: {}]   ;;  %s1684_s8 = inlined_call_operand.vmem [shape: f32[1,32], index: 8, kind: input, shape index: {}]   ;;  %s1685_s9 = inlined_call_operand.vmem [shape: f32[1,32], index: 9, kind: input, shape index: {}]   ;;  %s1686_s10 = inlined_call_operand.vmem [shape: f32[2,6,32], index: 10, kind: output, shape index: {}]  }
   0x1 LB: > { %s1243_s14 = sadd.s32 4294967295, %s1431_s13   ;;  %p1247_p0 = scmp.ge.s32.totalorder %s1431_s13, 1  ;;  %s1431_s13 = sphi %s1497_s13, %s20_s13  }
   0x2   : > { %p320_p1 = scmp.lt.s32.totalorder %s1431_s13, 3 }
   0x4   : > { %p321_p2 = pnand %p1247_p0, %p320_p1 }
   0x5   : > { %v434_v0 = vld [vmem:[%s1680_s4] sm:$0xff] (!%p321_p2)  ;;  %v435_v1 = vld [vmem:[%s1680_s4 + $0x8] sm:$0xff] (!%p321_p2)  ;;  %v436_v2 = vld [vmem:[%s1680_s4 + $0x10] sm:$0xff] (!%p321_p2)  ;;  %p360_p3 = scmp.lt.s32.totalorder (!%p321_p2), %s1243_s14, 1  ;;  %v1433_v3 = vmov (!%p321_p2), 0.0   ;;  %vm1434_vm0 = vmmov (!%p321_p2), 0  }
   0x6   : > { %324 = sbr.rel (%p321_p2) target bundleno = 2924 (0xb6c), region = 60  ;;  %1310 = vmatprep.subr.bf16.mxu1 (!%p321_p2), %v1433_v3  ;;  %v438_v4 = vpack.c.bf16 (!%p321_p2), %v435_v1, %v434_v0  ;;  %v437_v5 = vld [vmem:[%s1680_s4 + $0x18] sm:$0xff] (!%p321_p2)  ;;  %1302 = vmatprep.subr.bf16.mxu0 (!%p321_p2), %v1433_v3  ;;  %v376_v6 = vld [vmem:[%s1678_s2] sm:$0xff] (!%p321_p2)  ;;  %v377_v7 = vld [vmem:[%s1678_s2 + $0x8] sm:$0xff] (!%p321_p2)  ;;  %vm389_vm1 = vcmask (!%p321_p2), 261120   ;;  %vm492_vm2 = vcmask (!%p321_p2), 64512  }
   0x7   : > { %v380_v8 = vpack.c.bf16 (!%p321_p2), %v377_v7, %v376_v6  ;;  %1314 = vmatprep.mubr.msk.bf16.mxu1 (!%p321_p2), %vm1434_vm0, %v1433_v3  ;;  %v378_v9 = vld [vmem:[%s1678_s2 + $0x10] sm:$0xff] (!%p321_p2)  ;;  %v379_v10 = vld [vmem:[%s1678_s2 + $0x18] sm:$0xff] (!%p321_p2)  ;;  %1306 = vmatprep.mubr.msk.bf16.mxu0 (!%p321_p2), %vm1434_vm0, %v1433_v3  ;;  %v439_v11 = vpack.c.bf16 (!%p321_p2), %v437_v5, %v436_v2  ;;  %v1253_v17 = vld [vmem:[%s1681_s5] ss:$0 sm:$0xff] (!%p321_p2)  ;;  %s1435_s23 = smov (!%p321_p2), 120   ;;  %vm540_vm3 = vcmask (!%p321_p2), 46080  }
   0x8   : > { %1311 = vmatpush3.bf16.msra.mxu1 (!%p321_p2), %v438_v4  ;;  %v381_v12 = vpack.c.bf16 (!%p321_p2), %v379_v10, %v378_v9  ;;  %v1251_v18 = vld [vmem:[%s1679_s3] ss:$0 sm:$0xff] (!%p321_p2)  ;;  %s1436_s24 = smov (!%p321_p2), 96   ;;  %vm560_vm4 = vcmask (!%p321_p2), 1042432   ;;  %s1437_s25 = smov (!%p321_p2), 88   ;;  %vm556_vm5 = vcmask (!%p321_p2), 48128  }
   0x9   : > { %1312 = vmatprep.subr.bf16.mxu1 (!%p321_p2), %v1433_v3  ;;  %1303 = vmatpush3.bf16.msra.mxu0 (!%p321_p2), %v380_v8  ;;  %s1438_s26 = smov (!%p321_p2), 112   ;;  %v719_v63 = vld [vmem:[%s1682_s6 + $0x8] sm:$0xff] (!%p321_p2)  ;;  %vm725_vm6 = vcmask (!%p321_p2), 1043456   ;;  %v604_v6 = vld [vmem:[%s1682_s6] sm:$0xff] (!%p321_p2)  ;;  %s1439_s12 = smov (!%p321_p2), 80   ;;  %vm1148_vm7 = vcmask (!%p321_p2), 259072  }
   0xa   : > { %1304 = vmatprep.subr.bf16.mxu0 (!%p321_p2), %v1433_v3  ;;  %v721_v0 = vpack.c.bf16 (!%p321_p2), %v719_v63, %v719_v63  ;;  %v606_v7 = vpack.c.bf16 (!%p321_p2), %v604_v6, %v604_v6  ;;  %s1440_s15 = smov (!%p321_p2), 104   ;;  %s1441_s18 = smov (!%p321_p2), 72  }
   0xc   : > { %1313 = vmatpush3.bf16.msra.mxu1 (!%p321_p2), %v439_v11  ;;  %v727_v1 = vsel (!%p321_p2), %vm725_vm6, %v721_v0, 0  ;;  %v773_v11 = vsel (!%p321_p2), %vm725_vm6, %v606_v7, 0 }
   0xd   : > { %s1688_s14 = smov (!%p360_p3, %s1243_s14), 1  ;;  %1305 = vmatpush3.bf16.msra.mxu0 %v381_v12  ;;  %1324 = vmatprep.subr.bf16.mxu1 %v1433_v3 }
   0xe   : > { %s1536_s11 = sshll.u32 %s1688_s14, 3  ;;  %1318 = vmatprep.subr.bf16.mxu0 %v1433_v3 }
   0xf   : > { %s367_s16 = scalar_lea.vmem %s1677_s1, %s1536_s11  ;;  %s363_s19 = scalar_lea.vmem %s1676_s0, %s1536_s11 }
  0x10   : > { %v374_v13 = vld [vmem:[%s367_s16] sm:$0x3f]  ;;  %s371_s28 = scalar_lea.vmem %s1686_s10, %s1536_s11 }
  0x11   : > { %v433_v14 = vpack.c.bf16 %v374_v13, %v374_v13  ;;  %v1547_v15 = vld [vmem:[%s363_s19] sm:$0x3f] }
  0x12   : > { %v375_v16 = vpack.c.bf16 %v1547_v15, %v1547_v15 }
  0x13   : > { %1315 = vmatmul.mubr.msk.bf16.vlgmr.msra.gmra.mrb[0].mxu1 %vm389_vm1, %v433_v14 }
  0x14   : > { %1307 = vmatmul.mubr.msk.bf16.vlgmr.msra.gmra.mrb[0].mxu0 %vm389_vm1, %v375_v16  ;;  %1326 = vmatprep.mubr.msk.bf16.mxu1 %vm1434_vm0, %v1433_v3 }
  0x15   : > { %1320 = vmatprep.mubr.msk.bf16.mxu0 %vm1434_vm0, %v1433_v3 }
  0xe6   : > { %v484_v19 = vpop.f32.mrb[0].mxu1 }
  0xe7   : > { %v485_v20 = vadd.f32 %v1253_v17, %v484_v19  ;;  %v1316_v21 = vpop.f32.mrb[1].mxu1  ;;  %v427_v22 = vpop.f32.mrb[0].mxu0 }
  0xe8   : > { %v487_v23 = vpop.f32.mrb[2].mxu1  ;;  %v428_v24 = vadd.f32 %v1251_v18, %v427_v22  ;;  %v1308_v25 = vpop.f32.mrb[1].mxu0 }
  0xe9   : > { %v1563_v26 = vpack.c.bf16 %v485_v20, %v485_v20  ;;  %v1317_v27 = vpop.f32.mrb[3].mxu1  ;;  %v430_v28 = vpop.f32.mrb[2].mxu0 }
  0xea   : > { %v1309_v29 = vpop.f32.mrb[3].mxu0  ;;  %v1566_v30 = vpack.c.bf16 %v428_v24, %v428_v24 }
  0xeb   : > { %610 = vrot.lane.b32.xlu0 %v1563_v26, %s1435_s23  ;;  %v497_v31 = vsel %vm492_vm2, %v1563_v26, 0 }
  0xec   : > { %1319 = vmatpush3.bf16.xpose.msra.mxu0 %v497_v31 }
  0xed   : > { %1330 = vmatprep.subr.bf16.mxu0 %v1433_v3 }
  0xef   : > { %608 = vrot.lane.b32.xlu0 %v1566_v30, %s1435_s23 }
  0xf3   : > { %1321 = vmatmul.mubr.msk.bf16.vlgmr.msra.gmra.mrb[4].mxu0 %vm492_vm2, %v1566_v30 }
  0xf4   : > { %1332 = vmatprep.mubr.msk.bf16.mxu0 %vm1434_vm0, %v1433_v3 }
 0x15d   : > { %v611_v32 = vpop.permute.xlu0 %610 }
 0x15e   : > { %v616_v33 = vsel %vm492_vm2, %v611_v32, 0 }
 0x15f   : > { %1331 = vmatpush3.bf16.xpose.msra.mxu0 %v616_v33 }
 0x160   : > { %1342 = vmatprep.subr.bf16.mxu0 %v1433_v3 }
 0x161   : > { %v609_v34 = vpop.permute.xlu0 %608 }
 0x166   : > { %1333 = vmatmul.mubr.msk.bf16.vlgmr.msra.gmra.mrb[8].mxu0 %vm492_vm2, %v609_v34 }
 0x167   : > { %1344 = vmatprep.mubr.msk.bf16.mxu0 %vm1434_vm0, %v1433_v3  ;;  %1343 = vmatpush3.bf16.msra.mxu0 %v727_v1 }
 0x168   : > { %1354 = vmatprep.subr.bf16.mxu0 %v1433_v3 }
 0x1c6   : > { %v533_v35 = vpop.f32.mrb[4].mxu0 }
 0x1c7   : > { %v539_v36 = vmul.f32 0.35355338, %v533_v35  ;;  %v1322_v37 = vpop.f32.mrb[5].mxu0 }
 0x1c8   : > { %v536_v38 = vpop.f32.mrb[6].mxu0 }
 0x1c9   : > { %v1323_v39 = vpop.f32.mrb[7].mxu0  ;;  %v541_v40 = vsel %vm540_vm3, %v539_v36, -inf }
 0x1ca   : > { %542 = vmax.xlane.f32.xlu1 %v541_v40 }
 0x239   : > { %v652_v41 = vpop.f32.mrb[8].mxu0 }
 0x23a   : > { %v658_v42 = vmul.f32 0.35355338, %v652_v41  ;;  %v1334_v43 = vpop.f32.mrb[9].mxu0 }
 0x23b   : > { %v655_v44 = vpop.f32.mrb[10].mxu0 }
 0x23c   : > { %v1335_v45 = vpop.f32.mrb[11].mxu0  ;;  %v659_v46 = vsel %vm540_vm3, %v658_v42, -inf }
 0x23d   : > { %660 = vmax.xlane.f32.xlu1 %v659_v46 }
 0x24e   : > { %554 = vrot.lane.b32.xlu1 %v1563_v26, %s1436_s24 }
 0x257   : > { %v543_v47 = vpop.xlane.xlu1 %542 }
 0x258   : > { %v544_v48 = vsub.f32 %v539_v36, %v543_v47 }
 0x25a   : > { %v545_v49 = vmul.f32 1.442695, %v544_v48 }
 0x25c   : > { %1407 = vpow2.f32 %v545_v49 }
 0x266   : > { %v1408_v50 = vpop.eup %1407 }
 0x267   : > { %v547_v51 = vsel %vm540_vm3, %v1408_v50, 0.0 }
 0x268   : > { %548 = vadd.xlane.f32.xlu0 %v547_v51 }
 0x2ca   : > { %v661_v52 = vpop.xlane.xlu1 %660 }
 0x2cb   : > { %v662_v53 = vsub.f32 %v658_v42, %v661_v52 }
 0x2cd   : > { %v663_v54 = vmul.f32 1.442695, %v662_v53 }
 0x2ce   : > { %v555_v55 = vpop.permute.xlu1 %554 }
 0x2cf   : > { %1409 = vpow2.f32 %v663_v54  ;;  %v562_v56 = vsel %vm560_vm4, %v555_v55, 0 }
 0x2d0   : > { %1325 = vmatpush3.bf16.msra.mxu1 %v562_v56  ;;  %v926_v56 = vld [vmem:[%s1682_s6 + $0x10] sm:$0xff] }
 0x2d1   : > { %1336 = vmatprep.subr.bf16.mxu1 %v1433_v3 }
 0x2d9   : > { %v1410_v57 = vpop.eup %1409 }
 0x2da   : > { %v665_v58 = vsel %vm540_vm3, %v1410_v57, 0.0 }
 0x2db   : > { %666 = vadd.xlane.f32.xlu1 %v665_v58 }
 0x2ec   : > { %671 = vrot.lane.b32.xlu1 %v1563_v26, %s1437_s25 }
 0x2f0   : > { %817 = vrot.lane.b32.xlu1 %v1563_v26, %s1438_s26 }
 0x2f4   : > { %815 = vrot.lane.b32.xlu1 %v1566_v30, %s1438_s26 }
 0x2f5   : > { %v549_v59 = vpop.xlane.xlu0 %548 }
 0x2f6   : > { %1411 = vrcp.f32 %v549_v59 }
 0x300   : > { %v1412_v60 = vpop.eup %1411 }
 0x301   : > { %v551_v61 = vmul.f32 %v1412_v60, %v1408_v50 }
 0x303   : > { %v552_v62 = vpack.c.bf16 %v551_v61, %v551_v61 }
 0x305   : > { %1327 = vmatmul.mubr.msk.bf16.vlgmr.msra.gmra.mrb[4].mxu1 %vm556_vm5, %v552_v62 }
 0x306   : > { %1338 = vmatprep.mubr.msk.bf16.mxu1 %vm1434_vm0, %v1433_v3 }
 0x368   : > { %v667_v2 = vpop.xlane.xlu1 %666 }
 0x369   : > { %1413 = vrcp.f32 %v667_v2 }
 0x36c   : > { %v672_v4 = vpop.permute.xlu1 %671 }
 0x36d   : > { %v677_v5 = vsel %vm560_vm4, %v672_v4, 0 }
 0x36e   : > { %1337 = vmatpush3.bf16.msra.mxu1 %v677_v5 }
 0x36f   : > { %1348 = vmatprep.subr.bf16.mxu1 %v1433_v3 }
 0x370   : > { %v818_v18 = vpop.permute.xlu1 %817 }
 0x371   : > { %v823_v23 = vsel %vm492_vm2, %v818_v18, 0 }
 0x373   : > { %v1414_v8 = vpop.eup %1413 }
 0x374   : > { %v669_v9 = vmul.f32 %v1414_v8, %v1410_v57  ;;  %v816_v25 = vpop.permute.xlu1 %815  ;;  %v928_v57 = vpack.c.bf16 %v926_v56, %v926_v56 }
 0x376   : > { %v670_v10 = vpack.c.bf16 %v669_v9, %v669_v9  ;;  %v933_v58 = vsel %vm725_vm6, %v928_v57, 0 }
 0x378   : > { %1339 = vmatmul.mubr.msk.bf16.vlgmr.msra.gmra.mrb[8].mxu1 %vm556_vm5, %v670_v10 }
 0x379   : > { %1349 = vmatpush3.bf16.msra.mxu1 %v773_v11  ;;  %1350 = vmatprep.mubr.msk.bf16.mxu1 %vm1434_vm0, %v1433_v3 }
 0x37a   : > { %1360 = vmatprep.subr.bf16.mxu1 %v1433_v3 }
 0x3d8   : > { %v598_v12 = vpop.f32.mrb[4].mxu1 }
 0x3d9   : > { %v605_v13 = vpack.c.bf16 %v598_v12, %v598_v12  ;;  %v1328_v14 = vpop.f32.mrb[5].mxu1 }
 0x3da   : > { %v601_v16 = vpop.f32.mrb[6].mxu1 }
 0x3db   : > { %v1329_v17 = vpop.f32.mrb[7].mxu1  ;;  %1351 = vmatmul.mubr.msk.bf16.vlgmr.msra.gmra.mrb[12].mxu1 %vm492_vm2, %v605_v13 }
 0x3dc   : > { %1362 = vmatprep.mubr.msk.bf16.mxu1 %vm1434_vm0, %v1433_v3 }
 0x44b   : > { %v713_v19 = vpop.f32.mrb[8].mxu1 }
 0x44c   : > { %v720_v20 = vpack.c.bf16 %v713_v19, %v713_v19  ;;  %v1340_v21 = vpop.f32.mrb[9].mxu1 }
 0x44d   : > { %v716_v22 = vpop.f32.mrb[10].mxu1 }
 0x44e   : > { %v1341_v24 = vpop.f32.mrb[11].mxu1  ;;  %1345 = vmatmul.mubr.msk.bf16.vlgmr.msra.gmra.mrb[12].mxu0 %vm492_vm2, %v720_v20 }
 0x44f   : > { %1355 = vmatpush3.bf16.xpose.msra.mxu0 %v823_v23  ;;  %1356 = vmatprep.mubr.msk.bf16.mxu0 %vm1434_vm0, %v1433_v3 }
 0x450   : > { %1366 = vmatprep.subr.bf16.mxu0 %v1433_v3 }
 0x456   : > { %1357 = vmatmul.mubr.msk.bf16.vlgmr.msra.gmra.mrb[16].mxu0 %vm492_vm2, %v816_v25 }
 0x457   : > { %1368 = vmatprep.mubr.msk.bf16.mxu0 %vm1434_vm0, %v1433_v3  ;;  %1367 = vmatpush3.bf16.msra.mxu0 %v933_v58 }
 0x458   : > { %1378 = vmatprep.subr.bf16.mxu0 %v1433_v3 }
 0x4ae   : > { %v809_v27 = vpop.f32.mrb[12].mxu1 }
 0x4af   : > { %v1352_v28 = vpop.f32.mrb[13].mxu1 }
 0x4b0   : > { %v812_v29 = vpop.f32.mrb[14].mxu1 }
 0x4b1   : > { %v1353_v31 = vpop.f32.mrb[15].mxu1 }
 0x521   : > { %v763_v32 = vpop.f32.mrb[12].mxu0 }
 0x522   : > { %v1620_v33 = vadd.f32 %v809_v27, %v763_v32  ;;  %v1346_v34 = vpop.f32.mrb[13].mxu0 }
 0x523   : > { %v766_v35 = vpop.f32.mrb[14].mxu0 }
 0x524   : > { %v1347_v36 = vpop.f32.mrb[15].mxu0 }
 0x529   : > { %v859_v37 = vpop.f32.mrb[16].mxu0 }
 0x52a   : > { %v865_v38 = vmul.f32 0.35355338, %v859_v37  ;;  %v1358_v39 = vpop.f32.mrb[17].mxu0 }
 0x52b   : > { %v862_v40 = vpop.f32.mrb[18].mxu0 }
 0x52c   : > { %v1359_v41 = vpop.f32.mrb[19].mxu0  ;;  %v866_v42 = vsel %vm540_vm3, %v865_v38, -inf }
 0x52d   : > { %867 = vmax.xlane.f32.xlu0 %v866_v42 }
 0x543   : > { %878 = vrot.lane.b32.xlu0 %v1563_v26, %s1439_s12 }
 0x547   : > { %978 = vrot.lane.b32.xlu0 %v1563_v26, %s1440_s15 }
 0x54b   : > { %976 = vrot.lane.b32.xlu0 %v1566_v30, %s1440_s15 }
 0x5ba   : > { %v868_v43 = vpop.xlane.xlu0 %867 }
 0x5bb   : > { %v869_v44 = vsub.f32 %v865_v38, %v868_v43 }
 0x5bd   : > { %v870_v45 = vmul.f32 1.442695, %v869_v44 }
 0x5be   : > { %v879_v46 = vpop.permute.xlu0 %878 }
 0x5bf   : > { %1415 = vpow2.f32 %v870_v45  ;;  %v884_v47 = vsel %vm560_vm4, %v879_v46, 0 }
 0x5c0   : > { %1361 = vmatpush3.bf16.msra.mxu1 %v884_v47 }
 0x5c1   : > { %1372 = vmatprep.subr.bf16.mxu1 %v1433_v3 }
 0x5c2   : > { %v979_v53 = vpop.permute.xlu0 %978 }
 0x5c3   : > { %v984_v54 = vsel %vm492_vm2, %v979_v53, 0 }
 0x5c6   : > { %v977_v55 = vpop.permute.xlu0 %976 }
 0x5c9   : > { %v1416_v48 = vpop.eup %1415 }
 0x5ca   : > { %v872_v49 = vsel %vm540_vm3, %v1416_v48, 0.0 }
 0x5cb   : > { %873 = vadd.xlane.f32.xlu1 %v872_v49 }
 0x658   : > { %v874_v50 = vpop.xlane.xlu1 %873 }
 0x659   : > { %1417 = vrcp.f32 %v874_v50 }
 0x663   : > { %v1418_v51 = vpop.eup %1417 }
 0x664   : > { %v876_v52 = vmul.f32 %v1418_v51, %v1416_v48  ;;  %v1269_v51 = vld [vmem:[%s1685_s9] ss:$0 sm:$0xff] }
 0x666   : > { %v877_v30 = vpack.c.bf16 %v876_v52, %v876_v52 }
 0x668   : > { %1363 = vmatmul.mubr.msk.bf16.vlgmr.msra.gmra.mrb[16].mxu1 %vm556_vm5, %v877_v30 }
 0x669   : > { %1373 = vmatpush3.bf16.xpose.msra.mxu1 %v984_v54  ;;  %1374 = vmatprep.mubr.msk.bf16.mxu1 %vm1434_vm0, %v1433_v3 }
 0x66a   : > { %1384 = vmatprep.subr.bf16.mxu1 %v1433_v3 }
 0x670   : > { %1375 = vmatmul.mubr.msk.bf16.vlgmr.msra.gmra.mrb[20].mxu1 %vm492_vm2, %v977_v55 }
 0x671   : > { %1386 = vmatprep.mubr.msk.bf16.mxu1 %vm1434_vm0, %v1433_v3 }
 0x73b   : > { %v920_v59 = vpop.f32.mrb[16].mxu1 }
 0x73c   : > { %v927_v60 = vpack.c.bf16 %v920_v59, %v920_v59  ;;  %v1364_v61 = vpop.f32.mrb[17].mxu1 }
 0x73d   : > { %v923_v62 = vpop.f32.mrb[18].mxu1 }
 0x73e   : > { %v1365_v63 = vpop.f32.mrb[19].mxu1  ;;  %1369 = vmatmul.mubr.msk.bf16.vlgmr.msra.gmra.mrb[20].mxu0 %vm492_vm2, %v927_v60 }
 0x73f   : > { %1380 = vmatprep.mubr.msk.bf16.mxu0 %vm1434_vm0, %v1433_v3  ;;  %v1087_v3 = vld [vmem:[%s1682_s6 + $0x18] sm:$0xff] }
 0x740   : > { %v1089_v12 = vpack.c.bf16 %v1087_v3, %v1087_v3 }
 0x742   : > { %v1094_v13 = vsel %vm725_vm6, %v1089_v12, 0 }
 0x743   : > { %v1020_v0 = vpop.f32.mrb[20].mxu1  ;;  %1385 = vmatpush3.bf16.msra.mxu1 %v1094_v13 }
 0x744   : > { %v1026_v1 = vmul.f32 0.35355338, %v1020_v0  ;;  %v1376_v2 = vpop.f32.mrb[21].mxu1 }
 0x745   : > { %v1023_v4 = vpop.f32.mrb[22].mxu1 }
 0x746   : > { %v1377_v5 = vpop.f32.mrb[23].mxu1  ;;  %v1027_v6 = vsel %vm540_vm3, %v1026_v1, -inf }
 0x747   : > { %1028 = vmax.xlane.f32.xlu0 %v1027_v6 }
 0x7d4   : > { %v1029_v7 = vpop.xlane.xlu0 %1028 }
 0x7d5   : > { %v1030_v8 = vsub.f32 %v1026_v1, %v1029_v7 }
 0x7d7   : > { %v1031_v9 = vmul.f32 1.442695, %v1030_v8 }
 0x7d9   : > { %1419 = vpow2.f32 %v1031_v9 }
 0x7e3   : > { %v1420_v10 = vpop.eup %1419 }
 0x7e4   : > { %v1033_v11 = vsel %vm540_vm3, %v1420_v10, 0.0 }
 0x7e5   : > { %1034 = vadd.xlane.f32.xlu1 %v1033_v11 }
 0x7f6   : > { %1039 = vrot.lane.b32.xlu1 %v1563_v26, %s1441_s18 }
 0x811   : > { %v969_v14 = vpop.f32.mrb[20].mxu0 }
 0x812   : > { %v975_v16 = vadd.f32 %v969_v14, %v1620_v33  ;;  %v1370_v17 = vpop.f32.mrb[21].mxu0  ;;  %v1267_v33 = vld [vmem:[%s1683_s7] ss:$0 sm:$0xff] }
 0x813   : > { %v972_v18 = vpop.f32.mrb[22].mxu0 }
 0x814   : > { %v1371_v19 = vpop.f32.mrb[23].mxu0 }
 0x872   : > { %v1035_v20 = vpop.xlane.xlu1 %1034 }
 0x873   : > { %1421 = vrcp.f32 %v1035_v20 }
 0x876   : > { %v1040_v21 = vpop.permute.xlu1 %1039 }
 0x877   : > { %v1045_v22 = vsel %vm560_vm4, %v1040_v21, 0 }
 0x878   : > { %1379 = vmatpush3.bf16.msra.mxu0 %v1045_v22 }
 0x87d   : > { %v1422_v26 = vpop.eup %1421 }
 0x87e   : > { %v1037_v23 = vmul.f32 %v1422_v26, %v1420_v10 }
 0x880   : > { %v1038_v24 = vpack.c.bf16 %v1037_v23, %v1037_v23 }
 0x882   : > { %1381 = vmatmul.mubr.msk.bf16.vlgmr.msra.gmra.mrb[24].mxu0 %vm556_vm5, %v1038_v24 }
 0x955   : > { %v1081_v25 = vpop.f32.mrb[24].mxu0 }
 0x956   : > { %v1088_v27 = vpack.c.bf16 %v1081_v25, %v1081_v25  ;;  %v1382_v28 = vpop.f32.mrb[25].mxu0 }
 0x957   : > { %v1084_v29 = vpop.f32.mrb[26].mxu0 }
 0x958   : > { %v1383_v31 = vpop.f32.mrb[27].mxu0  ;;  %1387 = vmatmul.mubr.msk.bf16.vlgmr.msra.gmra.mrb[24].mxu1 %vm492_vm2, %v1088_v27 }
 0xa2b   : > { %v1130_v32 = vpop.f32.mrb[24].mxu1 }
 0xa2c   : > { %v1136_v34 = vadd.f32 %v1130_v32, %v975_v16  ;;  %v1388_v35 = vpop.f32.mrb[25].mxu1 }
 0xa2d   : > { %v1133_v36 = vpop.f32.mrb[26].mxu1 }
 0xa2e   : > { %v1144_v37 = vadd.f32 %v1267_v33, %v1136_v34  ;;  %v1389_v38 = vpop.f32.mrb[27].mxu1 }
 0xa30   : > { %v1145_v39 = vadd.f32 %v1144_v37, %v1547_v15  ;;  %v1268_v15 = vld [vmem:[%s1684_s8] ss:$0 sm:$0xff] }
 0xa32   : > { %v1149_v40 = vsel %vm1148_vm7, %v1145_v39, 0.0 }
 0xa33   : > { %1150 = vadd.xlane.f32.xlu1 %v1149_v40 }
 0xac0   : > { %v1151_v41 = vpop.xlane.xlu1 %1150 }
 0xac1   : > { %v1153_v42 = vmul.f32 0.03125, %v1151_v41 }
 0xac3   : > { %v1154_v43 = vsub.f32 %v1145_v39, %v1153_v42 }
 0xac5   : > { %v1155_v44 = vmul.f32 %v1154_v43, %v1154_v43 }
 0xac7   : > { %v1156_v45 = vsel %vm1148_vm7, %v1155_v44, 0.0 }
 0xac8   : > { %1157 = vadd.xlane.f32.xlu0 %v1156_v45 }
 0xb55   : > { %v1158_v46 = vpop.xlane.xlu0 %1157 }
 0xb56   : > { %v1159_v47 = vmul.f32 0.03125, %v1158_v46 }
 0xb58   : > { %v1160_v48 = vadd.f32 1e-05, %v1159_v47 }
 0xb5a   : > { %1423 = vrsqrt.f32 %v1160_v48 }
 0xb64   : > { %v1424_v49 = vpop.eup %1423 }
 0xb65   : > { %v1162_v50 = vmul.f32 %v1424_v49, %v1154_v43 }
 0xb67   : > { %v1169_v52 = vmul.f32 %v1268_v15, %v1162_v50 }
 0xb69   : > { %v1176_v53 = vadd.f32 %v1269_v51, %v1169_v52 }
 0xb6b   : > { %1177 = vst.msk [vmem:[%s371_s28] sm:$0x3f] %vm1148_vm7, %v1176_v53 }
 0xb6c PF: > { %s20_s13 = sadd.s32 1, %s1431_s13  }
 0xb6d   : > { %p17_p4 = scmp.ge.s32.totalorder %s20_s13, 4  }
 0xb6f   :  { %19 = sbr.rel (!%p17_p4) target bundleno = 1 (0x1), region = 93 }

// kernel: transformer_forward.12
= control target key start
LH: loop header
LB: loop body
LE: loop exit
PB: predicated region body
PF: predicated region fallthrough
CT: control target
= control target key end

     0   :  { %s1493_s13 = smov 0   ;;  %s1674_s0 = inlined_call_operand.vmem [shape: f32[2,8,32], index: 0, kind: input, shape index: {}, may-alias: {0,1}]   ;;  %s1675_s1 = inlined_call_operand.vmem [shape: f32[2,8,32], index: 1, kind: input, shape index: {}, may-alias: {0,1}]   ;;  %s1676_s2 = inlined_call_operand.vmem [shape: f32[32,32], index: 2, kind: input, shape index: {}]   ;;  %s1677_s3 = inlined_call_operand.vmem [shape: f32[1,32], index: 3, kind: input, shape index: {}]   ;;  %s1678_s4 = inlined_call_operand.vmem [shape: f32[32,64], index: 4, kind: input, shape index: {}]   ;;  %s1679_s5 = inlined_call_operand.vmem [shape: f32[1,64], index: 5, kind: input, shape index: {}]   ;;  %s1680_s6 = inlined_call_operand.vmem [shape: f32[32,32], index: 6, kind: input, shape index: {}]   ;;  %s1681_s7 = inlined_call_operand.vmem [shape: f32[1,32], index: 7, kind: input, shape index: {}]   ;;  %s1682_s8 = inlined_call_operand.vmem [shape: f32[1,32], index: 8, kind: input, shape index: {}]   ;;  %s1683_s9 = inlined_call_operand.vmem [shape: f32[1,32], index: 9, kind: input, shape index: {}]   ;;  %s1684_s10 = inlined_call_operand.vmem [shape: f32[2,8,32], index: 10, kind: output, shape index: {}]  }
   0x1 LB: > { %s1239_s14 = sadd.s32 4294967295, %s1427_s13   ;;  %p1243_p0 = scmp.ge.s32.totalorder %s1427_s13, 1  ;;  %s1427_s13 = sphi %s1493_s13, %s20_s13  }
   0x2   : > { %p320_p1 = scmp.lt.s32.totalorder %s1427_s13, 3 }
   0x4   : > { %p321_p2 = pnand %p1243_p0, %p320_p1 }
   0x5   : > { %v434_v0 = vld [vmem:[%s1678_s4] sm:$0xff] (!%p321_p2)  ;;  %v435_v1 = vld [vmem:[%s1678_s4 + $0x8] sm:$0xff] (!%p321_p2)  ;;  %v436_v2 = vld [vmem:[%s1678_s4 + $0x10] sm:$0xff] (!%p321_p2)  ;;  %p360_p3 = scmp.lt.s32.totalorder (!%p321_p2), %s1239_s14, 1  ;;  %v1429_v3 = vmov (!%p321_p2), 0.0   ;;  %vm1430_vm0 = vmmov (!%p321_p2), 0  }
   0x6   : > { %324 = sbr.rel (%p321_p2) target bundleno = 2924 (0xb6c), region = 60  ;;  %1306 = vmatprep.subr.bf16.mxu1 (!%p321_p2), %v1429_v3  ;;  %v438_v4 = vpack.c.bf16 (!%p321_p2), %v435_v1, %v434_v0  ;;  %v437_v5 = vld [vmem:[%s1678_s4 + $0x18] sm:$0xff] (!%p321_p2)  ;;  %1298 = vmatprep.subr.bf16.mxu0 (!%p321_p2), %v1429_v3  ;;  %v376_v6 = vld [vmem:[%s1676_s2] sm:$0xff] (!%p321_p2)  ;;  %v377_v7 = vld [vmem:[%s1676_s2 + $0x8] sm:$0xff] (!%p321_p2)  ;;  %vm389_vm1 = vcmask (!%p321_p2), 261120   ;;  %vm492_vm2 = vcmask (!%p321_p2), 64512  }
   0x7   : > { %v380_v8 = vpack.c.bf16 (!%p321_p2), %v377_v7, %v376_v6  ;;  %1310 = vmatprep.mubr.msk.bf16.mxu1 (!%p321_p2), %vm1430_vm0, %v1429_v3  ;;  %v378_v9 = vld [vmem:[%s1676_s2 + $0x10] sm:$0xff] (!%p321_p2)  ;;  %v379_v10 = vld [vmem:[%s1676_s2 + $0x18] sm:$0xff] (!%p321_p2)  ;;  %1302 = vmatprep.mubr.msk.bf16.mxu0 (!%p321_p2), %vm1430_vm0, %v1429_v3  ;;  %v439_v11 = vpack.c.bf16 (!%p321_p2), %v437_v5, %v436_v2  ;;  %v1249_v17 = vld [vmem:[%s1679_s5] ss:$0 sm:$0xff] (!%p321_p2)  ;;  %s1431_s23 = smov (!%p321_p2), 120   ;;  %s1432_s24 = smov (!%p321_p2), 96  }
   0x8   : > { %1307 = vmatpush3.bf16.msra.mxu1 (!%p321_p2), %v438_v4  ;;  %v381_v12 = vpack.c.bf16 (!%p321_p2), %v379_v10, %v378_v9  ;;  %v1247_v18 = vld [vmem:[%s1677_s3] ss:$0 sm:$0xff] (!%p321_p2)  ;;  %vm558_vm3 = vcmask (!%p321_p2), 1043456   ;;  %s1433_s25 = smov (!%p321_p2), 88   ;;  %s1434_s26 = smov (!%p321_p2), 112   ;;  %v717_v63 = vld [vmem:[%s1680_s6 + $0x8] sm:$0xff] (!%p321_p2) }
   0x9   : > { %1308 = vmatprep.subr.bf16.mxu1 (!%p321_p2), %v1429_v3  ;;  %1299 = vmatpush3.bf16.msra.mxu0 (!%p321_p2), %v380_v8  ;;  %v719_v0 = vpack.c.bf16 (!%p321_p2), %v717_v63, %v717_v63  ;;  %v602_v6 = vld [vmem:[%s1680_s6] sm:$0xff] (!%p321_p2)  ;;  %s1435_s12 = smov (!%p321_p2), 80   ;;  %s1436_s15 = smov (!%p321_p2), 104  }
   0xa   : > { %1300 = vmatprep.subr.bf16.mxu0 (!%p321_p2), %v1429_v3  ;;  %v604_v7 = vpack.c.bf16 (!%p321_p2), %v602_v6, %v602_v6  ;;  %s1437_s18 = smov (!%p321_p2), 72  }
   0xb   : > { %v724_v1 = vsel (!%p321_p2), %vm558_vm3, %v719_v0, 0 }
   0xc   : > { %1309 = vmatpush3.bf16.msra.mxu1 (!%p321_p2), %v439_v11  ;;  %v770_v11 = vsel (!%p321_p2), %vm558_vm3, %v604_v7, 0 }
   0xd   : > { %s1686_s14 = smov (!%p360_p3, %s1239_s14), 1  ;;  %1301 = vmatpush3.bf16.msra.mxu0 %v381_v12  ;;  %1320 = vmatprep.subr.bf16.mxu1 %v1429_v3 }
   0xe   : > { %s1532_s11 = sshll.u32 %s1686_s14, 3  ;;  %1314 = vmatprep.subr.bf16.mxu0 %v1429_v3 }
   0xf   : > { %s367_s16 = scalar_lea.vmem %s1675_s1, %s1532_s11  ;;  %s363_s19 = scalar_lea.vmem %s1674_s0, %s1532_s11 }
  0x10   : > { %v374_v13 = vld [vmem:[%s367_s16] sm:$0xff]  ;;  %s371_s28 = scalar_lea.vmem %s1684_s10, %s1532_s11 }
  0x11   : > { %v433_v14 = vpack.c.bf16 %v374_v13, %v374_v13  ;;  %v1543_v15 = vld [vmem:[%s363_s19] sm:$0xff] }
  0x12   : > { %v375_v16 = vpack.c.bf16 %v1543_v15, %v1543_v15 }
  0x13   : > { %1311 = vmatmul.mubr.msk.bf16.vlgmr.msra.gmra.mrb[0].mxu1 %vm389_vm1, %v433_v14 }
  0x14   : > { %1303 = vmatmul.mubr.msk.bf16.vlgmr.msra.gmra.mrb[0].mxu0 %vm389_vm1, %v375_v16  ;;  %1322 = vmatprep.mubr.msk.bf16.mxu1 %vm1430_vm0, %v1429_v3 }
  0x15   : > { %1316 = vmatprep.mubr.msk.bf16.mxu0 %vm1430_vm0, %v1429_v3 }
  0xe6   : > { %v484_v19 = vpop.f32.mrb[0].mxu1 }
  0xe7   : > { %v485_v20 = vadd.f32 %v1249_v17, %v484_v19  ;;  %v1312_v21 = vpop.f32.mrb[1].mxu1  ;;  %v427_v22 = vpop.f32.mrb[0].mxu0 }
  0xe8   : > { %v487_v23 = vpop.f32.mrb[2].mxu1  ;;  %v428_v24 = vadd.f32 %v1247_v18, %v427_v22  ;;  %v1304_v25 = vpop.f32.mrb[1].mxu0 }
  0xe9   : > { %v1561_v26 = vpack.c.bf16 %v485_v20, %v485_v20  ;;  %v1313_v27 = vpop.f32.mrb[3].mxu1  ;;  %v430_v28 = vpop.f32.mrb[2].mxu0 }
  0xea   : > { %v1305_v29 = vpop.f32.mrb[3].mxu0  ;;  %v1564_v30 = vpack.c.bf16 %v428_v24, %v428_v24 }
  0xeb   : > { %608 = vrot.lane.b32.xlu0 %v1561_v26, %s1431_s23  ;;  %v497_v31 = vsel %vm492_vm2, %v1561_v26, 0 }
  0xec   : > { %1315 = vmatpush3.bf16.xpose.msra.mxu0 %v497_v31 }
  0xed   : > { %1326 = vmatprep.subr.bf16.mxu0 %v1429_v3 }
  0xef   : > { %606 = vrot.lane.b32.xlu0 %v1564_v30, %s1431_s23 }
  0xf3   : > { %1317 = vmatmul.mubr.msk.bf16.vlgmr.msra.gmra.mrb[4].mxu0 %vm492_vm2, %v1564_v30 }
  0xf4   : > { %1328 = vmatprep.mubr.msk.bf16.mxu0 %vm1430_vm0, %v1429_v3 }
 0x15d   : > { %v609_v32 = vpop.permute.xlu0 %608 }
 0x15e   : > { %v614_v33 = vsel %vm492_vm2, %v609_v32, 0 }
 0x15f   : > { %1327 = vmatpush3.bf16.xpose.msra.mxu0 %v614_v33 }
 0x160   : > { %1338 = vmatprep.subr.bf16.mxu0 %v1429_v3 }
 0x161   : > { %v607_v34 = vpop.permute.xlu0 %606 }
 0x166   : > { %1329 = vmatmul.mubr.msk.bf16.vlgmr.msra.gmra.mrb[8].mxu0 %vm492_vm2, %v607_v34 }
 0x167   : > { %1340 = vmatprep.mubr.msk.bf16.mxu0 %vm1430_vm0, %v1429_v3  ;;  %1339 = vmatpush3.bf16.msra.mxu0 %v724_v1 }
 0x168   : > { %1350 = vmatprep.subr.bf16.mxu0 %v1429_v3 }
 0x1c6   : > { %v533_v35 = vpop.f32.mrb[4].mxu0 }
 0x1c7   : > { %v539_v36 = vmul.f32 0.35355338, %v533_v35  ;;  %v1318_v37 = vpop.f32.mrb[5].mxu0 }
 0x1c8   : > { %v536_v38 = vpop.f32.mrb[6].mxu0 }
 0x1c9   : > { %v1319_v39 = vpop.f32.mrb[7].mxu0  ;;  %v540_v40 = vsel %vm492_vm2, %v539_v36, -inf }
 0x1ca   : > { %541 = vmax.xlane.f32.xlu1 %v540_v40 }
 0x239   : > { %v650_v41 = vpop.f32.mrb[8].mxu0 }
 0x23a   : > { %v656_v42 = vmul.f32 0.35355338, %v650_v41  ;;  %v1330_v43 = vpop.f32.mrb[9].mxu0 }
 0x23b   : > { %v653_v44 = vpop.f32.mrb[10].mxu0 }
 0x23c   : > { %v1331_v45 = vpop.f32.mrb[11].mxu0  ;;  %v657_v46 = vsel %vm492_vm2, %v656_v42, -inf }
 0x23d   : > { %658 = vmax.xlane.f32.xlu1 %v657_v46 }
 0x24e   : > { %553 = vrot.lane.b32.xlu1 %v1561_v26, %s1432_s24 }
 0x257   : > { %v542_v47 = vpop.xlane.xlu1 %541 }
 0x258   : > { %v543_v48 = vsub.f32 %v539_v36, %v542_v47 }
 0x25a   : > { %v544_v49 = vmul.f32 1.442695, %v543_v48 }
 0x25c   : > { %1403 = vpow2.f32 %v544_v49 }
 0x266   : > { %v1404_v50 = vpop.eup %1403 }
 0x267   : > { %v546_v51 = vsel %vm492_vm2, %v1404_v50, 0.0 }
 0x268   : > { %547 = vadd.xlane.f32.xlu0 %v546_v51 }
 0x2ca   : > { %v659_v52 = vpop.xlane.xlu1 %658 }
 0x2cb   : > { %v660_v53 = vsub.f32 %v656_v42, %v659_v52 }
 0x2cd   : > { %v661_v54 = vmul.f32 1.442695, %v660_v53 }
 0x2ce   : > { %v554_v55 = vpop.permute.xlu1 %553 }
 0x2cf   : > { %1405 = vpow2.f32 %v661_v54  ;;  %v560_v56 = vsel %vm558_vm3, %v554_v55, 0 }
 0x2d0   : > { %1321 = vmatpush3.bf16.msra.mxu1 %v560_v56  ;;  %v923_v56 = vld [vmem:[%s1680_s6 + $0x10] sm:$0xff] }
 0x2d1   : > { %1332 = vmatprep.subr.bf16.mxu1 %v1429_v3 }
 0x2d9   : > { %v1406_v57 = vpop.eup %1405 }
 0x2da   : > { %v663_v58 = vsel %vm492_vm2, %v1406_v57, 0.0 }
 0x2db   : > { %664 = vadd.xlane.f32.xlu1 %v663_v58 }
 0x2ec   : > { %669 = vrot.lane.b32.xlu1 %v1561_v26, %s1433_s25 }
 0x2f0   : > { %814 = vrot.lane.b32.xlu1 %v1561_v26, %s1434_s26 }
 0x2f4   : > { %812 = vrot.lane.b32.xlu1 %v1564_v30, %s1434_s26 }
 0x2f5   : > { %v548_v59 = vpop.xlane.xlu0 %547 }
 0x2f6   : > { %1407 = vrcp.f32 %v548_v59 }
 0x300   : > { %v1408_v60 = vpop.eup %1407 }
 0x301   : > { %v550_v61 = vmul.f32 %v1408_v60, %v1404_v50 }
 0x303   : > { %v551_v62 = vpack.c.bf16 %v550_v61, %v550_v61 }
 0x305   : > { %1323 = vmatmul.mubr.msk.bf16.vlgmr.msra.gmra.mrb[4].mxu1 %vm492_vm2, %v551_v62 }
 0x306   : > { %1334 = vmatprep.mubr.msk.bf16.mxu1 %vm1430_vm0, %v1429_v3 }
 0x368   : > { %v665_v2 = vpop.xlane.xlu1 %664 }
 0x369   : > { %1409 = vrcp.f32 %v665_v2 }
 0x36c   : > { %v670_v4 = vpop.permute.xlu1 %669 }
 0x36d   : > { %v675_v5 = vsel %vm558_vm3, %v670_v4, 0 }
 0x36e   : > { %1333 = vmatpush3.bf16.msra.mxu1 %v675_v5 }
 0x36f   : > { %1344 = vmatprep.subr.bf16.mxu1 %v1429_v3 }
 0x370   : > { %v815_v18 = vpop.permute.xlu1 %814 }
 0x371   : > { %v820_v23 = vsel %vm492_vm2, %v815_v18, 0 }
 0x373   : > { %v1410_v8 = vpop.eup %1409 }
 0x374   : > { %v667_v9 = vmul.f32 %v1410_v8, %v1406_v57  ;;  %v813_v25 = vpop.permute.xlu1 %812  ;;  %v925_v57 = vpack.c.bf16 %v923_v56, %v923_v56 }
 0x376   : > { %v668_v10 = vpack.c.bf16 %v667_v9, %v667_v9  ;;  %v930_v58 = vsel %vm558_vm3, %v925_v57, 0 }
 0x378   : > { %1335 = vmatmul.mubr.msk.bf16.vlgmr.msra.gmra.mrb[8].mxu1 %vm492_vm2, %v668_v10 }
 0x379   : > { %1345 = vmatpush3.bf16.msra.mxu1 %v770_v11  ;;  %1346 = vmatprep.mubr.msk.bf16.mxu1 %vm1430_vm0, %v1429_v3 }
 0x37a   : > { %1356 = vmatprep.subr.bf16.mxu1 %v1429_v3 }
 0x3d8   : > { %v596_v12 = vpop.f32.mrb[4].mxu1 }
 0x3d9   : > { %v603_v13 = vpack.c.bf16 %v596_v12, %v596_v12  ;;  %v1324_v14 = vpop.f32.mrb[5].mxu1 }
 0x3da   : > { %v599_v16 = vpop.f32.mrb[6].mxu1 }
 0x3db   : > { %v1325_v17 = vpop.f32.mrb[7].mxu1  ;;  %1347 = vmatmul.mubr.msk.bf16.vlgmr.msra.gmra.mrb[12].mxu1 %vm492_vm2, %v603_v13 }
 0x3dc   : > { %1358 = vmatprep.mubr.msk.bf16.mxu1 %vm1430_vm0, %v1429_v3 }
 0x44b   : > { %v711_v19 = vpop.f32.mrb[8].mxu1 }
 0x44c   : > { %v718_v20 = vpack.c.bf16 %v711_v19, %v711_v19  ;;  %v1336_v21 = vpop.f32.mrb[9].mxu1 }
 0x44d   : > { %v714_v22 = vpop.f32.mrb[10].mxu1 }
 0x44e   : > { %v1337_v24 = vpop.f32.mrb[11].mxu1  ;;  %1341 = vmatmul.mubr.msk.bf16.vlgmr.msra.gmra.mrb[12].mxu0 %vm492_vm2, %v718_v20 }
 0x44f   : > { %1351 = vmatpush3.bf16.xpose.msra.mxu0 %v820_v23  ;;  %1352 = vmatprep.mubr.msk.bf16.mxu0 %vm1430_vm0, %v1429_v3 }
 0x450   : > { %1362 = vmatprep.subr.bf16.mxu0 %v1429_v3 }
 0x456   : > { %1353 = vmatmul.mubr.msk.bf16.vlgmr.msra.gmra.mrb[16].mxu0 %vm492_vm2, %v813_v25 }
 0x457   : > { %1364 = vmatprep.mubr.msk.bf16.mxu0 %vm1430_vm0, %v1429_v3  ;;  %1363 = vmatpush3.bf16.msra.mxu0 %v930_v58 }
 0x458   : > { %1374 = vmatprep.subr.bf16.mxu0 %v1429_v3 }
 0x4ae   : > { %v806_v27 = vpop.f32.mrb[12].mxu1 }
 0x4af   : > { %v1348_v28 = vpop.f32.mrb[13].mxu1 }
 0x4b0   : > { %v809_v29 = vpop.f32.mrb[14].mxu1 }
 0x4b1   : > { %v1349_v31 = vpop.f32.mrb[15].mxu1 }
 0x521   : > { %v760_v32 = vpop.f32.mrb[12].mxu0 }
 0x522   : > { %v1618_v33 = vadd.f32 %v806_v27, %v760_v32  ;;  %v1342_v34 = vpop.f32.mrb[13].mxu0 }
 0x523   : > { %v763_v35 = vpop.f32.mrb[14].mxu0 }
 0x524   : > { %v1343_v36 = vpop.f32.mrb[15].mxu0 }
 0x529   : > { %v856_v37 = vpop.f32.mrb[16].mxu0 }
 0x52a   : > { %v862_v38 = vmul.f32 0.35355338, %v856_v37  ;;  %v1354_v39 = vpop.f32.mrb[17].mxu0 }
 0x52b   : > { %v859_v40 = vpop.f32.mrb[18].mxu0 }
 0x52c   : > { %v1355_v41 = vpop.f32.mrb[19].mxu0  ;;  %v863_v42 = vsel %vm492_vm2, %v862_v38, -inf }
 0x52d   : > { %864 = vmax.xlane.f32.xlu0 %v863_v42 }
 0x543   : > { %875 = vrot.lane.b32.xlu0 %v1561_v26, %s1435_s12 }
 0x547   : > { %975 = vrot.lane.b32.xlu0 %v1561_v26, %s1436_s15 }
 0x54b   : > { %973 = vrot.lane.b32.xlu0 %v1564_v30, %s1436_s15 }
 0x5ba   : > { %v865_v43 = vpop.xlane.xlu0 %864 }
 0x5bb   : > { %v866_v44 = vsub.f32 %v862_v38, %v865_v43 }
 0x5bd   : > { %v867_v45 = vmul.f32 1.442695, %v866_v44 }
 0x5be   : > { %v876_v46 = vpop.permute.xlu0 %875 }
 0x5bf   : > { %1411 = vpow2.f32 %v867_v45  ;;  %v881_v47 = vsel %vm558_vm3, %v876_v46, 0 }
 0x5c0   : > { %1357 = vmatpush3.bf16.msra.mxu1 %v881_v47 }
 0x5c1   : > { %1368 = vmatprep.subr.bf16.mxu1 %v1429_v3 }
 0x5c2   : > { %v976_v53 = vpop.permute.xlu0 %975 }
 0x5c3   : > { %v981_v54 = vsel %vm492_vm2, %v976_v53, 0 }
 0x5c6   : > { %v974_v55 = vpop.permute.xlu0 %973 }
 0x5c9   : > { %v1412_v48 = vpop.eup %1411 }
 0x5ca   : > { %v869_v49 = vsel %vm492_vm2, %v1412_v48, 0.0 }
 0x5cb   : > { %870 = vadd.xlane.f32.xlu1 %v869_v49 }
 0x658   : > { %v871_v50 = vpop.xlane.xlu1 %870 }
 0x659   : > { %1413 = vrcp.f32 %v871_v50 }
 0x663   : > { %v1414_v51 = vpop.eup %1413 }
 0x664   : > { %v873_v52 = vmul.f32 %v1414_v51, %v1412_v48  ;;  %v1265_v51 = vld [vmem:[%s1683_s9] ss:$0 sm:$0xff] }
 0x666   : > { %v874_v30 = vpack.c.bf16 %v873_v52, %v873_v52 }
 0x668   : > { %1359 = vmatmul.mubr.msk.bf16.vlgmr.msra.gmra.mrb[16].mxu1 %vm492_vm2, %v874_v30 }
 0x669   : > { %1369 = vmatpush3.bf16.xpose.msra.mxu1 %v981_v54  ;;  %1370 = vmatprep.mubr.msk.bf16.mxu1 %vm1430_vm0, %v1429_v3 }
 0x66a   : > { %1380 = vmatprep.subr.bf16.mxu1 %v1429_v3 }
 0x670   : > { %1371 = vmatmul.mubr.msk.bf16.vlgmr.msra.gmra.mrb[20].mxu1 %vm492_vm2, %v974_v55 }
 0x671   : > { %1382 = vmatprep.mubr.msk.bf16.mxu1 %vm1430_vm0, %v1429_v3 }
 0x73b   : > { %v917_v59 = vpop.f32.mrb[16].mxu1 }
 0x73c   : > { %v924_v60 = vpack.c.bf16 %v917_v59, %v917_v59  ;;  %v1360_v61 = vpop.f32.mrb[17].mxu1 }
 0x73d   : > { %v920_v62 = vpop.f32.mrb[18].mxu1 }
 0x73e   : > { %v1361_v63 = vpop.f32.mrb[19].mxu1  ;;  %1365 = vmatmul.mubr.msk.bf16.vlgmr.msra.gmra.mrb[20].mxu0 %vm492_vm2, %v924_v60 }
 0x73f   : > { %1376 = vmatprep.mubr.msk.bf16.mxu0 %vm1430_vm0, %v1429_v3  ;;  %v1084_v3 = vld [vmem:[%s1680_s6 + $0x18] sm:$0xff] }
 0x740   : > { %v1086_v12 = vpack.c.bf16 %v1084_v3, %v1084_v3 }
 0x742   : > { %v1091_v13 = vsel %vm558_vm3, %v1086_v12, 0 }
 0x743   : > { %v1017_v0 = vpop.f32.mrb[20].mxu1  ;;  %1381 = vmatpush3.bf16.msra.mxu1 %v1091_v13 }
 0x744   : > { %v1023_v1 = vmul.f32 0.35355338, %v1017_v0  ;;  %v1372_v2 = vpop.f32.mrb[21].mxu1 }
 0x745   : > { %v1020_v4 = vpop.f32.mrb[22].mxu1 }
 0x746   : > { %v1373_v5 = vpop.f32.mrb[23].mxu1  ;;  %v1024_v6 = vsel %vm492_vm2, %v1023_v1, -inf }
 0x747   : > { %1025 = vmax.xlane.f32.xlu0 %v1024_v6 }
 0x7d4   : > { %v1026_v7 = vpop.xlane.xlu0 %1025 }
 0x7d5   : > { %v1027_v8 = vsub.f32 %v1023_v1, %v1026_v7 }
 0x7d7   : > { %v1028_v9 = vmul.f32 1.442695, %v1027_v8 }
 0x7d9   : > { %1415 = vpow2.f32 %v1028_v9 }
 0x7e3   : > { %v1416_v10 = vpop.eup %1415 }
 0x7e4   : > { %v1030_v11 = vsel %vm492_vm2, %v1416_v10, 0.0 }
 0x7e5   : > { %1031 = vadd.xlane.f32.xlu1 %v1030_v11 }
 0x7f6   : > { %1036 = vrot.lane.b32.xlu1 %v1561_v26, %s1437_s18 }
 0x811   : > { %v966_v14 = vpop.f32.mrb[20].mxu0 }
 0x812   : > { %v972_v16 = vadd.f32 %v966_v14, %v1618_v33  ;;  %v1366_v17 = vpop.f32.mrb[21].mxu0  ;;  %v1263_v33 = vld [vmem:[%s1681_s7] ss:$0 sm:$0xff] }
 0x813   : > { %v969_v18 = vpop.f32.mrb[22].mxu0 }
 0x814   : > { %v1367_v19 = vpop.f32.mrb[23].mxu0 }
 0x872   : > { %v1032_v20 = vpop.xlane.xlu1 %1031 }
 0x873   : > { %1417 = vrcp.f32 %v1032_v20 }
 0x876   : > { %v1037_v21 = vpop.permute.xlu1 %1036 }
 0x877   : > { %v1042_v22 = vsel %vm558_vm3, %v1037_v21, 0 }
 0x878   : > { %1375 = vmatpush3.bf16.msra.mxu0 %v1042_v22 }
 0x87d   : > { %v1418_v26 = vpop.eup %1417 }
 0x87e   : > { %v1034_v23 = vmul.f32 %v1418_v26, %v1416_v10 }
 0x880   : > { %v1035_v24 = vpack.c.bf16 %v1034_v23, %v1034_v23 }
 0x882   : > { %1377 = vmatmul.mubr.msk.bf16.vlgmr.msra.gmra.mrb[24].mxu0 %vm492_vm2, %v1035_v24 }
 0x955   : > { %v1078_v25 = vpop.f32.mrb[24].mxu0 }
 0x956   : > { %v1085_v27 = vpack.c.bf16 %v1078_v25, %v1078_v25  ;;  %v1378_v28 = vpop.f32.mrb[25].mxu0 }
 0x957   : > { %v1081_v29 = vpop.f32.mrb[26].mxu0 }
 0x958   : > { %v1379_v31 = vpop.f32.mrb[27].mxu0  ;;  %1383 = vmatmul.mubr.msk.bf16.vlgmr.msra.gmra.mrb[24].mxu1 %vm492_vm2, %v1085_v27 }
 0xa2b   : > { %v1127_v32 = vpop.f32.mrb[24].mxu1 }
 0xa2c   : > { %v1133_v34 = vadd.f32 %v1127_v32, %v972_v16  ;;  %v1384_v35 = vpop.f32.mrb[25].mxu1 }
 0xa2d   : > { %v1130_v36 = vpop.f32.mrb[26].mxu1 }
 0xa2e   : > { %v1141_v37 = vadd.f32 %v1263_v33, %v1133_v34  ;;  %v1385_v38 = vpop.f32.mrb[27].mxu1 }
 0xa30   : > { %v1142_v39 = vadd.f32 %v1141_v37, %v1543_v15  ;;  %v1264_v15 = vld [vmem:[%s1682_s8] ss:$0 sm:$0xff] }
 0xa32   : > { %v1145_v40 = vsel %vm389_vm1, %v1142_v39, 0.0 }
 0xa33   : > { %1146 = vadd.xlane.f32.xlu1 %v1145_v40 }
 0xac0   : > { %v1147_v41 = vpop.xlane.xlu1 %1146 }
 0xac1   : > { %v1149_v42 = vmul.f32 0.03125, %v1147_v41 }
 0xac3   : > { %v1150_v43 = vsub.f32 %v1142_v39, %v1149_v42 }
 0xac5   : > { %v1151_v44 = vmul.f32 %v1150_v43, %v1150_v43 }
 0xac7   : > { %v1152_v45 = vsel %vm389_vm1, %v1151_v44, 0.0 }
 0xac8   : > { %1153 = vadd.xlane.f32.xlu0 %v1152_v45 }
 0xb55   : > { %v1154_v46 = vpop.xlane.xlu0 %1153 }
 0xb56   : > { %v1155_v47 = vmul.f32 0.03125, %v1154_v46 }
 0xb58   : > { %v1156_v48 = vadd.f32 1e-05, %v1155_v47 }
 0xb5a   : > { %1419 = vrsqrt.f32 %v1156_v48 }
 0xb64   : > { %v1420_v49 = vpop.eup %1419 }
 0xb65   : > { %v1158_v50 = vmul.f32 %v1420_v49, %v1150_v43 }
 0xb67   : > { %v1165_v52 = vmul.f32 %v1264_v15, %v1158_v50 }
 0xb69   : > { %v1172_v53 = vadd.f32 %v1265_v51, %v1165_v52 }
 0xb6b   : > { %1173 = vst.msk [vmem:[%s371_s28] sm:$0xff] %vm389_vm1, %v1172_v53 }
 0xb6c PF: > { %s20_s13 = sadd.s32 1, %s1427_s13  }
 0xb6d   : > { %p17_p4 = scmp.ge.s32.totalorder %s20_s13, 4  }
 0xb6f   :  { %19 = sbr.rel (!%p17_p4) target bundleno = 1 (0x1), region = 93 }

// kernel: transformer_forward.18
= control target key start
LH: loop header
LB: loop body
LE: loop exit
PB: predicated region body
PF: predicated region fallthrough
CT: control target
= control target key end

     0   :  { %s1495_s13 = smov 0   ;;  %s1674_s0 = inlined_call_operand.vmem [shape: f32[2,6,32], index: 0, kind: input, shape index: {}]   ;;  %s1675_s1 = inlined_call_operand.vmem [shape: f32[2,8,32], index: 1, kind: input, shape index: {}]   ;;  %s1676_s2 = inlined_call_operand.vmem [shape: f32[32,32], index: 2, kind: input, shape index: {}]   ;;  %s1677_s3 = inlined_call_operand.vmem [shape: f32[1,32], index: 3, kind: input, shape index: {}]   ;;  %s1678_s4 = inlined_call_operand.vmem [shape: f32[32,64], index: 4, kind: input, shape index: {}]   ;;  %s1679_s5 = inlined_call_operand.vmem [shape: f32[1,64], index: 5, kind: input, shape index: {}]   ;;  %s1680_s6 = inlined_call_operand.vmem [shape: f32[32,32], index: 6, kind: input, shape index: {}]   ;;  %s1681_s7 = inlined_call_operand.vmem [shape: f32[1,32], index: 7, kind: input, shape index: {}]   ;;  %s1682_s8 = inlined_call_operand.vmem [shape: f32[1,32], index: 8, kind: input, shape index: {}]   ;;  %s1683_s9 = inlined_call_operand.vmem [shape: f32[1,32], index: 9, kind: input, shape index: {}]   ;;  %s1684_s10 = inlined_call_operand.vmem [shape: f32[2,6,32], index: 10, kind: output, shape index: {}]  }
   0x1 LB: > { %s1241_s14 = sadd.s32 4294967295, %s1429_s13   ;;  %p1245_p0 = scmp.ge.s32.totalorder %s1429_s13, 1  ;;  %s1429_s13 = sphi %s1495_s13, %s20_s13  }
   0x2   : > { %p320_p1 = scmp.lt.s32.totalorder %s1429_s13, 3 }
   0x4   : > { %p321_p2 = pnand %p1245_p0, %p320_p1 }
   0x5   : > { %v434_v0 = vld [vmem:[%s1678_s4] sm:$0xff] (!%p321_p2)  ;;  %v435_v1 = vld [vmem:[%s1678_s4 + $0x8] sm:$0xff] (!%p321_p2)  ;;  %v436_v2 = vld [vmem:[%s1678_s4 + $0x10] sm:$0xff] (!%p321_p2)  ;;  %p360_p3 = scmp.lt.s32.totalorder (!%p321_p2), %s1241_s14, 1  ;;  %v1431_v3 = vmov (!%p321_p2), 0.0   ;;  %vm1432_vm0 = vmmov (!%p321_p2), 0  }
   0x6   : > { %324 = sbr.rel (%p321_p2) target bundleno = 2924 (0xb6c), region = 60  ;;  %1308 = vmatprep.subr.bf16.mxu1 (!%p321_p2), %v1431_v3  ;;  %v438_v4 = vpack.c.bf16 (!%p321_p2), %v435_v1, %v434_v0  ;;  %v437_v5 = vld [vmem:[%s1678_s4 + $0x18] sm:$0xff] (!%p321_p2)  ;;  %1300 = vmatprep.subr.bf16.mxu0 (!%p321_p2), %v1431_v3  ;;  %v376_v6 = vld [vmem:[%s1676_s2] sm:$0xff] (!%p321_p2)  ;;  %v377_v7 = vld [vmem:[%s1676_s2 + $0x8] sm:$0xff] (!%p321_p2)  ;;  %vm389_vm1 = vcmask (!%p321_p2), 261120   ;;  %vm492_vm2 = vcmask (!%p321_p2), 64512  }
   0x7   : > { %v380_v8 = vpack.c.bf16 (!%p321_p2), %v377_v7, %v376_v6  ;;  %1312 = vmatprep.mubr.msk.bf16.mxu1 (!%p321_p2), %vm1432_vm0, %v1431_v3  ;;  %v378_v9 = vld [vmem:[%s1676_s2 + $0x10] sm:$0xff] (!%p321_p2)  ;;  %v379_v10 = vld [vmem:[%s1676_s2 + $0x18] sm:$0xff] (!%p321_p2)  ;;  %1304 = vmatprep.mubr.msk.bf16.mxu0 (!%p321_p2), %vm1432_vm0, %v1431_v3  ;;  %v439_v11 = vpack.c.bf16 (!%p321_p2), %v437_v5, %v436_v2  ;;  %v1251_v17 = vld [vmem:[%s1679_s5] ss:$0 sm:$0xff] (!%p321_p2)  ;;  %s1433_s23 = smov (!%p321_p2), 120   ;;  %vm540_vm3 = vcmask (!%p321_p2), 62464  }
   0x8   : > { %1309 = vmatpush3.bf16.msra.mxu1 (!%p321_p2), %v438_v4  ;;  %v381_v12 = vpack.c.bf16 (!%p321_p2), %v379_v10, %v378_v9  ;;  %v1249_v18 = vld [vmem:[%s1677_s3] ss:$0 sm:$0xff] (!%p321_p2)  ;;  %s1434_s24 = smov (!%p321_p2), 96   ;;  %vm559_vm4 = vcmask (!%p321_p2), 1043456   ;;  %s1435_s25 = smov (!%p321_p2), 88   ;;  %v718_v63 = vld [vmem:[%s1680_s6 + $0x8] sm:$0xff] (!%p321_p2) }
   0x9   : > { %1310 = vmatprep.subr.bf16.mxu1 (!%p321_p2), %v1431_v3  ;;  %1301 = vmatpush3.bf16.msra.mxu0 (!%p321_p2), %v380_v8  ;;  %s1436_s26 = smov (!%p321_p2), 112   ;;  %v720_v0 = vpack.c.bf16 (!%p321_p2), %v718_v63, %v718_v63  ;;  %v603_v6 = vld [vmem:[%s1680_s6] sm:$0xff] (!%p321_p2)  ;;  %s1437_s12 = smov (!%p321_p2), 80   ;;  %vm1146_vm5 = vcmask (!%p321_p2), 259072  }
   0xa   : > { %1302 = vmatprep.subr.bf16.mxu0 (!%p321_p2), %v1431_v3  ;;  %v605_v7 = vpack.c.bf16 (!%p321_p2), %v603_v6, %v603_v6  ;;  %s1438_s15 = smov (!%p321_p2), 104   ;;  %s1439_s18 = smov (!%p321_p2), 72  }
   0xb   : > { %v725_v1 = vsel (!%p321_p2), %vm559_vm4, %v720_v0, 0 }
   0xc   : > { %1311 = vmatpush3.bf16.msra.mxu1 (!%p321_p2), %v439_v11  ;;  %v771_v11 = vsel (!%p321_p2), %vm559_vm4, %v605_v7, 0 }
   0xd   : > { %s1686_s14 = smov (!%p360_p3, %s1241_s14), 1  ;;  %1303 = vmatpush3.bf16.msra.mxu0 %v381_v12  ;;  %1322 = vmatprep.subr.bf16.mxu1 %v1431_v3 }
   0xe   : > { %s1534_s11 = sshll.u32 %s1686_s14, 3  ;;  %1316 = vmatprep.subr.bf16.mxu0 %v1431_v3 }
   0xf   : > { %s367_s16 = scalar_lea.vmem %s1675_s1, %s1534_s11  ;;  %s363_s19 = scalar_lea.vmem %s1674_s0, %s1534_s11 }
  0x10   : > { %v374_v13 = vld [vmem:[%s367_s16] sm:$0xff]  ;;  %s371_s28 = scalar_lea.vmem %s1684_s10, %s1534_s11 }
  0x11   : > { %v433_v14 = vpack.c.bf16 %v374_v13, %v374_v13  ;;  %v1545_v15 = vld [vmem:[%s363_s19] sm:$0x3f] }
  0x12   : > { %v375_v16 = vpack.c.bf16 %v1545_v15, %v1545_v15 }
  0x13   : > { %1313 = vmatmul.mubr.msk.bf16.vlgmr.msra.gmra.mrb[0].mxu1 %vm389_vm1, %v433_v14 }
  0x14   : > { %1305 = vmatmul.mubr.msk.bf16.vlgmr.msra.gmra.mrb[0].mxu0 %vm389_vm1, %v375_v16  ;;  %1324 = vmatprep.mubr.msk.bf16.mxu1 %vm1432_vm0, %v1431_v3 }
  0x15   : > { %1318 = vmatprep.mubr.msk.bf16.mxu0 %vm1432_vm0, %v1431_v3 }
  0xe6   : > { %v484_v19 = vpop.f32.mrb[0].mxu1 }
  0xe7   : > { %v485_v20 = vadd.f32 %v1251_v17, %v484_v19  ;;  %v1314_v21 = vpop.f32.mrb[1].mxu1  ;;  %v427_v22 = vpop.f32.mrb[0].mxu0 }
  0xe8   : > { %v487_v23 = vpop.f32.mrb[2].mxu1  ;;  %v428_v24 = vadd.f32 %v1249_v18, %v427_v22  ;;  %v1306_v25 = vpop.f32.mrb[1].mxu0 }
  0xe9   : > { %v1561_v26 = vpack.c.bf16 %v485_v20, %v485_v20  ;;  %v1315_v27 = vpop.f32.mrb[3].mxu1  ;;  %v430_v28 = vpop.f32.mrb[2].mxu0 }
  0xea   : > { %v1307_v29 = vpop.f32.mrb[3].mxu0  ;;  %v1564_v30 = vpack.c.bf16 %v428_v24, %v428_v24 }
  0xeb   : > { %609 = vrot.lane.b32.xlu0 %v1561_v26, %s1433_s23  ;;  %v497_v31 = vsel %vm492_vm2, %v1561_v26, 0 }
  0xec   : > { %1317 = vmatpush3.bf16.xpose.msra.mxu0 %v497_v31 }
  0xed   : > { %1328 = vmatprep.subr.bf16.mxu0 %v1431_v3 }
  0xef   : > { %607 = vrot.lane.b32.xlu0 %v1564_v30, %s1433_s23 }
  0xf3   : > { %1319 = vmatmul.mubr.msk.bf16.vlgmr.msra.gmra.mrb[4].mxu0 %vm492_vm2, %v1564_v30 }
  0xf4   : > { %1330 = vmatprep.mubr.msk.bf16.mxu0 %vm1432_vm0, %v1431_v3 }
 0x15d   : > { %v610_v32 = vpop.permute.xlu0 %609 }
 0x15e   : > { %v615_v33 = vsel %vm492_vm2, %v610_v32, 0 }
 0x15f   : > { %1329 = vmatpush3.bf16.xpose.msra.mxu0 %v615_v33 }
 0x160   : > { %1340 = vmatprep.subr.bf16.mxu0 %v1431_v3 }
 0x161   : > { %v608_v34 = vpop.permute.xlu0 %607 }
 0x166   : > { %1331 = vmatmul.mubr.msk.bf16.vlgmr.msra.gmra.mrb[8].mxu0 %vm492_vm2, %v608_v34 }
 0x167   : > { %1342 = vmatprep.mubr.msk.bf16.mxu0 %vm1432_vm0, %v1431_v3  ;;  %1341 = vmatpush3.bf16.msra.mxu0 %v725_v1 }
 0x168   : > { %1352 = vmatprep.subr.bf16.mxu0 %v1431_v3 }
 0x1c6   : > { %v533_v35 = vpop.f32.mrb[4].mxu0 }
 0x1c7   : > { %v539_v36 = vmul.f32 0.35355338, %v533_v35  ;;  %v1320_v37 = vpop.f32.mrb[5].mxu0 }
 0x1c8   : > { %v536_v38 = vpop.f32.mrb[6].mxu0 }
 0x1c9   : > { %v1321_v39 = vpop.f32.mrb[7].mxu0  ;;  %v541_v40 = vsel %vm540_vm3, %v539_v36, -inf }
 0x1ca   : > { %542 = vmax.xlane.f32.xlu1 %v541_v40 }
 0x239   : > { %v651_v41 = vpop.f32.mrb[8].mxu0 }
 0x23a   : > { %v657_v42 = vmul.f32 0.35355338, %v651_v41  ;;  %v1332_v43 = vpop.f32.mrb[9].mxu0 }
 0x23b   : > { %v654_v44 = vpop.f32.mrb[10].mxu0 }
 0x23c   : > { %v1333_v45 = vpop.f32.mrb[11].mxu0  ;;  %v658_v46 = vsel %vm540_vm3, %v657_v42, -inf }
 0x23d   : > { %659 = vmax.xlane.f32.xlu1 %v658_v46 }
 0x24e   : > { %554 = vrot.lane.b32.xlu1 %v1561_v26, %s1434_s24 }
 0x257   : > { %v543_v47 = vpop.xlane.xlu1 %542 }
 0x258   : > { %v544_v48 = vsub.f32 %v539_v36, %v543_v47 }
 0x25a   : > { %v545_v49 = vmul.f32 1.442695, %v544_v48 }
 0x25c   : > { %1405 = vpow2.f32 %v545_v49 }
 0x266   : > { %v1406_v50 = vpop.eup %1405 }
 0x267   : > { %v547_v51 = vsel %vm540_vm3, %v1406_v50, 0.0 }
 0x268   : > { %548 = vadd.xlane.f32.xlu0 %v547_v51 }
 0x2ca   : > { %v660_v52 = vpop.xlane.xlu1 %659 }
 0x2cb   : > { %v661_v53 = vsub.f32 %v657_v42, %v660_v52 }
 0x2cd   : > { %v662_v54 = vmul.f32 1.442695, %v661_v53 }
 0x2ce   : > { %v555_v55 = vpop.permute.xlu1 %554 }
 0x2cf   : > { %1407 = vpow2.f32 %v662_v54  ;;  %v561_v56 = vsel %vm559_vm4, %v555_v55, 0 }
 0x2d0   : > { %1323 = vmatpush3.bf16.msra.mxu1 %v561_v56  ;;  %v924_v56 = vld [vmem:[%s1680_s6 + $0x10] sm:$0xff] }
 0x2d1   : > { %1334 = vmatprep.subr.bf16.mxu1 %v1431_v3 }
 0x2d9   : > { %v1408_v57 = vpop.eup %1407 }
 0x2da   : > { %v664_v58 = vsel %vm540_vm3, %v1408_v57, 0.0 }
 0x2db   : > { %665 = vadd.xlane.f32.xlu1 %v664_v58 }
 0x2ec   : > { %670 = vrot.lane.b32.xlu1 %v1561_v26, %s1435_s25 }
 0x2f0   : > { %815 = vrot.lane.b32.xlu1 %v1561_v26, %s1436_s26 }
 0x2f4   : > { %813 = vrot.lane.b32.xlu1 %v1564_v30, %s1436_s26 }
 0x2f5   : > { %v549_v59 = vpop.xlane.xlu0 %548 }
 0x2f6   : > { %1409 = vrcp.f32 %v549_v59 }
 0x300   : > { %v1410_v60 = vpop.eup %1409 }
 0x301   : > { %v551_v61 = vmul.f32 %v1410_v60, %v1406_v50 }
 0x303   : > { %v552_v62 = vpack.c.bf16 %v551_v61, %v551_v61 }
 0x305   : > { %1325 = vmatmul.mubr.msk.bf16.vlgmr.msra.gmra.mrb[4].mxu1 %vm492_vm2, %v552_v62 }
 0x306   : > { %1336 = vmatprep.mubr.msk.bf16.mxu1 %vm1432_vm0, %v1431_v3 }
 0x368   : > { %v666_v2 = vpop.xlane.xlu1 %665 }
 0x369   : > { %1411 = vrcp.f32 %v666_v2 }
 0x36c   : > { %v671_v4 = vpop.permute.xlu1 %670 }
 0x36d   : > { %v676_v5 = vsel %vm559_vm4, %v671_v4, 0 }
 0x36e   : > { %1335 = vmatpush3.bf16.msra.mxu1 %v676_v5 }
 0x36f   : > { %1346 = vmatprep.subr.bf16.mxu1 %v1431_v3 }
 0x370   : > { %v816_v18 = vpop.permute.xlu1 %815 }
 0x371   : > { %v821_v23 = vsel %vm492_vm2, %v816_v18, 0 }
 0x373   : > { %v1412_v8 = vpop.eup %1411 }
 0x374   : > { %v668_v9 = vmul.f32 %v1412_v8, %v1408_v57  ;;  %v814_v25 = vpop.permute.xlu1 %813  ;;  %v926_v57 = vpack.c.bf16 %v924_v56, %v924_v56 }
 0x376   : > { %v669_v10 = vpack.c.bf16 %v668_v9, %v668_v9  ;;  %v931_v58 = vsel %vm559_vm4, %v926_v57, 0 }
 0x378   : > { %1337 = vmatmul.mubr.msk.bf16.vlgmr.msra.gmra.mrb[8].mxu1 %vm492_vm2, %v669_v10 }
 0x379   : > { %1347 = vmatpush3.bf16.msra.mxu1 %v771_v11  ;;  %1348 = vmatprep.mubr.msk.bf16.mxu1 %vm1432_vm0, %v1431_v3 }
 0x37a   : > { %1358 = vmatprep.subr.bf16.mxu1 %v1431_v3 }
 0x3d8   : > { %v597_v12 = vpop.f32.mrb[4].mxu1 }
 0x3d9   : > { %v604_v13 = vpack.c.bf16 %v597_v12, %v597_v12  ;;  %v1326_v14 = vpop.f32.mrb[5].mxu1 }
 0x3da   : > { %v600_v16 = vpop.f32.mrb[6].mxu1 }
 0x3db   : > { %v1327_v17 = vpop.f32.mrb[7].mxu1  ;;  %1349 = vmatmul.mubr.msk.bf16.vlgmr.msra.gmra.mrb[12].mxu1 %vm492_vm2, %v604_v13 }
 0x3dc   : > { %1360 = vmatprep.mubr.msk.bf16.mxu1 %vm1432_vm0, %v1431_v3 }
 0x44b   : > { %v712_v19 = vpop.f32.mrb[8].mxu1 }
 0x44c   : > { %v719_v20 = vpack.c.bf16 %v712_v19, %v712_v19  ;;  %v1338_v21 = vpop.f32.mrb[9].mxu1 }
 0x44d   : > { %v715_v22 = vpop.f32.mrb[10].mxu1 }
 0x44e   : > { %v1339_v24 = vpop.f32.mrb[11].mxu1  ;;  %1343 = vmatmul.mubr.msk.bf16.vlgmr.msra.gmra.mrb[12].mxu0 %vm492_vm2, %v719_v20 }
 0x44f   : > { %1353 = vmatpush3.bf16.xpose.msra.mxu0 %v821_v23  ;;  %1354 = vmatprep.mubr.msk.bf16.mxu0 %vm1432_vm0, %v1431_v3 }
 0x450   : > { %1364 = vmatprep.subr.bf16.mxu0 %v1431_v3 }
 0x456   : > { %1355 = vmatmul.mubr.msk.bf16.vlgmr.msra.gmra.mrb[16].mxu0 %vm492_vm2, %v814_v25 }
 0x457   : > { %1366 = vmatprep.mubr.msk.bf16.mxu0 %vm1432_vm0, %v1431_v3  ;;  %1365 = vmatpush3.bf16.msra.mxu0 %v931_v58 }
 0x458   : > { %1376 = vmatprep.subr.bf16.mxu0 %v1431_v3 }
 0x4ae   : > { %v807_v27 = vpop.f32.mrb[12].mxu1 }
 0x4af   : > { %v1350_v28 = vpop.f32.mrb[13].mxu1 }
 0x4b0   : > { %v810_v29 = vpop.f32.mrb[14].mxu1 }
 0x4b1   : > { %v1351_v31 = vpop.f32.mrb[15].mxu1 }
 0x521   : > { %v761_v32 = vpop.f32.mrb[12].mxu0 }
 0x522   : > { %v1618_v33 = vadd.f32 %v807_v27, %v761_v32  ;;  %v1344_v34 = vpop.f32.mrb[13].mxu0 }
 0x523   : > { %v764_v35 = vpop.f32.mrb[14].mxu0 }
 0x524   : > { %v1345_v36 = vpop.f32.mrb[15].mxu0 }
 0x529   : > { %v857_v37 = vpop.f32.mrb[16].mxu0 }
 0x52a   : > { %v863_v38 = vmul.f32 0.35355338, %v857_v37  ;;  %v1356_v39 = vpop.f32.mrb[17].mxu0 }
 0x52b   : > { %v860_v40 = vpop.f32.mrb[18].mxu0 }
 0x52c   : > { %v1357_v41 = vpop.f32.mrb[19].mxu0  ;;  %v864_v42 = vsel %vm540_vm3, %v863_v38, -inf }
 0x52d   : > { %865 = vmax.xlane.f32.xlu0 %v864_v42 }
 0x543   : > { %876 = vrot.lane.b32.xlu0 %v1561_v26, %s1437_s12 }
 0x547   : > { %976 = vrot.lane.b32.xlu0 %v1561_v26, %s1438_s15 }
 0x54b   : > { %974 = vrot.lane.b32.xlu0 %v1564_v30, %s1438_s15 }
 0x5ba   : > { %v866_v43 = vpop.xlane.xlu0 %865 }
 0x5bb   : > { %v867_v44 = vsub.f32 %v863_v38, %v866_v43 }
 0x5bd   : > { %v868_v45 = vmul.f32 1.442695, %v867_v44 }
 0x5be   : > { %v877_v46 = vpop.permute.xlu0 %876 }
 0x5bf   : > { %1413 = vpow2.f32 %v868_v45  ;;  %v882_v47 = vsel %vm559_vm4, %v877_v46, 0 }
 0x5c0   : > { %1359 = vmatpush3.bf16.msra.mxu1 %v882_v47 }
 0x5c1   : > { %1370 = vmatprep.subr.bf16.mxu1 %v1431_v3 }
 0x5c2   : > { %v977_v53 = vpop.permute.xlu0 %976 }
 0x5c3   : > { %v982_v54 = vsel %vm492_vm2, %v977_v53, 0 }
 0x5c6   : > { %v975_v55 = vpop.permute.xlu0 %974 }
 0x5c9   : > { %v1414_v48 = vpop.eup %1413 }
 0x5ca   : > { %v870_v49 = vsel %vm540_vm3, %v1414_v48, 0.0 }
 0x5cb   : > { %871 = vadd.xlane.f32.xlu1 %v870_v49 }
 0x658   : > { %v872_v50 = vpop.xlane.xlu1 %871 }
 0x659   : > { %1415 = vrcp.f32 %v872_v50 }
 0x663   : > { %v1416_v51 = vpop.eup %1415 }
 0x664   : > { %v874_v52 = vmul.f32 %v1416_v51, %v1414_v48  ;;  %v1267_v51 = vld [vmem:[%s1683_s9] ss:$0 sm:$0xff] }
 0x666   : > { %v875_v30 = vpack.c.bf16 %v874_v52, %v874_v52 }
 0x668   : > { %1361 = vmatmul.mubr.msk.bf16.vlgmr.msra.gmra.mrb[16].mxu1 %vm492_vm2, %v875_v30 }
 0x669   : > { %1371 = vmatpush3.bf16.xpose.msra.mxu1 %v982_v54  ;;  %1372 = vmatprep.mubr.msk.bf16.mxu1 %vm1432_vm0, %v1431_v3 }
 0x66a   : > { %1382 = vmatprep.subr.bf16.mxu1 %v1431_v3 }
 0x670   : > { %1373 = vmatmul.mubr.msk.bf16.vlgmr.msra.gmra.mrb[20].mxu1 %vm492_vm2, %v975_v55 }
 0x671   : > { %1384 = vmatprep.mubr.msk.bf16.mxu1 %vm1432_vm0, %v1431_v3 }
 0x73b   : > { %v918_v59 = vpop.f32.mrb[16].mxu1 }
 0x73c   : > { %v925_v60 = vpack.c.bf16 %v918_v59, %v918_v59  ;;  %v1362_v61 = vpop.f32.mrb[17].mxu1 }
 0x73d   : > { %v921_v62 = vpop.f32.mrb[18].mxu1 }
 0x73e   : > { %v1363_v63 = vpop.f32.mrb[19].mxu1  ;;  %1367 = vmatmul.mubr.msk.bf16.vlgmr.msra.gmra.mrb[20].mxu0 %vm492_vm2, %v925_v60 }
 0x73f   : > { %1378 = vmatprep.mubr.msk.bf16.mxu0 %vm1432_vm0, %v1431_v3  ;;  %v1085_v3 = vld [vmem:[%s1680_s6 + $0x18] sm:$0xff] }
 0x740   : > { %v1087_v12 = vpack.c.bf16 %v1085_v3, %v1085_v3 }
 0x742   : > { %v1092_v13 = vsel %vm559_vm4, %v1087_v12, 0 }
 0x743   : > { %v1018_v0 = vpop.f32.mrb[20].mxu1  ;;  %1383 = vmatpush3.bf16.msra.mxu1 %v1092_v13 }
 0x744   : > { %v1024_v1 = vmul.f32 0.35355338, %v1018_v0  ;;  %v1374_v2 = vpop.f32.mrb[21].mxu1 }
 0x745   : > { %v1021_v4 = vpop.f32.mrb[22].mxu1 }
 0x746   : > { %v1375_v5 = vpop.f32.mrb[23].mxu1  ;;  %v1025_v6 = vsel %vm540_vm3, %v1024_v1, -inf }
 0x747   : > { %1026 = vmax.xlane.f32.xlu0 %v1025_v6 }
 0x7d4   : > { %v1027_v7 = vpop.xlane.xlu0 %1026 }
 0x7d5   : > { %v1028_v8 = vsub.f32 %v1024_v1, %v1027_v7 }
 0x7d7   : > { %v1029_v9 = vmul.f32 1.442695, %v1028_v8 }
 0x7d9   : > { %1417 = vpow2.f32 %v1029_v9 }
 0x7e3   : > { %v1418_v10 = vpop.eup %1417 }
 0x7e4   : > { %v1031_v11 = vsel %vm540_vm3, %v1418_v10, 0.0 }
 0x7e5   : > { %1032 = vadd.xlane.f32.xlu1 %v1031_v11 }
 0x7f6   : > { %1037 = vrot.lane.b32.xlu1 %v1561_v26, %s1439_s18 }
 0x811   : > { %v967_v14 = vpop.f32.mrb[20].mxu0 }
 0x812   : > { %v973_v16 = vadd.f32 %v967_v14, %v1618_v33  ;;  %v1368_v17 = vpop.f32.mrb[21].mxu0  ;;  %v1265_v33 = vld [vmem:[%s1681_s7] ss:$0 sm:$0xff] }
 0x813   : > { %v970_v18 = vpop.f32.mrb[22].mxu0 }
 0x814   : > { %v1369_v19 = vpop.f32.mrb[23].mxu0 }
 0x872   : > { %v1033_v20 = vpop.xlane.xlu1 %1032 }
 0x873   : > { %1419 = vrcp.f32 %v1033_v20 }
 0x876   : > { %v1038_v21 = vpop.permute.xlu1 %1037 }
 0x877   : > { %v1043_v22 = vsel %vm559_vm4, %v1038_v21, 0 }
 0x878   : > { %1377 = vmatpush3.bf16.msra.mxu0 %v1043_v22 }
 0x87d   : > { %v1420_v26 = vpop.eup %1419 }
 0x87e   : > { %v1035_v23 = vmul.f32 %v1420_v26, %v1418_v10 }
 0x880   : > { %v1036_v24 = vpack.c.bf16 %v1035_v23, %v1035_v23 }
 0x882   : > { %1379 = vmatmul.mubr.msk.bf16.vlgmr.msra.gmra.mrb[24].mxu0 %vm492_vm2, %v1036_v24 }
 0x955   : > { %v1079_v25 = vpop.f32.mrb[24].mxu0 }
 0x956   : > { %v1086_v27 = vpack.c.bf16 %v1079_v25, %v1079_v25  ;;  %v1380_v28 = vpop.f32.mrb[25].mxu0 }
 0x957   : > { %v1082_v29 = vpop.f32.mrb[26].mxu0 }
 0x958   : > { %v1381_v31 = vpop.f32.mrb[27].mxu0  ;;  %1385 = vmatmul.mubr.msk.bf16.vlgmr.msra.gmra.mrb[24].mxu1 %vm492_vm2, %v1086_v27 }
 0xa2b   : > { %v1128_v32 = vpop.f32.mrb[24].mxu1 }
 0xa2c   : > { %v1134_v34 = vadd.f32 %v1128_v32, %v973_v16  ;;  %v1386_v35 = vpop.f32.mrb[25].mxu1 }
 0xa2d   : > { %v1131_v36 = vpop.f32.mrb[26].mxu1 }
 0xa2e   : > { %v1142_v37 = vadd.f32 %v1265_v33, %v1134_v34  ;;  %v1387_v38 = vpop.f32.mrb[27].mxu1 }
 0xa30   : > { %v1143_v39 = vadd.f32 %v1142_v37, %v1545_v15  ;;  %v1266_v15 = vld [vmem:[%s1682_s8] ss:$0 sm:$0xff] }
 0xa32   : > { %v1147_v40 = vsel %vm1146_vm5, %v1143_v39, 0.0 }
 0xa33   : > { %1148 = vadd.xlane.f32.xlu1 %v1147_v40 }
 0xac0   : > { %v1149_v41 = vpop.xlane.xlu1 %1148 }
 0xac1   : > { %v1151_v42 = vmul.f32 0.03125, %v1149_v41 }
 0xac3   : > { %v1152_v43 = vsub.f32 %v1143_v39, %v1151_v42 }
 0xac5   : > { %v1153_v44 = vmul.f32 %v1152_v43, %v1152_v43 }
 0xac7   : > { %v1154_v45 = vsel %vm1146_vm5, %v1153_v44, 0.0 }
 0xac8   : > { %1155 = vadd.xlane.f32.xlu0 %v1154_v45 }
 0xb55   : > { %v1156_v46 = vpop.xlane.xlu0 %1155 }
 0xb56   : > { %v1157_v47 = vmul.f32 0.03125, %v1156_v46 }
 0xb58   : > { %v1158_v48 = vadd.f32 1e-05, %v1157_v47 }
 0xb5a   : > { %1421 = vrsqrt.f32 %v1158_v48 }
 0xb64   : > { %v1422_v49 = vpop.eup %1421 }
 0xb65   : > { %v1160_v50 = vmul.f32 %v1422_v49, %v1152_v43 }
 0xb67   : > { %v1167_v52 = vmul.f32 %v1266_v15, %v1160_v50 }
 0xb69   : > { %v1174_v53 = vadd.f32 %v1267_v51, %v1167_v52 }
 0xb6b   : > { %1175 = vst.msk [vmem:[%s371_s28] sm:$0x3f] %vm1146_vm5, %v1174_v53 }
 0xb6c PF: > { %s20_s13 = sadd.s32 1, %s1429_s13  }
 0xb6d   : > { %p17_p4 = scmp.ge.s32.totalorder %s20_s13, 4  }
 0xb6f   :  { %19 = sbr.rel (!%p17_p4) target bundleno = 1 (0x1), region = 93 }

// kernel: transformer_forward.19
= control target key start
LH: loop header
LB: loop body
LE: loop exit
PB: predicated region body
PF: predicated region fallthrough
CT: control target
= control target key end

     0   :  { %s590_s24 = smov 0   ;;  %s665_s0 = inlined_call_operand.vmem [shape: f32[2,6,32], index: 0, kind: input, shape index: {}]   ;;  %s666_s1 = inlined_call_operand.vmem [shape: f32[32,64], index: 1, kind: input, shape index: {}]   ;;  %s667_s2 = inlined_call_operand.vmem [shape: f32[1,64], index: 2, kind: input, shape index: {}]   ;;  %s668_s3 = inlined_call_operand.vmem [shape: f32[64,32], index: 3, kind: input, shape index: {}]   ;;  %s669_s4 = inlined_call_operand.vmem [shape: f32[1,32], index: 4, kind: input, shape index: {}]   ;;  %s670_s5 = inlined_call_operand.vmem [shape: f32[1,32], index: 5, kind: input, shape index: {}]   ;;  %s671_s6 = inlined_call_operand.vmem [shape: f32[1,32], index: 6, kind: input, shape index: {}]   ;;  %s672_s7 = inlined_call_operand.vmem [shape: f32[2,6,32], index: 7, kind: output, shape index: {}]  }
   0x1 LB: > { %s485_s25 = sadd.s32 4294967295, %s546_s24   ;;  %p489_p0 = scmp.ge.s32.totalorder %s546_s24, 1  ;;  %s546_s24 = sphi %s590_s24, %s17_s24  }
   0x2   : > { %p236_p1 = scmp.lt.s32.totalorder %s546_s24, 3 }
   0x4   : > { %p237_p2 = pnand %p489_p0, %p236_p1 }
   0x5   : > { %v277_v0 = vld [vmem:[%s666_s1] sm:$0xff] (!%p237_p2)  ;;  %v278_v1 = vld [vmem:[%s666_s1 + $0x8] sm:$0xff] (!%p237_p2)  ;;  %v279_v2 = vld [vmem:[%s666_s1 + $0x10] sm:$0xff] (!%p237_p2)  ;;  %p266_p3 = scmp.lt.s32.totalorder (!%p237_p2), %s485_s25, 1  ;;  %v548_v3 = vmov (!%p237_p2), 0.0   ;;  %vm549_vm0 = vmmov (!%p237_p2), 0  }
   0x6   : > { %240 = sbr.rel (%p237_p2) target bundleno = 767 (0x2ff), region = 48  ;;  %508 = vmatprep.subr.bf16.mxu0 (!%p237_p2), %v548_v3  ;;  %v281_v4 = vpack.c.bf16 (!%p237_p2), %v278_v1, %v277_v0  ;;  %v280_v5 = vld [vmem:[%s666_s1 + $0x18] sm:$0xff] (!%p237_p2)  ;;  %512 = vmatprep.mubr.msk.bf16.mxu0 (!%p237_p2), %vm549_vm0, %v548_v3  ;;  %v336_v6 = vld [vmem:[%s668_s3] sm:$0xff] (!%p237_p2)  ;;  %v337_v7 = vld [vmem:[%s668_s3 + $0x8] sm:$0xff] (!%p237_p2)  ;;  %vm290_vm1 = vcmask (!%p237_p2), 261120   ;;  %vm355_vm2 = vcmask (!%p237_p2), 523264  }
   0x7   : > { %516 = vmatprep.subr.bf16.mxu1 (!%p237_p2), %v548_v3  ;;  %v344_v8 = vpack.c.bf16 (!%p237_p2), %v337_v7, %v336_v6  ;;  %v338_v9 = vld [vmem:[%s668_s3 + $0x10] sm:$0xff] (!%p237_p2)  ;;  %v339_v10 = vld [vmem:[%s668_s3 + $0x18] sm:$0xff] (!%p237_p2)  ;;  %524 = vmatprep.mubr.msk.bf16.mxu1 (!%p237_p2), %vm549_vm0, %v548_v3  ;;  %v282_v11 = vpack.c.bf16 (!%p237_p2), %v280_v5, %v279_v2  ;;  %v340_v15 = vld [vmem:[%s668_s3 + $0x20] sm:$0xff] (!%p237_p2)  ;;  %vm402_vm3 = vcmask (!%p237_p2), 259072  }
   0x8   : > { %509 = vmatpush3.bf16.msra.mxu0 (!%p237_p2), %v281_v4  ;;  %v345_v12 = vpack.c.bf16 (!%p237_p2), %v339_v10, %v338_v9  ;;  %v341_v16 = vld [vmem:[%s668_s3 + $0x28] sm:$0xff] (!%p237_p2)  ;;  %v342_v18 = vld [vmem:[%s668_s3 + $0x30] sm:$0xff] (!%p237_p2)  ;;  %v343_v19 = vld [vmem:[%s668_s3 + $0x38] sm:$0xff] (!%p237_p2) }
   0x9   : > { %510 = vmatprep.subr.bf16.mxu0 (!%p237_p2), %v548_v3  ;;  %517 = vmatpush3.bf16.msra.mxu1 (!%p237_p2), %v344_v8  ;;  %v346_v17 = vpack.c.bf16 (!%p237_p2), %v341_v16, %v340_v15  ;;  %v347_v20 = vpack.c.bf16 (!%p237_p2), %v343_v19, %v342_v18  ;;  %v492_v21 = vld [vmem:[%s667_s2] ss:$0 sm:$0xff] (!%p237_p2) }
   0xa   : > { %518 = vmatprep.subr.bf16.mxu1 (!%p237_p2), %v548_v3  ;;  %v494_v29 = vld [vmem:[%s669_s4] ss:$0 sm:$0xff] (!%p237_p2) }
   0xb   : > { %v496_v46 = vld [vmem:[%s670_s5] ss:$0 sm:$0xff] (!%p237_p2) }
   0xc   : > { %511 = vmatpush3.bf16.msra.mxu0 (!%p237_p2), %v282_v11  ;;  %v497_v48 = vld [vmem:[%s671_s6] ss:$0 sm:$0xff] (!%p237_p2) }
   0xd   : > { %s674_s25 = smov (!%p266_p3, %s485_s25), 1  ;;  %519 = vmatpush3.bf16.msra.mxu1 %v345_v12 }
   0xe   : > { %s490_s19 = sshll.u32 %s674_s25, 3  ;;  %520 = vmatprep.subr.bf16.mxu1 %v548_v3 }
   0xf   : > { %s269_s22 = scalar_lea.vmem %s665_s0, %s490_s19  ;;  %s273_s21 = scalar_lea.vmem %s672_s7, %s490_s19 }
  0x10   : > { %v275_v13 = vld [vmem:[%s269_s22] sm:$0x3f] }
  0x11   : > { %v276_v14 = vpack.c.bf16 %v275_v13, %v275_v13  ;;  %521 = vmatpush3.bf16.msra.mxu1 %v346_v17 }
  0x12   : > { %522 = vmatprep.subr.bf16.mxu1 %v548_v3 }
  0x13   : > { %513 = vmatmul.mubr.msk.bf16.vlgmr.msra.gmra.mrb[0].mxu0 %vm290_vm1, %v276_v14 }
  0x15   : > { %523 = vmatpush3.bf16.msra.mxu1 %v347_v20 }
  0xe6   : > { %v328_v22 = vpop.f32.mrb[0].mxu0 }
  0xe7   : > { %v329_v23 = vadd.f32 %v492_v21, %v328_v22  ;;  %v514_v24 = vpop.f32.mrb[1].mxu0 }
  0xe8   : > { %v331_v25 = vpop.f32.mrb[2].mxu0 }
  0xe9   : > { %v334_v26 = vmax.f32 %v329_v23, 0.0  ;;  %v515_v27 = vpop.f32.mrb[3].mxu0 }
  0xeb   : > { %v335_v28 = vpack.c.bf16 %v334_v26, %v334_v26 }
  0xed   : > { %525 = vmatmul.mubr.msk.bf16.vlgmr.msra.gmra.mrb[0].mxu1 %vm355_vm2, %v335_v28 }
 0x1c0   : > { %v393_v30 = vpop.f32.mrb[0].mxu1 }
 0x1c1   : > { %v394_v31 = vadd.f32 %v494_v29, %v393_v30  ;;  %v526_v32 = vpop.f32.mrb[1].mxu1 }
 0x1c2   : > { %v396_v33 = vpop.f32.mrb[2].mxu1 }
 0x1c3   : > { %v527_v34 = vpop.f32.mrb[3].mxu1  ;;  %v399_v35 = vadd.f32 %v394_v31, %v275_v13 }
 0x1c5   : > { %v403_v36 = vsel %vm402_vm3, %v399_v35, 0.0 }
 0x1c6   : > { %404 = vadd.xlane.f32.xlu0 %v403_v36 }
 0x253   : > { %v405_v37 = vpop.xlane.xlu0 %404 }
 0x254   : > { %v407_v38 = vmul.f32 0.03125, %v405_v37 }
 0x256   : > { %v408_v39 = vsub.f32 %v399_v35, %v407_v38 }
 0x258   : > { %v409_v40 = vmul.f32 %v408_v39, %v408_v39 }
 0x25a   : > { %v410_v41 = vsel %vm402_vm3, %v409_v40, 0.0 }
 0x25b   : > { %411 = vadd.xlane.f32.xlu0 %v410_v41 }
 0x2e8   : > { %v412_v42 = vpop.xlane.xlu0 %411 }
 0x2e9   : > { %v413_v43 = vmul.f32 0.03125, %v412_v42 }
 0x2eb   : > { %v414_v44 = vadd.f32 1e-05, %v413_v43 }
 0x2ed   : > { %538 = vrsqrt.f32 %v414_v44 }
 0x2f7   : > { %v539_v45 = vpop.eup %538 }
 0x2f8   : > { %v416_v47 = vmul.f32 %v539_v45, %v408_v39 }
 0x2fa   : > { %v423_v49 = vmul.f32 %v496_v46, %v416_v47 }
 0x2fc   : > { %v430_v50 = vadd.f32 %v497_v48, %v423_v49 }
 0x2fe   : > { %431 = vst.msk [vmem:[%s273_s21] sm:$0x3f] %vm402_vm3, %v430_v50 }
 0x2ff PF: > { %s17_s24 = sadd.s32 1, %s546_s24  }
 0x300   : > { %p14_p4 = scmp.ge.s32.totalorder %s17_s24, 4  }
 0x302   :  { %16 = sbr.rel (!%p14_p4) target bundleno = 1 (0x1), region = 78 }

// kernel: transformer_forward.23
= control target key start
LH: loop header
LB: loop body
LE: loop exit
PB: predicated region body
PF: predicated region fallthrough
CT: control target
= control target key end

     0   :  { %s301_s12 = smov 0   ;;  %s327_s0 = inlined_call_operand.vmem [shape: f32[2,6,32], index: 0, kind: input, shape index: {}]   ;;  %s328_s1 = inlined_call_operand.vmem [shape: f32[1,32], index: 1, kind: input, shape index: {}]   ;;  %s329_s2 = inlined_call_operand.vmem [shape: f32[1,32], index: 2, kind: input, shape index: {}]   ;;  %s330_s3 = inlined_call_operand.vmem [shape: f32[2,6,32], index: 3, kind: output, shape index: {}]  }
   0x1 LB: > { %s252_s13 = sadd.s32 4294967295, %s279_s12   ;;  %p256_p0 = scmp.ge.s32.totalorder %s279_s12, 1  ;;  %s279_s12 = sphi %s301_s12, %s13_s12  }
   0x2   : > { %p136_p1 = scmp.lt.s32.totalorder %s279_s12, 3 }
   0x4   : > { %p137_p2 = pnand %p256_p0, %p136_p1 }
   0x5   : > { %p158_p3 = scmp.lt.s32.totalorder (!%p137_p2), %s252_s13, 1  ;;  %vm169_vm0 = vcmask (!%p137_p2), 259072   ;;  %v259_v11 = vld [vmem:[%s328_s1] ss:$0 sm:$0xff] (!%p137_p2) }
   0x6   : > { %140 = sbr.rel (%p137_p2) target bundleno = 331 (0x14b), region = 32  ;;  %v260_v13 = vld [vmem:[%s329_s2] ss:$0 sm:$0xff] (!%p137_p2) }
   0xd   : > { %s332_s13 = smov (!%p158_p3, %s252_s13), 1 }
   0xe   : > { %s257_s14 = sshll.u32 %s332_s13, 3 }
   0xf   : > { %s161_s17 = scalar_lea.vmem %s327_s0, %s257_s14  ;;  %s165_s24 = scalar_lea.vmem %s330_s3, %s257_s14 }
  0x10   : > { %v166_v0 = vld [vmem:[%s161_s17] sm:$0x3f] }
  0x11   : > { %v170_v1 = vsel %vm169_vm0, %v166_v0, 0.0 }
  0x12   : > { %171 = vadd.xlane.f32.xlu0 %v170_v1 }
  0x9f   : > { %v172_v2 = vpop.xlane.xlu0 %171 }
  0xa0   : > { %v174_v3 = vmul.f32 0.03125, %v172_v2 }
  0xa2   : > { %v175_v4 = vsub.f32 %v166_v0, %v174_v3 }
  0xa4   : > { %v176_v5 = vmul.f32 %v175_v4, %v175_v4 }
  0xa6   : > { %v177_v6 = vsel %vm169_vm0, %v176_v5, 0.0 }
  0xa7   : > { %178 = vadd.xlane.f32.xlu0 %v177_v6 }
 0x134   : > { %v179_v7 = vpop.xlane.xlu0 %178 }
 0x135   : > { %v180_v8 = vmul.f32 0.03125, %v179_v7 }
 0x137   : > { %v181_v9 = vadd.f32 1e-05, %v180_v8 }
 0x139   : > { %271 = vrsqrt.f32 %v181_v9 }
 0x143   : > { %v272_v10 = vpop.eup %271 }
 0x144   : > { %v183_v12 = vmul.f32 %v272_v10, %v175_v4 }
 0x146   : > { %v190_v14 = vmul.f32 %v259_v11, %v183_v12 }
 0x148   : > { %v197_v15 = vadd.f32 %v260_v13, %v190_v14 }
 0x14a   : > { %198 = vst.msk [vmem:[%s165_s24] sm:$0x3f] %vm169_vm0, %v197_v15 }
 0x14b PF: > { %s13_s12 = sadd.s32 1, %s279_s12  }
 0x14c   : > { %p10_p4 = scmp.ge.s32.totalorder %s13_s12, 4  }
 0x14e   :  { %12 = sbr.rel (!%p10_p4) target bundleno = 1 (0x1), region = 62 }

</bundles_post_ra>
